<compile_context>
chip_gen: v7x
topology: tpu7x:2x2x1
jax: 0.10.0
libtpu: 0.0.40
codegen_flags: <defaults>
</compile_context>

<pallas_src>
import functools

import numpy as np
import jax
import jax.numpy as jnp
from jax.experimental import pallas as pl
from jax.experimental.pallas import tpu as pltpu

BN_EPS = 1e-5


def _round_up(v, m):
    return (v + m - 1) // m * m


def _space_to_depth(xp, s, hq, wq):
    """(N, Hp, Wp, C) padded image -> (N*s*s, hq, wq, C) stride-phase planes.

    Pure permutation (plus zero fill), no replication: plane (a, b) holds
    xp[:, a::s, b::s, :], so a stride-s conv tap becomes a unit-stride slice.
    """
    n = xp.shape[0]
    planes = []
    for a in range(s):
        for b in range(s):
            sub = xp[:, a::s, b::s, :][:, :hq, :wq, :]
            dh, dw = hq - sub.shape[1], wq - sub.shape[2]
            if dh or dw:
                sub = jnp.pad(sub, ((0, 0), (0, dh), (0, dw), (0, 0)))
            planes.append(sub)
    xq = jnp.stack(planes, axis=1)                      # (N, s*s, hq, wq, C)
    return xq.reshape(n * s * s, hq, wq, xp.shape[-1])


def _residual_block_kernel(xq_ref, w1_ref, w2_ref, wd_ref, gam_ref, bet_ref,
                           out_ref,
                           h_scr, fpad_scr, s_sum, s_sq, bn_a, bn_b,
                           *, ksz, stride, pad, oh, ow, inv_m, c7):
    """Fused residual block.  grid = (3 phases, N images).

    xq_ref:   (s*s, hq, wq, Cin_p)  bf16 stride-phase planes of padded x (one image)
    w1_ref:   (k*k, Cin_p, Cp)      bf16 conv1 weight, one (ci, co) matrix per tap
    w2_ref:   (k*k, Cp, Cp)         bf16 conv2 weight per tap
    wd_ref:   (Cin_p, Cp)           bf16 1x1 down_sample weight (unused if stride==1)
    gam/bet:  (1, Cp)               f32 BatchNorm affine params (zero padded)
    out_ref:  (1, oh*ow, Cp)        f32 output rows for this image
    h_scr:    (N, oh*ow, Cp)        f32 holds conv1 output, then h (pre-BN2)
    fpad_scr: (oh+2p, >=ow+2p, Cp)  bf16 zero-padded f for conv2's spatial taps
    s_sum/s_sq/bn_a/bn_b: (1, Cp)   f32 BN stat accumulators / fused scale & shift
    """
    ph = pl.program_id(0)
    bi = pl.program_id(1)
    cpad = out_ref.shape[-1]
    m_rows = oh * ow
    f32 = jnp.float32

    @pl.when((ph == 0) & (bi == 0))
    def _init():
        fpad_scr[...] = jnp.zeros_like(fpad_scr)     # zero border stays zero forever
        s_sum[...] = jnp.zeros_like(s_sum)
        s_sq[...] = jnp.zeros_like(s_sq)

    def finalize_bn():
        if c7:                                        # no BatchNorm in c7 mode
            bn_a[...] = jnp.ones_like(bn_a)
            bn_b[...] = jnp.zeros_like(bn_b)
        else:
            mean = s_sum[...] * inv_m
            var = s_sq[...] * inv_m - mean * mean     # biased var (train-mode BN)
            scale = gam_ref[...] * jax.lax.rsqrt(var + BN_EPS)
            bn_a[...] = scale
            bn_b[...] = bet_ref[...] - mean * scale
            s_sum[...] = jnp.zeros_like(s_sum)        # reset for the next BN
            s_sq[...] = jnp.zeros_like(s_sq)

    def accum_stats(v2d):                             # v2d: (m_rows, Cp) f32
        if not c7:
            s_sum[...] += jnp.sum(v2d, axis=0, keepdims=True)
            s_sq[...] += jnp.sum(v2d * v2d, axis=0, keepdims=True)

    # ---------------- phase 0: conv1, BN1 stats ----------------
    @pl.when(ph == 0)
    def _phase0():
        acc = jnp.zeros((m_rows, cpad), f32)
        for kh in range(ksz):
            for kw in range(ksz):
                a, qh = kh % stride, kh // stride
                b, qw = kw % stride, kw // stride
                tap = xq_ref[a * stride + b, qh:qh + oh, qw:qw + ow, :]
                tap = tap.reshape(m_rows, tap.shape[-1])
                acc = acc + jnp.dot(tap, w1_ref[kh * ksz + kw],
                                    preferred_element_type=f32)
        h_scr[bi] = acc
        accum_stats(acc)

    # -------- phase 1: BN1+ReLU, conv2, identity, BN2 stats --------
    @pl.when(ph == 1)
    def _phase1():
        @pl.when(bi == 0)
        def _():
            finalize_bn()                             # BN1 scale/shift from phase-0 stats

        out1 = h_scr[bi]                              # (m_rows, Cp) f32
        f = jnp.maximum(out1 * bn_a[...] + bn_b[...], 0.0)
        fpad_scr[pad:pad + oh, pad:pad + ow, :] = (
            f.reshape(oh, ow, cpad).astype(fpad_scr.dtype))

        acc = jnp.zeros((m_rows, cpad), f32)
        for kh in range(ksz):
            for kw in range(ksz):
                tap = fpad_scr[kh:kh + oh, kw:kw + ow, :]
                tap = tap.reshape(m_rows, cpad)
                acc = acc + jnp.dot(tap, w2_ref[kh * ksz + kw],
                                    preferred_element_type=f32)

        # identity / 1x1 stride-s down_sample from the same stride-phase planes
        po, qo = pad % stride, pad // stride
        xid = xq_ref[po * stride + po, qo:qo + oh, qo:qo + ow, :]
        xid = xid.reshape(m_rows, xid.shape[-1])
        if stride != 1:
            ident = jnp.dot(xid, wd_ref[...], preferred_element_type=f32)
        else:
            ident = xid.astype(f32)                   # direct add (Cin_p == Cp here)

        hv = acc + ident
        h_scr[bi] = hv                                # overwrite: out1 no longer needed
        accum_stats(hv)

    # ---------------- phase 2: BN2 + ReLU, write output ----------------
    @pl.when(ph == 2)
    def _phase2():
        @pl.when(bi == 0)
        def _():
            finalize_bn()                             # BN2 scale/shift from phase-1 stats
        hv = h_scr[bi]
        y = jnp.maximum(hv * bn_a[...] + bn_b[...], 0.0)
        out_ref[0] = y.astype(out_ref.dtype)


def residual_block_forward(x_nchw, w1, w2, wd, gamma, beta, *,
                           stride, padding, c7=False):
    n, cin, h, w = x_nchw.shape
    cout, w1_cin, ksz, ksz2 = w1.shape
    assert ksz == ksz2 and w1_cin == cin
    # conv2 (stride 1, same padding) must preserve spatial size so f + identity works.
    assert 2 * padding == ksz - 1, "requires 2*padding == kernel_size - 1"
    if stride == 1:
        assert cin == cout, "stride==1 identity shortcut needs in_channels == out_channels"

    oh = (h + 2 * padding - ksz) // stride + 1
    ow = (w + 2 * padding - ksz) // stride + 1
    taps = ksz * ksz

    cpad = _round_up(cout, 128)                       # lane-dense channels
    cin_p = cpad if stride == 1 else _round_up(cin, 8)

    hq = oh + (ksz - 1) // stride
    wq = ow + (ksz - 1) // stride

    # --- glue: pad + stride-phase re-layout of x (no replication), bf16 ---
    x = jnp.transpose(x_nchw, (0, 2, 3, 1)).astype(jnp.float32)
    x = jnp.pad(x, ((0, 0), (padding, padding), (padding, padding),
                    (0, cin_p - cin)))
    xq = _space_to_depth(x, stride, hq, wq).astype(jnp.bfloat16)

    # --- glue: weights into per-tap (ci, co) matmul layout, zero padded, bf16 ---
    w1q = jnp.zeros((taps, cin_p, cpad), jnp.float32)
    w1q = w1q.at[:, :cin, :cout].set(
        jnp.transpose(w1, (2, 3, 1, 0)).reshape(taps, cin, cout)).astype(jnp.bfloat16)
    w2q = jnp.zeros((taps, cpad, cpad), jnp.float32)
    w2q = w2q.at[:, :cout, :cout].set(
        jnp.transpose(w2, (2, 3, 1, 0)).reshape(taps, cout, cout)).astype(jnp.bfloat16)
    wdq = jnp.zeros((cin_p, cpad), jnp.float32)
    if stride != 1:
        wdq = wdq.at[:cin, :cout].set(jnp.asarray(wd)[:, :, 0, 0].T)
    wdq = wdq.astype(jnp.bfloat16)

    g = jnp.zeros((1, cpad), jnp.float32).at[0, :cout].set(
        jnp.asarray(gamma, jnp.float32))
    b = jnp.zeros((1, cpad), jnp.float32).at[0, :cout].set(
        jnp.asarray(beta, jnp.float32))

    kernel = functools.partial(
        _residual_block_kernel, ksz=ksz, stride=stride, pad=padding,
        oh=oh, ow=ow, inv_m=1.0 / float(n * oh * ow), c7=c7)

    fpad_w = _round_up(ow + 2 * padding, 8)           # sublane-aligned scratch width

    out = pl.pallas_call(
        kernel,
        out_shape=jax.ShapeDtypeStruct((n, oh * ow, cpad), jnp.float32),
        grid=(3, n),                                  # (phase, image)
        in_specs=[
            pl.BlockSpec((stride * stride, hq, wq, cin_p),
                         lambda ph, i: (i, 0, 0, 0)),
            pl.BlockSpec((taps, cin_p, cpad), lambda ph, i: (0, 0, 0)),
            pl.BlockSpec((taps, cpad, cpad), lambda ph, i: (0, 0, 0)),
            pl.BlockSpec((cin_p, cpad), lambda ph, i: (0, 0)),
            pl.BlockSpec((1, cpad), lambda ph, i: (0, 0)),
            pl.BlockSpec((1, cpad), lambda ph, i: (0, 0)),
        ],
        out_specs=pl.BlockSpec((1, oh * ow, cpad), lambda ph, i: (i, 0, 0)),
        scratch_shapes=[
            pltpu.VMEM((n, oh * ow, cpad), jnp.float32),            # out1 / h
            pltpu.VMEM((oh + 2 * padding, fpad_w, cpad), jnp.bfloat16),  # padded f
            pltpu.VMEM((1, cpad), jnp.float32),                     # sum
            pltpu.VMEM((1, cpad), jnp.float32),                     # sum of squares
            pltpu.VMEM((1, cpad), jnp.float32),                     # BN scale
            pltpu.VMEM((1, cpad), jnp.float32),                     # BN shift
        ],
        compiler_params=pltpu.CompilerParams(
            dimension_semantics=("arbitrary", "arbitrary"),
            vmem_limit_bytes=32 * 1024 * 1024),
    )(xq, w1q, w2q, wdq, g, b)

    out = out.reshape(n, oh, ow, cpad)[:, :, :, :cout]
    return jnp.transpose(out, (0, 3, 1, 2))           # NCHW


def _reference_forward(x, w1, w2, wd, gamma, beta, *, stride, padding, c7=False):
    """Pure-JAX (XLA conv) reference mirroring the PyTorch module."""
    dn = ("NCHW", "OIHW", "NCHW")

    def conv(inp, wt, s, p):
        return jax.lax.conv_general_dilated(
            inp, wt, (s, s), [(p, p), (p, p)], dimension_numbers=dn)

    def bn(v):
        mean = v.mean(axis=(0, 2, 3), keepdims=True)
        var = ((v - mean) ** 2).mean(axis=(0, 2, 3), keepdims=True)
        return ((v - mean) / jnp.sqrt(var + BN_EPS)
                * gamma.reshape(1, -1, 1, 1) + beta.reshape(1, -1, 1, 1))

    out1 = conv(x, w1, stride, padding)
    f = jax.nn.relu(out1 if c7 else bn(out1))
    f = conv(f, w2, 1, padding)
    identity = conv(x, wd, stride, 0) if stride != 1 else x
    h = f + identity
    if not c7:
        h = bn(h)
    return jax.nn.relu(h)


if __name__ == "__main__":
    key = jax.random.PRNGKey(0)

    # Config A: ResidualBlock(4, 8, 3, stride=2, padding=1, c7=False)
    #           -> down_sample conv + both BatchNorms.
    N, CIN, H, W = 2, 4, 16, 16
    COUT, K, STRIDE, PAD = 8, 3, 2, 1
    k1, k2, k3, k4, k5, k6, k7 = jax.random.split(key, 7)
    x = jax.random.normal(k1, (N, CIN, H, W), jnp.float32)
    w1 = 0.2 * jax.random.normal(k2, (COUT, CIN, K, K), jnp.float32)
    w2 = 0.2 * jax.random.normal(k3, (COUT, COUT, K, K), jnp.float32)
    wd = 0.2 * jax.random.normal(k4, (COUT, CIN, 1, 1), jnp.float32)
    gamma = 1.0 + 0.1 * jax.random.normal(k5, (COUT,), jnp.float32)
    beta = 0.1 * jax.random.normal(k6, (COUT,), jnp.float32)

    out = residual_block_forward(x, w1, w2, wd, gamma, beta,
                                 stride=STRIDE, padding=PAD, c7=False)
    out = jax.block_until_ready(out)
    ref = _reference_forward(x, w1, w2, wd, gamma, beta,
                             stride=STRIDE, padding=PAD, c7=False)
    np.testing.assert_allclose(np.asarray(out), np.asarray(ref),
                               rtol=3e-2, atol=3e-2)

    # Config B: ResidualBlock(8, 8, 3, stride=1, padding=1, c7=True)
    #           -> identity shortcut, no BatchNorm.
    N2, C2, H2, W2 = 2, 8, 8, 8
    j1, j2, j3, j4, j5 = jax.random.split(k7, 5)
    x2 = jax.random.normal(j1, (N2, C2, H2, W2), jnp.float32)
    w1b = 0.2 * jax.random.normal(j2, (C2, C2, K, K), jnp.float32)
    w2b = 0.2 * jax.random.normal(j3, (C2, C2, K, K), jnp.float32)
    g2 = 1.0 + 0.1 * jax.random.normal(j4, (C2,), jnp.float32)
    b2 = 0.1 * jax.random.normal(j5, (C2,), jnp.float32)

    out2 = residual_block_forward(x2, w1b, w2b, None, g2, b2,
                                  stride=1, padding=PAD, c7=True)
    out2 = jax.block_until_ready(out2)
    ref2 = _reference_forward(x2, w1b, w2b, None, g2, b2,
                              stride=1, padding=PAD, c7=True)
    np.testing.assert_allclose(np.asarray(out2), np.asarray(ref2),
                               rtol=3e-2, atol=3e-2)

    print("KERNEL_OK")
</pallas_src>

<mosaic_0001>
module attributes {stable_mosaic.version = 11 : i64} {
  func.func @_residual_block_kernel(%arg0: i32, %arg1: i32, %arg2: memref<4x9x9x8xbf16, #tpu.memory_space<vmem>>, %arg3: memref<9x8x128xbf16, #tpu.memory_space<vmem>>, %arg4: memref<9x128x128xbf16, #tpu.memory_space<vmem>>, %arg5: memref<8x128xbf16, #tpu.memory_space<vmem>>, %arg6: memref<1x128xf32, #tpu.memory_space<vmem>>, %arg7: memref<1x128xf32, #tpu.memory_space<vmem>>, %arg8: memref<1x64x128xf32, #tpu.memory_space<vmem>>, %arg9: memref<2x64x128xf32, #tpu.memory_space<vmem>>, %arg10: memref<10x16x128xbf16, #tpu.memory_space<vmem>>, %arg11: memref<1x128xf32, #tpu.memory_space<vmem>>, %arg12: memref<1x128xf32, #tpu.memory_space<vmem>>, %arg13: memref<1x128xf32, #tpu.memory_space<vmem>>, %arg14: memref<1x128xf32, #tpu.memory_space<vmem>>) attributes {dimension_semantics = [#tpu.dimension_semantics<arbitrary>, #tpu.dimension_semantics<arbitrary>], iteration_bounds = array<i64: 3, 2>, scalar_prefetch = 0 : i64, scratch_operands = 6 : i64, tpu.core_type = #tpu.core_type<tc>, window_params = [{transform_indices = @transform_0, window_bounds = array<i64: 4, 9, 9, 8>}, {pipeline_mode = #tpu.pipeline_mode<synchronous>, transform_indices = @transform_1, window_bounds = array<i64: 9, 8, 128>}, {pipeline_mode = #tpu.pipeline_mode<synchronous>, transform_indices = @transform_2, window_bounds = array<i64: 9, 128, 128>}, {pipeline_mode = #tpu.pipeline_mode<synchronous>, transform_indices = @transform_3, window_bounds = array<i64: 8, 128>}, {pipeline_mode = #tpu.pipeline_mode<synchronous>, transform_indices = @transform_4, window_bounds = array<i64: 1, 128>}, {pipeline_mode = #tpu.pipeline_mode<synchronous>, transform_indices = @transform_5, window_bounds = array<i64: 1, 128>}, {transform_indices = @transform_6, window_bounds = array<i64: 1, 64, 128>}]} {
    %c0_i32 = arith.constant 0 : i32
    %0 = arith.cmpi eq, %arg0, %c0_i32 : i32
    %c0_i32_0 = arith.constant 0 : i32
    %1 = arith.cmpi eq, %arg1, %c0_i32_0 : i32
    %2 = arith.andi %0, %1 : i1
    %3 = arith.extui %2 : i1 to i32
    %c0_i32_1 = arith.constant 0 : i32
    %4 = arith.cmpi ne, %3, %c0_i32_1 : i32
    scf.if %4 {
      %cst = arith.constant 0.000000e+00 : bf16
      %14 = vector.broadcast %cst : bf16 to vector<10x16x128xbf16>
      %c0 = arith.constant 0 : index
      %c0_6 = arith.constant 0 : index
      %c0_7 = arith.constant 0 : index
      %15 = vector.load %arg10[%c0, %c0_6, %c0_7] : memref<10x16x128xbf16, #tpu.memory_space<vmem>>, vector<10x16x128xbf16>
      tpu.vector_store %arg10[%c0, %c0_6, %c0_7], %14 {strides = array<i32>} : memref<10x16x128xbf16, #tpu.memory_space<vmem>>, vector<10x16x128xbf16>,
      %cst_8 = arith.constant 0.000000e+00 : f32
      %16 = vector.broadcast %cst_8 : f32 to vector<1x128xf32>
      %c0_9 = arith.constant 0 : index
      %c0_10 = arith.constant 0 : index
      %17 = vector.load %arg11[%c0_9, %c0_10] : memref<1x128xf32, #tpu.memory_space<vmem>>, vector<1x128xf32>
      tpu.vector_store %arg11[%c0_9, %c0_10], %16 {strides = array<i32>} : memref<1x128xf32, #tpu.memory_space<vmem>>, vector<1x128xf32>,
      %cst_11 = arith.constant 0.000000e+00 : f32
      %18 = vector.broadcast %cst_11 : f32 to vector<1x128xf32>
      %c0_12 = arith.constant 0 : index
      %c0_13 = arith.constant 0 : index
      %19 = vector.load %arg12[%c0_12, %c0_13] : memref<1x128xf32, #tpu.memory_space<vmem>>, vector<1x128xf32>
      tpu.vector_store %arg12[%c0_12, %c0_13], %18 {strides = array<i32>} : memref<1x128xf32, #tpu.memory_space<vmem>>, vector<1x128xf32>,
    } else {
    }
    %c0_i32_2 = arith.constant 0 : i32
    %5 = arith.cmpi eq, %arg0, %c0_i32_2 : i32
    %6 = arith.extui %5 : i1 to i32
    %c0_i32_3 = arith.constant 0 : i32
    %7 = arith.cmpi ne, %6, %c0_i32_3 : i32
    scf.if %7 {
      %cst = arith.constant 0.000000e+00 : f32
      %14 = vector.broadcast %cst : f32 to vector<64x128xf32>
      %c0 = arith.constant 0 : index
      %c0_6 = arith.constant 0 : index
      %c0_7 = arith.constant 0 : index
      %c0_8 = arith.constant 0 : index
      %15 = vector.load %arg2[%c0, %c0_6, %c0_7, %c0_8] : memref<4x9x9x8xbf16, #tpu.memory_space<vmem>>, vector<1x8x8x8xbf16>
      %16 = vector.shape_cast %15 : vector<1x8x8x8xbf16> to vector<8x8x8xbf16>
      %17 = vector.shape_cast %16 : vector<8x8x8xbf16> to vector<64x8xbf16>
      %c0_9 = arith.constant 0 : index
      %c0_10 = arith.constant 0 : index
      %c0_11 = arith.constant 0 : index
      %18 = vector.load %arg3[%c0_9, %c0_10, %c0_11] : memref<9x8x128xbf16, #tpu.memory_space<vmem>>, vector<1x8x128xbf16>
      %19 = vector.shape_cast %18 : vector<1x8x128xbf16> to vector<8x128xbf16>
      %cst_12 = arith.constant dense<0.000000e+00> : vector<64x128xf32>
      %20 = tpu.matmul %17, %19, %cst_12 {dimension_numbers = #tpu.dot_dimension_numbers<[1], [0], [0], [1], [0, 0, 1, 1], [], []>} : vector<64x8xbf16>, vector<8x128xbf16>, vector<64x128xf32> -> vector<64x128xf32>
      %21 = arith.addf %14, %20 : vector<64x128xf32>
      %c1 = arith.constant 1 : index
      %c0_13 = arith.constant 0 : index
      %c0_14 = arith.constant 0 : index
      %c0_15 = arith.constant 0 : index
      %22 = vector.load %arg2[%c1, %c0_13, %c0_14, %c0_15] : memref<4x9x9x8xbf16, #tpu.memory_space<vmem>>, vector<1x8x8x8xbf16>
      %23 = vector.shape_cast %22 : vector<1x8x8x8xbf16> to vector<8x8x8xbf16>
      %24 = vector.shape_cast %23 : vector<8x8x8xbf16> to vector<64x8xbf16>
      %c1_16 = arith.constant 1 : index
      %c0_17 = arith.constant 0 : index
      %c0_18 = arith.constant 0 : index
      %25 = vector.load %arg3[%c1_16, %c0_17, %c0_18] : memref<9x8x128xbf16, #tpu.memory_space<vmem>>, vector<1x8x128xbf16>
      %26 = vector.shape_cast %25 : vector<1x8x128xbf16> to vector<8x128xbf16>
      %cst_19 = arith.constant dense<0.000000e+00> : vector<64x128xf32>
      %27 = tpu.matmul %24, %26, %cst_19 {dimension_numbers = #tpu.dot_dimension_numbers<[1], [0], [0], [1], [0, 0, 1, 1], [], []>} : vector<64x8xbf16>, vector<8x128xbf16>, vector<64x128xf32> -> vector<64x128xf32>
      %28 = arith.addf %21, %27 : vector<64x128xf32>
      %c0_20 = arith.constant 0 : index
      %c0_21 = arith.constant 0 : index
      %c1_22 = arith.constant 1 : index
      %c0_23 = arith.constant 0 : index
      %29 = vector.load %arg2[%c0_20, %c0_21, %c1_22, %c0_23] : memref<4x9x9x8xbf16, #tpu.memory_space<vmem>>, vector<1x8x8x8xbf16>
      %30 = vector.shape_cast %29 : vector<1x8x8x8xbf16> to vector<8x8x8xbf16>
      %31 = vector.shape_cast %30 : vector<8x8x8xbf16> to vector<64x8xbf16>
      %c2 = arith.constant 2 : index
      %c0_24 = arith.constant 0 : index
      %c0_25 = arith.constant 0 : index
      %32 = vector.load %arg3[%c2, %c0_24, %c0_25] : memref<9x8x128xbf16, #tpu.memory_space<vmem>>, vector<1x8x128xbf16>
      %33 = vector.shape_cast %32 : vector<1x8x128xbf16> to vector<8x128xbf16>
      %cst_26 = arith.constant dense<0.000000e+00> : vector<64x128xf32>
      %34 = tpu.matmul %31, %33, %cst_26 {dimension_numbers = #tpu.dot_dimension_numbers<[1], [0], [0], [1], [0, 0, 1, 1], [], []>} : vector<64x8xbf16>, vector<8x128xbf16>, vector<64x128xf32> -> vector<64x128xf32>
      %35 = arith.addf %28, %34 : vector<64x128xf32>
      %c2_27 = arith.constant 2 : index
      %c0_28 = arith.constant 0 : index
      %c0_29 = arith.constant 0 : index
      %c0_30 = arith.constant 0 : index
      %36 = vector.load %arg2[%c2_27, %c0_28, %c0_29, %c0_30] : memref<4x9x9x8xbf16, #tpu.memory_space<vmem>>, vector<1x8x8x8xbf16>
      %37 = vector.shape_cast %36 : vector<1x8x8x8xbf16> to vector<8x8x8xbf16>
      %38 = vector.shape_cast %37 : vector<8x8x8xbf16> to vector<64x8xbf16>
      %c3 = arith.constant 3 : index
      %c0_31 = arith.constant 0 : index
      %c0_32 = arith.constant 0 : index
      %39 = vector.load %arg3[%c3, %c0_31, %c0_32] : memref<9x8x128xbf16, #tpu.memory_space<vmem>>, vector<1x8x128xbf16>
      %40 = vector.shape_cast %39 : vector<1x8x128xbf16> to vector<8x128xbf16>
      %cst_33 = arith.constant dense<0.000000e+00> : vector<64x128xf32>
      %41 = tpu.matmul %38, %40, %cst_33 {dimension_numbers = #tpu.dot_dimension_numbers<[1], [0], [0], [1], [0, 0, 1, 1], [], []>} : vector<64x8xbf16>, vector<8x128xbf16>, vector<64x128xf32> -> vector<64x128xf32>
      %42 = arith.addf %35, %41 : vector<64x128xf32>
      %c3_34 = arith.constant 3 : index
      %c0_35 = arith.constant 0 : index
      %c0_36 = arith.constant 0 : index
      %c0_37 = arith.constant 0 : index
      %43 = vector.load %arg2[%c3_34, %c0_35, %c0_36, %c0_37] : memref<4x9x9x8xbf16, #tpu.memory_space<vmem>>, vector<1x8x8x8xbf16>
      %44 = vector.shape_cast %43 : vector<1x8x8x8xbf16> to vector<8x8x8xbf16>
      %45 = vector.shape_cast %44 : vector<8x8x8xbf16> to vector<64x8xbf16>
      %c4 = arith.constant 4 : index
      %c0_38 = arith.constant 0 : index
      %c0_39 = arith.constant 0 : index
      %46 = vector.load %arg3[%c4, %c0_38, %c0_39] : memref<9x8x128xbf16, #tpu.memory_space<vmem>>, vector<1x8x128xbf16>
      %47 = vector.shape_cast %46 : vector<1x8x128xbf16> to vector<8x128xbf16>
      %cst_40 = arith.constant dense<0.000000e+00> : vector<64x128xf32>
      %48 = tpu.matmul %45, %47, %cst_40 {dimension_numbers = #tpu.dot_dimension_numbers<[1], [0], [0], [1], [0, 0, 1, 1], [], []>} : vector<64x8xbf16>, vector<8x128xbf16>, vector<64x128xf32> -> vector<64x128xf32>
      %49 = arith.addf %42, %48 : vector<64x128xf32>
      %c2_41 = arith.constant 2 : index
      %c0_42 = arith.constant 0 : index
      %c1_43 = arith.constant 1 : index
      %c0_44 = arith.constant 0 : index
      %50 = vector.load %arg2[%c2_41, %c0_42, %c1_43, %c0_44] : memref<4x9x9x8xbf16, #tpu.memory_space<vmem>>, vector<1x8x8x8xbf16>
      %51 = vector.shape_cast %50 : vector<1x8x8x8xbf16> to vector<8x8x8xbf16>
      %52 = vector.shape_cast %51 : vector<8x8x8xbf16> to vector<64x8xbf16>
      %c5 = arith.constant 5 : index
      %c0_45 = arith.constant 0 : index
      %c0_46 = arith.constant 0 : index
      %53 = vector.load %arg3[%c5, %c0_45, %c0_46] : memref<9x8x128xbf16, #tpu.memory_space<vmem>>, vector<1x8x128xbf16>
      %54 = vector.shape_cast %53 : vector<1x8x128xbf16> to vector<8x128xbf16>
      %cst_47 = arith.constant dense<0.000000e+00> : vector<64x128xf32>
      %55 = tpu.matmul %52, %54, %cst_47 {dimension_numbers = #tpu.dot_dimension_numbers<[1], [0], [0], [1], [0, 0, 1, 1], [], []>} : vector<64x8xbf16>, vector<8x128xbf16>, vector<64x128xf32> -> vector<64x128xf32>
      %56 = arith.addf %49, %55 : vector<64x128xf32>
      %c0_48 = arith.constant 0 : index
      %c1_49 = arith.constant 1 : index
      %c0_50 = arith.constant 0 : index
      %c0_51 = arith.constant 0 : index
      %57 = vector.load %arg2[%c0_48, %c1_49, %c0_50, %c0_51] : memref<4x9x9x8xbf16, #tpu.memory_space<vmem>>, vector<1x8x8x8xbf16>
      %58 = vector.shape_cast %57 : vector<1x8x8x8xbf16> to vector<8x8x8xbf16>
      %59 = vector.shape_cast %58 : vector<8x8x8xbf16> to vector<64x8xbf16>
      %c6 = arith.constant 6 : index
      %c0_52 = arith.constant 0 : index
      %c0_53 = arith.constant 0 : index
      %60 = vector.load %arg3[%c6, %c0_52, %c0_53] : memref<9x8x128xbf16, #tpu.memory_space<vmem>>, vector<1x8x128xbf16>
      %61 = vector.shape_cast %60 : vector<1x8x128xbf16> to vector<8x128xbf16>
      %cst_54 = arith.constant dense<0.000000e+00> : vector<64x128xf32>
      %62 = tpu.matmul %59, %61, %cst_54 {dimension_numbers = #tpu.dot_dimension_numbers<[1], [0], [0], [1], [0, 0, 1, 1], [], []>} : vector<64x8xbf16>, vector<8x128xbf16>, vector<64x128xf32> -> vector<64x128xf32>
      %63 = arith.addf %56, %62 : vector<64x128xf32>
      %c1_55 = arith.constant 1 : index
      %c1_56 = arith.constant 1 : index
      %c0_57 = arith.constant 0 : index
      %c0_58 = arith.constant 0 : index
      %64 = vector.load %arg2[%c1_55, %c1_56, %c0_57, %c0_58] : memref<4x9x9x8xbf16, #tpu.memory_space<vmem>>, vector<1x8x8x8xbf16>
      %65 = vector.shape_cast %64 : vector<1x8x8x8xbf16> to vector<8x8x8xbf16>
      %66 = vector.shape_cast %65 : vector<8x8x8xbf16> to vector<64x8xbf16>
      %c7 = arith.constant 7 : index
      %c0_59 = arith.constant 0 : index
      %c0_60 = arith.constant 0 : index
      %67 = vector.load %arg3[%c7, %c0_59, %c0_60] : memref<9x8x128xbf16, #tpu.memory_space<vmem>>, vector<1x8x128xbf16>
      %68 = vector.shape_cast %67 : vector<1x8x128xbf16> to vector<8x128xbf16>
      %cst_61 = arith.constant dense<0.000000e+00> : vector<64x128xf32>
      %69 = tpu.matmul %66, %68, %cst_61 {dimension_numbers = #tpu.dot_dimension_numbers<[1], [0], [0], [1], [0, 0, 1, 1], [], []>} : vector<64x8xbf16>, vector<8x128xbf16>, vector<64x128xf32> -> vector<64x128xf32>
      %70 = arith.addf %63, %69 : vector<64x128xf32>
      %c0_62 = arith.constant 0 : index
      %c1_63 = arith.constant 1 : index
      %c1_64 = arith.constant 1 : index
      %c0_65 = arith.constant 0 : index
      %71 = vector.load %arg2[%c0_62, %c1_63, %c1_64, %c0_65] : memref<4x9x9x8xbf16, #tpu.memory_space<vmem>>, vector<1x8x8x8xbf16>
      %72 = vector.shape_cast %71 : vector<1x8x8x8xbf16> to vector<8x8x8xbf16>
      %73 = vector.shape_cast %72 : vector<8x8x8xbf16> to vector<64x8xbf16>
      %c8 = arith.constant 8 : index
      %c0_66 = arith.constant 0 : index
      %c0_67 = arith.constant 0 : index
      %74 = vector.load %arg3[%c8, %c0_66, %c0_67] : memref<9x8x128xbf16, #tpu.memory_space<vmem>>, vector<1x8x128xbf16>
      %75 = vector.shape_cast %74 : vector<1x8x128xbf16> to vector<8x128xbf16>
      %cst_68 = arith.constant dense<0.000000e+00> : vector<64x128xf32>
      %76 = tpu.matmul %73, %75, %cst_68 {dimension_numbers = #tpu.dot_dimension_numbers<[1], [0], [0], [1], [0, 0, 1, 1], [], []>} : vector<64x8xbf16>, vector<8x128xbf16>, vector<64x128xf32> -> vector<64x128xf32>
      %77 = arith.addf %70, %76 : vector<64x128xf32>
      %78 = arith.index_cast %arg1 : i32 to index
      %c0_69 = arith.constant 0 : index
      %c0_70 = arith.constant 0 : index
      %79 = vector.load %arg9[%78, %c0_69, %c0_70] : memref<2x64x128xf32, #tpu.memory_space<vmem>>, vector<1x64x128xf32>
      %80 = vector.shape_cast %79 : vector<1x64x128xf32> to vector<64x128xf32>
      %81 = vector.shape_cast %77 : vector<64x128xf32> to vector<1x64x128xf32>
      tpu.vector_store %arg9[%78, %c0_69, %c0_70], %81 {strides = array<i32>} : memref<2x64x128xf32, #tpu.memory_space<vmem>>, vector<1x64x128xf32>,
      %c0_71 = arith.constant 0 : index
      %c0_72 = arith.constant 0 : index
      %82 = vector.load %arg11[%c0_71, %c0_72] : memref<1x128xf32, #tpu.memory_space<vmem>>, vector<1x128xf32>
      %cst_73 = arith.constant dense<0.000000e+00> : vector<128xf32>
      %83 = vector.multi_reduction <add>, %77, %cst_73 [0] : vector<64x128xf32> to vector<128xf32>
      %84 = vector.shape_cast %83 : vector<128xf32> to vector<1x128xf32>
      %85 = arith.addf %82, %84 : vector<1x128xf32>
      %c0_74 = arith.constant 0 : index
      %c0_75 = arith.constant 0 : index
      %86 = vector.load %arg11[%c0_74, %c0_75] : memref<1x128xf32, #tpu.memory_space<vmem>>, vector<1x128xf32>
      tpu.vector_store %arg11[%c0_74, %c0_75], %85 {strides = array<i32>} : memref<1x128xf32, #tpu.memory_space<vmem>>, vector<1x128xf32>,
      %c0_76 = arith.constant 0 : index
      %c0_77 = arith.constant 0 : index
      %87 = vector.load %arg12[%c0_76, %c0_77] : memref<1x128xf32, #tpu.memory_space<vmem>>, vector<1x128xf32>
      %88 = arith.mulf %77, %77 : vector<64x128xf32>
      %cst_78 = arith.constant dense<0.000000e+00> : vector<128xf32>
      %89 = vector.multi_reduction <add>, %88, %cst_78 [0] : vector<64x128xf32> to vector<128xf32>
      %90 = vector.shape_cast %89 : vector<128xf32> to vector<1x128xf32>
      %91 = arith.addf %87, %90 : vector<1x128xf32>
      %c0_79 = arith.constant 0 : index
      %c0_80 = arith.constant 0 : index
      %92 = vector.load %arg12[%c0_79, %c0_80] : memref<1x128xf32, #tpu.memory_space<vmem>>, vector<1x128xf32>
      tpu.vector_store %arg12[%c0_79, %c0_80], %91 {strides = array<i32>} : memref<1x128xf32, #tpu.memory_space<vmem>>, vector<1x128xf32>,
    } else {
    }
    %c1_i32 = arith.constant 1 : i32
    %8 = arith.cmpi eq, %arg0, %c1_i32 : i32
    %9 = arith.extui %8 : i1 to i32
    %c0_i32_4 = arith.constant 0 : i32
    %10 = arith.cmpi ne, %9, %c0_i32_4 : i32
    scf.if %10 {
      %c0_i32_6 = arith.constant 0 : i32
      %14 = arith.cmpi eq, %arg1, %c0_i32_6 : i32
      %15 = arith.extui %14 : i1 to i32
      %c0_i32_7 = arith.constant 0 : i32
      %16 = arith.cmpi ne, %15, %c0_i32_7 : i32
      scf.if %16 {
        %c0_91 = arith.constant 0 : index
        %c0_92 = arith.constant 0 : index
        %107 = vector.load %arg11[%c0_91, %c0_92] : memref<1x128xf32, #tpu.memory_space<vmem>>, vector<1x128xf32>
        %cst_93 = arith.constant 7.812500e-03 : f32
        %108 = vector.broadcast %cst_93 : f32 to vector<1x128xf32>
        %109 = arith.mulf %107, %108 : vector<1x128xf32>
        %c0_94 = arith.constant 0 : index
        %c0_95 = arith.constant 0 : index
        %110 = vector.load %arg12[%c0_94, %c0_95] : memref<1x128xf32, #tpu.memory_space<vmem>>, vector<1x128xf32>
        %cst_96 = arith.constant 7.812500e-03 : f32
        %111 = vector.broadcast %cst_96 : f32 to vector<1x128xf32>
        %112 = arith.mulf %110, %111 : vector<1x128xf32>
        %113 = arith.mulf %109, %109 : vector<1x128xf32>
        %114 = arith.subf %112, %113 : vector<1x128xf32>
        %c0_97 = arith.constant 0 : index
        %c0_98 = arith.constant 0 : index
        %115 = vector.load %arg6[%c0_97, %c0_98] : memref<1x128xf32, #tpu.memory_space<vmem>>, vector<1x128xf32>
        %cst_99 = arith.constant 9.99999974E-6 : f32
        %116 = vector.broadcast %cst_99 : f32 to vector<1x128xf32>
        %117 = arith.addf %114, %116 : vector<1x128xf32>
        %118 = math.rsqrt %117 : vector<1x128xf32>
        %119 = arith.mulf %115, %118 : vector<1x128xf32>
        %c0_100 = arith.constant 0 : index
        %c0_101 = arith.constant 0 : index
        %120 = vector.load %arg13[%c0_100, %c0_101] : memref<1x128xf32, #tpu.memory_space<vmem>>, vector<1x128xf32>
        tpu.vector_store %arg13[%c0_100, %c0_101], %119 {strides = array<i32>} : memref<1x128xf32, #tpu.memory_space<vmem>>, vector<1x128xf32>,
        %c0_102 = arith.constant 0 : index
        %c0_103 = arith.constant 0 : index
        %121 = vector.load %arg7[%c0_102, %c0_103] : memref<1x128xf32, #tpu.memory_space<vmem>>, vector<1x128xf32>
        %122 = arith.mulf %109, %119 : vector<1x128xf32>
        %123 = arith.subf %121, %122 : vector<1x128xf32>
        %c0_104 = arith.constant 0 : index
        %c0_105 = arith.constant 0 : index
        %124 = vector.load %arg14[%c0_104, %c0_105] : memref<1x128xf32, #tpu.memory_space<vmem>>, vector<1x128xf32>
        tpu.vector_store %arg14[%c0_104, %c0_105], %123 {strides = array<i32>} : memref<1x128xf32, #tpu.memory_space<vmem>>, vector<1x128xf32>,
        %cst_106 = arith.constant 0.000000e+00 : f32
        %125 = vector.broadcast %cst_106 : f32 to vector<1x128xf32>
        %c0_107 = arith.constant 0 : index
        %c0_108 = arith.constant 0 : index
        %126 = vector.load %arg11[%c0_107, %c0_108] : memref<1x128xf32, #tpu.memory_space<vmem>>, vector<1x128xf32>
        tpu.vector_store %arg11[%c0_107, %c0_108], %125 {strides = array<i32>} : memref<1x128xf32, #tpu.memory_space<vmem>>, vector<1x128xf32>,
        %cst_109 = arith.constant 0.000000e+00 : f32
        %127 = vector.broadcast %cst_109 : f32 to vector<1x128xf32>
        %c0_110 = arith.constant 0 : index
        %c0_111 = arith.constant 0 : index
        %128 = vector.load %arg12[%c0_110, %c0_111] : memref<1x128xf32, #tpu.memory_space<vmem>>, vector<1x128xf32>
        tpu.vector_store %arg12[%c0_110, %c0_111], %127 {strides = array<i32>} : memref<1x128xf32, #tpu.memory_space<vmem>>, vector<1x128xf32>,
      } else {
      }
      %17 = arith.index_cast %arg1 : i32 to index
      %c0 = arith.constant 0 : index
      %c0_8 = arith.constant 0 : index
      %18 = vector.load %arg9[%17, %c0, %c0_8] : memref<2x64x128xf32, #tpu.memory_space<vmem>>, vector<1x64x128xf32>
      %19 = vector.shape_cast %18 : vector<1x64x128xf32> to vector<64x128xf32>
      %c0_9 = arith.constant 0 : index
      %c0_10 = arith.constant 0 : index
      %20 = vector.load %arg13[%c0_9, %c0_10] : memref<1x128xf32, #tpu.memory_space<vmem>>, vector<1x128xf32>
      %21 = vector.broadcast %20 : vector<1x128xf32> to vector<64x128xf32>
      %22 = arith.mulf %19, %21 : vector<64x128xf32>
      %c0_11 = arith.constant 0 : index
      %c0_12 = arith.constant 0 : index
      %23 = vector.load %arg14[%c0_11, %c0_12] : memref<1x128xf32, #tpu.memory_space<vmem>>, vector<1x128xf32>
      %24 = vector.broadcast %23 : vector<1x128xf32> to vector<64x128xf32>
      %25 = arith.addf %22, %24 : vector<64x128xf32>
      %cst = arith.constant 0.000000e+00 : f32
      %26 = vector.broadcast %cst : f32 to vector<64x128xf32>
      %27 = arith.maximumf %25, %26 : vector<64x128xf32>
      %28 = vector.shape_cast %27 : vector<64x128xf32> to vector<8x8x128xf32>
      %29 = arith.truncf %28 : vector<8x8x128xf32> to vector<8x8x128xbf16>
      %c1 = arith.constant 1 : index
      %c1_13 = arith.constant 1 : index
      %c0_14 = arith.constant 0 : index
      %30 = vector.load %arg10[%c1, %c1_13, %c0_14] : memref<10x16x128xbf16, #tpu.memory_space<vmem>>, vector<8x8x128xbf16>
      tpu.vector_store %arg10[%c1, %c1_13, %c0_14], %29 {strides = array<i32>} : memref<10x16x128xbf16, #tpu.memory_space<vmem>>, vector<8x8x128xbf16>,
      %cst_15 = arith.constant 0.000000e+00 : f32
      %31 = vector.broadcast %cst_15 : f32 to vector<64x128xf32>
      %c0_16 = arith.constant 0 : index
      %c0_17 = arith.constant 0 : index
      %c0_18 = arith.constant 0 : index
      %32 = vector.load %arg10[%c0_16, %c0_17, %c0_18] : memref<10x16x128xbf16, #tpu.memory_space<vmem>>, vector<8x8x128xbf16>
      %33 = vector.shape_cast %32 : vector<8x8x128xbf16> to vector<64x128xbf16>
      %c0_19 = arith.constant 0 : index
      %c0_20 = arith.constant 0 : index
      %c0_21 = arith.constant 0 : index
      %34 = vector.load %arg4[%c0_19, %c0_20, %c0_21] : memref<9x128x128xbf16, #tpu.memory_space<vmem>>, vector<1x128x128xbf16>
      %35 = vector.shape_cast %34 : vector<1x128x128xbf16> to vector<128x128xbf16>
      %cst_22 = arith.constant dense<0.000000e+00> : vector<64x128xf32>
      %36 = tpu.matmul %33, %35, %cst_22 {dimension_numbers = #tpu.dot_dimension_numbers<[1], [0], [0], [1], [0, 0, 1, 1], [], []>} : vector<64x128xbf16>, vector<128x128xbf16>, vector<64x128xf32> -> vector<64x128xf32>
      %37 = arith.addf %31, %36 : vector<64x128xf32>
      %c0_23 = arith.constant 0 : index
      %c1_24 = arith.constant 1 : index
      %c0_25 = arith.constant 0 : index
      %38 = vector.load %arg10[%c0_23, %c1_24, %c0_25] : memref<10x16x128xbf16, #tpu.memory_space<vmem>>, vector<8x8x128xbf16>
      %39 = vector.shape_cast %38 : vector<8x8x128xbf16> to vector<64x128xbf16>
      %c1_26 = arith.constant 1 : index
      %c0_27 = arith.constant 0 : index
      %c0_28 = arith.constant 0 : index
      %40 = vector.load %arg4[%c1_26, %c0_27, %c0_28] : memref<9x128x128xbf16, #tpu.memory_space<vmem>>, vector<1x128x128xbf16>
      %41 = vector.shape_cast %40 : vector<1x128x128xbf16> to vector<128x128xbf16>
      %cst_29 = arith.constant dense<0.000000e+00> : vector<64x128xf32>
      %42 = tpu.matmul %39, %41, %cst_29 {dimension_numbers = #tpu.dot_dimension_numbers<[1], [0], [0], [1], [0, 0, 1, 1], [], []>} : vector<64x128xbf16>, vector<128x128xbf16>, vector<64x128xf32> -> vector<64x128xf32>
      %43 = arith.addf %37, %42 : vector<64x128xf32>
      %c0_30 = arith.constant 0 : index
      %c2 = arith.constant 2 : index
      %c0_31 = arith.constant 0 : index
      %44 = vector.load %arg10[%c0_30, %c2, %c0_31] : memref<10x16x128xbf16, #tpu.memory_space<vmem>>, vector<8x8x128xbf16>
      %45 = vector.shape_cast %44 : vector<8x8x128xbf16> to vector<64x128xbf16>
      %c2_32 = arith.constant 2 : index
      %c0_33 = arith.constant 0 : index
      %c0_34 = arith.constant 0 : index
      %46 = vector.load %arg4[%c2_32, %c0_33, %c0_34] : memref<9x128x128xbf16, #tpu.memory_space<vmem>>, vector<1x128x128xbf16>
      %47 = vector.shape_cast %46 : vector<1x128x128xbf16> to vector<128x128xbf16>
      %cst_35 = arith.constant dense<0.000000e+00> : vector<64x128xf32>
      %48 = tpu.matmul %45, %47, %cst_35 {dimension_numbers = #tpu.dot_dimension_numbers<[1], [0], [0], [1], [0, 0, 1, 1], [], []>} : vector<64x128xbf16>, vector<128x128xbf16>, vector<64x128xf32> -> vector<64x128xf32>
      %49 = arith.addf %43, %48 : vector<64x128xf32>
      %c1_36 = arith.constant 1 : index
      %c0_37 = arith.constant 0 : index
      %c0_38 = arith.constant 0 : index
      %50 = vector.load %arg10[%c1_36, %c0_37, %c0_38] : memref<10x16x128xbf16, #tpu.memory_space<vmem>>, vector<8x8x128xbf16>
      %51 = vector.shape_cast %50 : vector<8x8x128xbf16> to vector<64x128xbf16>
      %c3 = arith.constant 3 : index
      %c0_39 = arith.constant 0 : index
      %c0_40 = arith.constant 0 : index
      %52 = vector.load %arg4[%c3, %c0_39, %c0_40] : memref<9x128x128xbf16, #tpu.memory_space<vmem>>, vector<1x128x128xbf16>
      %53 = vector.shape_cast %52 : vector<1x128x128xbf16> to vector<128x128xbf16>
      %cst_41 = arith.constant dense<0.000000e+00> : vector<64x128xf32>
      %54 = tpu.matmul %51, %53, %cst_41 {dimension_numbers = #tpu.dot_dimension_numbers<[1], [0], [0], [1], [0, 0, 1, 1], [], []>} : vector<64x128xbf16>, vector<128x128xbf16>, vector<64x128xf32> -> vector<64x128xf32>
      %55 = arith.addf %49, %54 : vector<64x128xf32>
      %c1_42 = arith.constant 1 : index
      %c1_43 = arith.constant 1 : index
      %c0_44 = arith.constant 0 : index
      %56 = vector.load %arg10[%c1_42, %c1_43, %c0_44] : memref<10x16x128xbf16, #tpu.memory_space<vmem>>, vector<8x8x128xbf16>
      %57 = vector.shape_cast %56 : vector<8x8x128xbf16> to vector<64x128xbf16>
      %c4 = arith.constant 4 : index
      %c0_45 = arith.constant 0 : index
      %c0_46 = arith.constant 0 : index
      %58 = vector.load %arg4[%c4, %c0_45, %c0_46] : memref<9x128x128xbf16, #tpu.memory_space<vmem>>, vector<1x128x128xbf16>
      %59 = vector.shape_cast %58 : vector<1x128x128xbf16> to vector<128x128xbf16>
      %cst_47 = arith.constant dense<0.000000e+00> : vector<64x128xf32>
      %60 = tpu.matmul %57, %59, %cst_47 {dimension_numbers = #tpu.dot_dimension_numbers<[1], [0], [0], [1], [0, 0, 1, 1], [], []>} : vector<64x128xbf16>, vector<128x128xbf16>, vector<64x128xf32> -> vector<64x128xf32>
      %61 = arith.addf %55, %60 : vector<64x128xf32>
      %c1_48 = arith.constant 1 : index
      %c2_49 = arith.constant 2 : index
      %c0_50 = arith.constant 0 : index
      %62 = vector.load %arg10[%c1_48, %c2_49, %c0_50] : memref<10x16x128xbf16, #tpu.memory_space<vmem>>, vector<8x8x128xbf16>
      %63 = vector.shape_cast %62 : vector<8x8x128xbf16> to vector<64x128xbf16>
      %c5 = arith.constant 5 : index
      %c0_51 = arith.constant 0 : index
      %c0_52 = arith.constant 0 : index
      %64 = vector.load %arg4[%c5, %c0_51, %c0_52] : memref<9x128x128xbf16, #tpu.memory_space<vmem>>, vector<1x128x128xbf16>
      %65 = vector.shape_cast %64 : vector<1x128x128xbf16> to vector<128x128xbf16>
      %cst_53 = arith.constant dense<0.000000e+00> : vector<64x128xf32>
      %66 = tpu.matmul %63, %65, %cst_53 {dimension_numbers = #tpu.dot_dimension_numbers<[1], [0], [0], [1], [0, 0, 1, 1], [], []>} : vector<64x128xbf16>, vector<128x128xbf16>, vector<64x128xf32> -> vector<64x128xf32>
      %67 = arith.addf %61, %66 : vector<64x128xf32>
      %c2_54 = arith.constant 2 : index
      %c0_55 = arith.constant 0 : index
      %c0_56 = arith.constant 0 : index
      %68 = vector.load %arg10[%c2_54, %c0_55, %c0_56] : memref<10x16x128xbf16, #tpu.memory_space<vmem>>, vector<8x8x128xbf16>
      %69 = vector.shape_cast %68 : vector<8x8x128xbf16> to vector<64x128xbf16>
      %c6 = arith.constant 6 : index
      %c0_57 = arith.constant 0 : index
      %c0_58 = arith.constant 0 : index
      %70 = vector.load %arg4[%c6, %c0_57, %c0_58] : memref<9x128x128xbf16, #tpu.memory_space<vmem>>, vector<1x128x128xbf16>
      %71 = vector.shape_cast %70 : vector<1x128x128xbf16> to vector<128x128xbf16>
      %cst_59 = arith.constant dense<0.000000e+00> : vector<64x128xf32>
      %72 = tpu.matmul %69, %71, %cst_59 {dimension_numbers = #tpu.dot_dimension_numbers<[1], [0], [0], [1], [0, 0, 1, 1], [], []>} : vector<64x128xbf16>, vector<128x128xbf16>, vector<64x128xf32> -> vector<64x128xf32>
      %73 = arith.addf %67, %72 : vector<64x128xf32>
      %c2_60 = arith.constant 2 : index
      %c1_61 = arith.constant 1 : index
      %c0_62 = arith.constant 0 : index
      %74 = vector.load %arg10[%c2_60, %c1_61, %c0_62] : memref<10x16x128xbf16, #tpu.memory_space<vmem>>, vector<8x8x128xbf16>
      %75 = vector.shape_cast %74 : vector<8x8x128xbf16> to vector<64x128xbf16>
      %c7 = arith.constant 7 : index
      %c0_63 = arith.constant 0 : index
      %c0_64 = arith.constant 0 : index
      %76 = vector.load %arg4[%c7, %c0_63, %c0_64] : memref<9x128x128xbf16, #tpu.memory_space<vmem>>, vector<1x128x128xbf16>
      %77 = vector.shape_cast %76 : vector<1x128x128xbf16> to vector<128x128xbf16>
      %cst_65 = arith.constant dense<0.000000e+00> : vector<64x128xf32>
      %78 = tpu.matmul %75, %77, %cst_65 {dimension_numbers = #tpu.dot_dimension_numbers<[1], [0], [0], [1], [0, 0, 1, 1], [], []>} : vector<64x128xbf16>, vector<128x128xbf16>, vector<64x128xf32> -> vector<64x128xf32>
      %79 = arith.addf %73, %78 : vector<64x128xf32>
      %c2_66 = arith.constant 2 : index
      %c2_67 = arith.constant 2 : index
      %c0_68 = arith.constant 0 : index
      %80 = vector.load %arg10[%c2_66, %c2_67, %c0_68] : memref<10x16x128xbf16, #tpu.memory_space<vmem>>, vector<8x8x128xbf16>
      %81 = vector.shape_cast %80 : vector<8x8x128xbf16> to vector<64x128xbf16>
      %c8 = arith.constant 8 : index
      %c0_69 = arith.constant 0 : index
      %c0_70 = arith.constant 0 : index
      %82 = vector.load %arg4[%c8, %c0_69, %c0_70] : memref<9x128x128xbf16, #tpu.memory_space<vmem>>, vector<1x128x128xbf16>
      %83 = vector.shape_cast %82 : vector<1x128x128xbf16> to vector<128x128xbf16>
      %cst_71 = arith.constant dense<0.000000e+00> : vector<64x128xf32>
      %84 = tpu.matmul %81, %83, %cst_71 {dimension_numbers = #tpu.dot_dimension_numbers<[1], [0], [0], [1], [0, 0, 1, 1], [], []>} : vector<64x128xbf16>, vector<128x128xbf16>, vector<64x128xf32> -> vector<64x128xf32>
      %85 = arith.addf %79, %84 : vector<64x128xf32>
      %c3_72 = arith.constant 3 : index
      %c0_73 = arith.constant 0 : index
      %c0_74 = arith.constant 0 : index
      %c0_75 = arith.constant 0 : index
      %86 = vector.load %arg2[%c3_72, %c0_73, %c0_74, %c0_75] : memref<4x9x9x8xbf16, #tpu.memory_space<vmem>>, vector<1x8x8x8xbf16>
      %87 = vector.shape_cast %86 : vector<1x8x8x8xbf16> to vector<8x8x8xbf16>
      %88 = vector.shape_cast %87 : vector<8x8x8xbf16> to vector<64x8xbf16>
      %c0_76 = arith.constant 0 : index
      %c0_77 = arith.constant 0 : index
      %89 = vector.load %arg5[%c0_76, %c0_77] : memref<8x128xbf16, #tpu.memory_space<vmem>>, vector<8x128xbf16>
      %cst_78 = arith.constant dense<0.000000e+00> : vector<64x128xf32>
      %90 = tpu.matmul %88, %89, %cst_78 {dimension_numbers = #tpu.dot_dimension_numbers<[1], [0], [0], [1], [0, 0, 1, 1], [], []>} : vector<64x8xbf16>, vector<8x128xbf16>, vector<64x128xf32> -> vector<64x128xf32>
      %91 = arith.addf %85, %90 : vector<64x128xf32>
      %92 = arith.index_cast %arg1 : i32 to index
      %c0_79 = arith.constant 0 : index
      %c0_80 = arith.constant 0 : index
      %93 = vector.load %arg9[%92, %c0_79, %c0_80] : memref<2x64x128xf32, #tpu.memory_space<vmem>>, vector<1x64x128xf32>
      %94 = vector.shape_cast %93 : vector<1x64x128xf32> to vector<64x128xf32>
      %95 = vector.shape_cast %91 : vector<64x128xf32> to vector<1x64x128xf32>
      tpu.vector_store %arg9[%92, %c0_79, %c0_80], %95 {strides = array<i32>} : memref<2x64x128xf32, #tpu.memory_space<vmem>>, vector<1x64x128xf32>,
      %c0_81 = arith.constant 0 : index
      %c0_82 = arith.constant 0 : index
      %96 = vector.load %arg11[%c0_81, %c0_82] : memref<1x128xf32, #tpu.memory_space<vmem>>, vector<1x128xf32>
      %cst_83 = arith.constant dense<0.000000e+00> : vector<128xf32>
      %97 = vector.multi_reduction <add>, %91, %cst_83 [0] : vector<64x128xf32> to vector<128xf32>
      %98 = vector.shape_cast %97 : vector<128xf32> to vector<1x128xf32>
      %99 = arith.addf %96, %98 : vector<1x128xf32>
      %c0_84 = arith.constant 0 : index
      %c0_85 = arith.constant 0 : index
      %100 = vector.load %arg11[%c0_84, %c0_85] : memref<1x128xf32, #tpu.memory_space<vmem>>, vector<1x128xf32>
      tpu.vector_store %arg11[%c0_84, %c0_85], %99 {strides = array<i32>} : memref<1x128xf32, #tpu.memory_space<vmem>>, vector<1x128xf32>,
      %c0_86 = arith.constant 0 : index
      %c0_87 = arith.constant 0 : index
      %101 = vector.load %arg12[%c0_86, %c0_87] : memref<1x128xf32, #tpu.memory_space<vmem>>, vector<1x128xf32>
      %102 = arith.mulf %91, %91 : vector<64x128xf32>
      %cst_88 = arith.constant dense<0.000000e+00> : vector<128xf32>
      %103 = vector.multi_reduction <add>, %102, %cst_88 [0] : vector<64x128xf32> to vector<128xf32>
      %104 = vector.shape_cast %103 : vector<128xf32> to vector<1x128xf32>
      %105 = arith.addf %101, %104 : vector<1x128xf32>
      %c0_89 = arith.constant 0 : index
      %c0_90 = arith.constant 0 : index
      %106 = vector.load %arg12[%c0_89, %c0_90] : memref<1x128xf32, #tpu.memory_space<vmem>>, vector<1x128xf32>
      tpu.vector_store %arg12[%c0_89, %c0_90], %105 {strides = array<i32>} : memref<1x128xf32, #tpu.memory_space<vmem>>, vector<1x128xf32>,
    } else {
    }
    %c2_i32 = arith.constant 2 : i32
    %11 = arith.cmpi eq, %arg0, %c2_i32 : i32
    %12 = arith.extui %11 : i1 to i32
    %c0_i32_5 = arith.constant 0 : i32
    %13 = arith.cmpi ne, %12, %c0_i32_5 : i32
    scf.if %13 {
      %c0_i32_6 = arith.constant 0 : i32
      %14 = arith.cmpi eq, %arg1, %c0_i32_6 : i32
      %15 = arith.extui %14 : i1 to i32
      %c0_i32_7 = arith.constant 0 : i32
      %16 = arith.cmpi ne, %15, %c0_i32_7 : i32
      scf.if %16 {
        %c0_16 = arith.constant 0 : index
        %c0_17 = arith.constant 0 : index
        %31 = vector.load %arg11[%c0_16, %c0_17] : memref<1x128xf32, #tpu.memory_space<vmem>>, vector<1x128xf32>
        %cst_18 = arith.constant 7.812500e-03 : f32
        %32 = vector.broadcast %cst_18 : f32 to vector<1x128xf32>
        %33 = arith.mulf %31, %32 : vector<1x128xf32>
        %c0_19 = arith.constant 0 : index
        %c0_20 = arith.constant 0 : index
        %34 = vector.load %arg12[%c0_19, %c0_20] : memref<1x128xf32, #tpu.memory_space<vmem>>, vector<1x128xf32>
        %cst_21 = arith.constant 7.812500e-03 : f32
        %35 = vector.broadcast %cst_21 : f32 to vector<1x128xf32>
        %36 = arith.mulf %34, %35 : vector<1x128xf32>
        %37 = arith.mulf %33, %33 : vector<1x128xf32>
        %38 = arith.subf %36, %37 : vector<1x128xf32>
        %c0_22 = arith.constant 0 : index
        %c0_23 = arith.constant 0 : index
        %39 = vector.load %arg6[%c0_22, %c0_23] : memref<1x128xf32, #tpu.memory_space<vmem>>, vector<1x128xf32>
        %cst_24 = arith.constant 9.99999974E-6 : f32
        %40 = vector.broadcast %cst_24 : f32 to vector<1x128xf32>
        %41 = arith.addf %38, %40 : vector<1x128xf32>
        %42 = math.rsqrt %41 : vector<1x128xf32>
        %43 = arith.mulf %39, %42 : vector<1x128xf32>
        %c0_25 = arith.constant 0 : index
        %c0_26 = arith.constant 0 : index
        %44 = vector.load %arg13[%c0_25, %c0_26] : memref<1x128xf32, #tpu.memory_space<vmem>>, vector<1x128xf32>
        tpu.vector_store %arg13[%c0_25, %c0_26], %43 {strides = array<i32>} : memref<1x128xf32, #tpu.memory_space<vmem>>, vector<1x128xf32>,
        %c0_27 = arith.constant 0 : index
        %c0_28 = arith.constant 0 : index
        %45 = vector.load %arg7[%c0_27, %c0_28] : memref<1x128xf32, #tpu.memory_space<vmem>>, vector<1x128xf32>
        %46 = arith.mulf %33, %43 : vector<1x128xf32>
        %47 = arith.subf %45, %46 : vector<1x128xf32>
        %c0_29 = arith.constant 0 : index
        %c0_30 = arith.constant 0 : index
        %48 = vector.load %arg14[%c0_29, %c0_30] : memref<1x128xf32, #tpu.memory_space<vmem>>, vector<1x128xf32>
        tpu.vector_store %arg14[%c0_29, %c0_30], %47 {strides = array<i32>} : memref<1x128xf32, #tpu.memory_space<vmem>>, vector<1x128xf32>,
        %cst_31 = arith.constant 0.000000e+00 : f32
        %49 = vector.broadcast %cst_31 : f32 to vector<1x128xf32>
        %c0_32 = arith.constant 0 : index
        %c0_33 = arith.constant 0 : index
        %50 = vector.load %arg11[%c0_32, %c0_33] : memref<1x128xf32, #tpu.memory_space<vmem>>, vector<1x128xf32>
        tpu.vector_store %arg11[%c0_32, %c0_33], %49 {strides = array<i32>} : memref<1x128xf32, #tpu.memory_space<vmem>>, vector<1x128xf32>,
        %cst_34 = arith.constant 0.000000e+00 : f32
        %51 = vector.broadcast %cst_34 : f32 to vector<1x128xf32>
        %c0_35 = arith.constant 0 : index
        %c0_36 = arith.constant 0 : index
        %52 = vector.load %arg12[%c0_35, %c0_36] : memref<1x128xf32, #tpu.memory_space<vmem>>, vector<1x128xf32>
        tpu.vector_store %arg12[%c0_35, %c0_36], %51 {strides = array<i32>} : memref<1x128xf32, #tpu.memory_space<vmem>>, vector<1x128xf32>,
      } else {
      }
      %17 = arith.index_cast %arg1 : i32 to index
      %c0 = arith.constant 0 : index
      %c0_8 = arith.constant 0 : index
      %18 = vector.load %arg9[%17, %c0, %c0_8] : memref<2x64x128xf32, #tpu.memory_space<vmem>>, vector<1x64x128xf32>
      %19 = vector.shape_cast %18 : vector<1x64x128xf32> to vector<64x128xf32>
      %c0_9 = arith.constant 0 : index
      %c0_10 = arith.constant 0 : index
      %20 = vector.load %arg13[%c0_9, %c0_10] : memref<1x128xf32, #tpu.memory_space<vmem>>, vector<1x128xf32>
      %21 = vector.broadcast %20 : vector<1x128xf32> to vector<64x128xf32>
      %22 = arith.mulf %19, %21 : vector<64x128xf32>
      %c0_11 = arith.constant 0 : index
      %c0_12 = arith.constant 0 : index
      %23 = vector.load %arg14[%c0_11, %c0_12] : memref<1x128xf32, #tpu.memory_space<vmem>>, vector<1x128xf32>
      %24 = vector.broadcast %23 : vector<1x128xf32> to vector<64x128xf32>
      %25 = arith.addf %22, %24 : vector<64x128xf32>
      %cst = arith.constant 0.000000e+00 : f32
      %26 = vector.broadcast %cst : f32 to vector<64x128xf32>
      %27 = arith.maximumf %25, %26 : vector<64x128xf32>
      %c0_13 = arith.constant 0 : index
      %c0_14 = arith.constant 0 : index
      %c0_15 = arith.constant 0 : index
      %28 = vector.load %arg8[%c0_13, %c0_14, %c0_15] : memref<1x64x128xf32, #tpu.memory_space<vmem>>, vector<1x64x128xf32>
      %29 = vector.shape_cast %28 : vector<1x64x128xf32> to vector<64x128xf32>
      %30 = vector.shape_cast %27 : vector<64x128xf32> to vector<1x64x128xf32>
      tpu.vector_store %arg8[%c0_13, %c0_14, %c0_15], %30 {strides = array<i32>} : memref<1x64x128xf32, #tpu.memory_space<vmem>>, vector<1x64x128xf32>,
    } else {
    }
    return
  }
  func.func @transform_0(%arg0: i32, %arg1: i32) -> (i32, i32, i32, i32) {
    %c0_i32 = arith.constant 0 : i32
    %c0_i32_0 = arith.constant 0 : i32
    %c0_i32_1 = arith.constant 0 : i32
    %c0_i32_2 = arith.constant 0 : i32
    return %arg1, %c0_i32, %c0_i32_0, %c0_i32_1 : i32, i32, i32, i32
  }
  func.func @transform_1(%arg0: i32, %arg1: i32) -> (i32, i32, i32) {
    %c0_i32 = arith.constant 0 : i32
    %c0_i32_0 = arith.constant 0 : i32
    %c0_i32_1 = arith.constant 0 : i32
    %c0_i32_2 = arith.constant 0 : i32
    return %c0_i32, %c0_i32_0, %c0_i32_1 : i32, i32, i32
  }
  func.func @transform_2(%arg0: i32, %arg1: i32) -> (i32, i32, i32) {
    %c0_i32 = arith.constant 0 : i32
    %c0_i32_0 = arith.constant 0 : i32
    %c0_i32_1 = arith.constant 0 : i32
    %c0_i32_2 = arith.constant 0 : i32
    return %c0_i32, %c0_i32_0, %c0_i32_1 : i32, i32, i32
  }
  func.func @transform_3(%arg0: i32, %arg1: i32) -> (i32, i32) {
    %c0_i32 = arith.constant 0 : i32
    %c0_i32_0 = arith.constant 0 : i32
    %c0_i32_1 = arith.constant 0 : i32
    return %c0_i32, %c0_i32_0 : i32, i32
  }
  func.func @transform_4(%arg0: i32, %arg1: i32) -> (i32, i32) {
    %c0_i32 = arith.constant 0 : i32
    %c0_i32_0 = arith.constant 0 : i32
    %c0_i32_1 = arith.constant 0 : i32
    return %c0_i32, %c0_i32_0 : i32, i32
  }
  func.func @transform_5(%arg0: i32, %arg1: i32) -> (i32, i32) {
    %c0_i32 = arith.constant 0 : i32
    %c0_i32_0 = arith.constant 0 : i32
    %c0_i32_1 = arith.constant 0 : i32
    return %c0_i32, %c0_i32_0 : i32, i32
  }
  func.func @transform_6(%arg0: i32, %arg1: i32) -> (i32, i32, i32) {
    %c0_i32 = arith.constant 0 : i32
    %c0_i32_0 = arith.constant 0 : i32
    %c0_i32_1 = arith.constant 0 : i32
    return %arg1, %c0_i32, %c0_i32_0 : i32, i32, i32
  }
}

</mosaic_0001>

<bundles_post_ra>
// kernel: tpu_custom_call.1
= control target key start
LH: loop header
LB: loop body
LE: loop exit
PB: predicated region body
PF: predicated region fallthrough
CT: control target
= control target key end

     0   :  { %11 = vsyncpa [#allocation9], 0  ;;  %s6850_s0 = inlined_call_operand.vmem [shape: bf16[8,9,9,8], index: 0, kind: input, shape index: {}]   ;;  %s6851_s1 = inlined_call_operand.vmem [shape: bf16[9,8,128], index: 1, kind: input, shape index: {}]   ;;  %s6852_s2 = inlined_call_operand.vmem [shape: bf16[9,128,128], index: 2, kind: input, shape index: {}]   ;;  %s6853_s3 = inlined_call_operand.vmem [shape: bf16[8,128], index: 3, kind: input, shape index: {}]   ;;  %s6854_s4 = inlined_call_operand.vmem [shape: f32[1,128], index: 4, kind: input, shape index: {}]   ;;  %s6855_s5 = inlined_call_operand.vmem [shape: f32[1,128], index: 5, kind: input, shape index: {}]   ;;  %s6856_s6 = inlined_call_operand.hbm [shape: f32[2,64,128], index: 6, kind: output, shape index: {}]  }
   0x1   :  { %13 = vsyncpa [#allocation9 + $0x1], 0  ;;  %s5988_s21 = smov 0   ;;  %s5990_s22 = smov 0  }
   0x2   :  { %s5992_s23 = smov 0   ;;  %s5994_s24 = smov 0  }
   0x3   :  { %s5996_s25 = smov 0   ;;  %s5998_s26 = smov 0  }
   0x4   :  { %s6000_s27 = smov 0   ;;  %s6002_s28 = smov 0  }
   0x5 LB: > { %s4387_s29 = sadd.s32 4294967295, %s5944_s28   ;;  %s4388_s30 = sadd.s32 4294967294, %s5944_s28   ;;  %s5944_s28 = sphi %s6002_s28, %s19_s28   ;;  %s5940_s27 = sphi %s6000_s27, %s6875_s27   ;;  %s5936_s26 = sphi %s5998_s26, %s6874_s26   ;;  %s5932_s25 = sphi %s5996_s25, %s6873_s25   ;;  %s5928_s24 = sphi %s5994_s24, %s6872_s24   ;;  %s5924_s23 = sphi %s5992_s23, %s6871_s23   ;;  %s5920_s22 = sphi %s5990_s22, %s6870_s22   ;;  %s5916_s21 = sphi %s5988_s21, %s6869_s21  }
   0x6   : > { %s28_s7 = sadd.s32 1, %s5936_s26  ;;  %s31_s8 = sadd.s32 1, %s5940_s27 }
   0x7   : > { %p29_p0 = scmp.ge.s32.totalorder %s28_s7, 2  ;;  %s169_s9 = sadd.s32 1, %s5924_s23 }
   0x8   : > { %p179_p1 = scmp.ne.s32.totalorder %s5924_s23, %s5920_s22  ;;  %p180_p2 = scmp.eq.s32.totalorder %s4387_s29, 5 }
   0x9   : > { %s6877_s7 = smov (%p29_p0, %s28_s7), 0  ;;  %s6879_s8 = smov (!%p29_p0, %s31_s8), %s5940_s27 }
   0xa   : > { %s166_s10 = ssub.s32 %s5936_s26, %s6877_s7  ;;  %p6040_p3 = por %p180_p2, %p179_p1 }
   0xb   : > { %p33_p4 = scmp.ge.s32.totalorder %s6879_s8, 3  ;;  %p167_p5 = scmp.eq.s32.totalorder %s166_s10, 0 }
   0xc   : > { %p185_p6 = scmp.ne.s32.totalorder %s5920_s22, %s5916_s21  ;;  %p186_p7 = scmp.eq.s32.totalorder %s4388_s30, 5 }
   0xd   : > { %s6881_s8 = smov (%p33_p4, %s6879_s8), 0  ;;  %p4391_p9 = scmp.ge.s32.totalorder %s5944_s28, 1 }
   0xe   : > { %s6049_s12 = scalar_select %p167_p5, %s5924_s23, %s169_s9  }
   0xf   : > { %p6051_p8 = por %p186_p7, %p185_p6  ;;  %p229_p10 = scmp.lt.s32.totalorder %s5944_s28, 7 }
  0x11   : > { %p230_p11 = pnand %p4391_p9, %p229_p10 }
  0x12   : > { %s6857_s14 = sand.u32 (!%p230_p11), 1, %s5920_s22   ;;  %s4393_s15 = sshll.u32 (!%p230_p11), %s5928_s24, 2 }
  0x13   : > { %233 = sbr.rel (%p230_p11) target bundleno = 900 (0x384), region = 44  ;;  %s4392_s16 = sshll.u32 (!%p230_p11), %s6857_s14, 6 }
  0x14   : > { %p261_p12 = scmp.lt.s32.totalorder (!%p230_p11), %s4393_s15, 7  ;;  %p268_p13 = scmp.eq.s32.totalorder (!%p230_p11), %s5932_s25, 0 }
  0x15   : > { %p269_p0 = scmp.eq.s32.totalorder (!%p230_p11), %s5928_s24, 0  ;;  %s6068_s29 = scalar_lea.vmem (!%p230_p11), [#allocation8], %s4392_s16 }
  0x17   : > { %p270_p1 = pnand (!%p230_p11), %p269_p0, %p268_p13 }
  0x1a   : > { %s6883_s15 = smov (!%p261_p12, %s4393_s15), 7  ;;  %273 = sbr.rel (%p270_p1) target bundleno = 34 (0x22), region = 48 }
  0x1b   : > { %s5560_s17 = smul.u32 72, %s6883_s15  ;;  %v5946_v0 = vmov (!%p270_p1), 0   ;;  %v5947_v1 = vmov (!%p270_p1), 0.0  }
  0x1c   : > { %274 = vst [vmem:[#allocation3] sm:$0xff] (!%p270_p1), %v5946_v0  ;;  %275 = vst [vmem:[#allocation3 + $0x8] sm:$0xff] (!%p270_p1), %v5946_v0 }
  0x1d   : > { %s6066_s20 = scalar_lea.vmem %s6850_s0, %s5560_s17  ;;  %276 = vst [vmem:[#allocation3 + $0x10] sm:$0xff] (!%p270_p1), %v5946_v0  ;;  %277 = vst [vmem:[#allocation3 + $0x18] sm:$0xff] (!%p270_p1), %v5946_v0 }
  0x1e   : > { %278 = vst [vmem:[#allocation3 + $0x20] sm:$0xff] (!%p270_p1), %v5946_v0  ;;  %279 = vst [vmem:[#allocation3 + $0x28] sm:$0xff] (!%p270_p1), %v5946_v0 }
  0x1f   : > { %280 = vst [vmem:[#allocation3 + $0x30] sm:$0xff] (!%p270_p1), %v5946_v0  ;;  %281 = vst [vmem:[#allocation3 + $0x38] sm:$0xff] (!%p270_p1), %v5946_v0 }
  0x20   : > { %282 = vst [vmem:[#allocation3 + $0x40] sm:$0xff] (!%p270_p1), %v5946_v0  ;;  %283 = vst [vmem:[#allocation3 + $0x48] sm:$0xff] (!%p270_p1), %v5946_v0 }
  0x21   : > { %284 = vst [vmem:[#allocation4] sm:$0x1] %v5947_v1  ;;  %285 = vst [vmem:[#allocation5] sm:$0x1] %v5947_v1 }
  0x22 PF: > { %p4395_p2 = scmp.ne.s32.totalorder %s5932_s25, 0 }
  0x23   : > { %v4404_v2 = vld [vmem:[%s6851_s1 + $0x4] sm:$0xf] (!%p4395_p2)  ;;  %vm342_vm0 = vcmask (!%p4395_p2), 1043456   ;;  %v6077_v3 = vld [vmem:[%s6851_s1 + $0x10] sm:$0xf] (!%p4395_p2)  ;;  %vm329_vm1 = vcmask (!%p4395_p2), 64512  }
  0x24   : > { %288 = sbr.rel (%p4395_p2) target bundleno = 356 (0x164), region = 52  ;;  %5549 = vmatprep.subr.msk.bf16.mxu1 (!%p4395_p2), %vm342_vm0, %v4404_v2  ;;  %5553 = vmatprep.subr.msk.bf16.mxu0 (!%p4395_p2), %vm342_vm0, %v6077_v3  ;;  %v344_v4 = vsel (!%p4395_p2), %vm342_vm0, %v4404_v2, 0  ;;  %v6085_v5 = vsel (!%p4395_p2), %vm342_vm0, %v6077_v3, 0  ;;  %v5638_v6 = vld [vmem:[%s6066_s20 + $0x48] ss:$8 sps:$4 sm:$0xff] (!%p4395_p2)   ;;  %s4548_s10 = sshll.u32 (!%p4395_p2), %s5928_s24, 6 }
  0x25   : > { %5096 = vmatpush3.bf16.msra.mxu1 (!%p4395_p2), %v344_v4  ;;  %5136 = vmatpush3.bf16.msra.mxu0 (!%p4395_p2), %v6085_v5  ;;  %v5639_v7 = vld [vmem:[%s6066_s20 + $0xd8] ss:$8 sps:$4 sm:$0xff] (!%p4395_p2)   ;;  %v5641_v10 = vld [vmem:[%s6066_s20 + $0xe8] ss:$8 sps:$4 sm:$0xff] (!%p4395_p2)   ;;  %v4480_v11 = vld [vmem:[%s6851_s1 + $0x14] sm:$0xf] (!%p4395_p2) }
  0x26   : > { %5097 = vmatprep.mubr.msk.bf16.mxu1 (!%p4395_p2), %vm329_vm1, %v5638_v6  ;;  %v5640_v8 = vld [vmem:[%s6066_s20 + $0x58] ss:$8 sps:$4 sm:$0xff] (!%p4395_p2)   ;;  %5137 = vmatprep.mubr.msk.bf16.mxu0 (!%p4395_p2), %vm329_vm1, %v5639_v7  ;;  %v1137_v13 = vsel (!%p4395_p2), %vm342_vm0, %v4480_v11, 0  ;;  %v5642_v14 = vld [vmem:[%s6066_s20 + $0x68] ss:$8 sps:$4 sm:$0xff] (!%p4395_p2)   ;;  %s6289_s15 = scalar_lea.vmem (!%p4395_p2), [#allocation2], %s4548_s10 }
  0x27   : > { %v297_v9 = vld [vmem:[%s6851_s1] sm:$0xf] (!%p4395_p2)  ;;  %5555 = vmatprep.subr.msk.bf16.mxu0 (!%p4395_p2), %vm342_vm0, %v4480_v11  ;;  %vm527_vm2 = vsmask.f32 (!%p4395_p2), 3328  ;;  %vm528_vm3 = vsmask.f32 (!%p4395_p2), 7440 }
  0x28   : > { %5550 = vmatprep.subr.msk.bf16.mxu1 (!%p4395_p2), %vm342_vm0, %v297_v9  ;;  %5098 = vmatmul.mubr.msk.bf16.vlgmr.msra.gmra.mrb[0].mxu1 (!%p4395_p2), %vm329_vm1, %v5640_v8  ;;  %v444_v12 = vsel (!%p4395_p2), %vm342_vm0, %v297_v9, 0  ;;  %v5643_v15 = vld [vmem:[%s6066_s20 + $0x78] ss:$8 sps:$4 sm:$0xff] (!%p4395_p2)   ;;  %v4464_v16 = vld [vmem:[%s6066_s20 + $0x90] sm:$0xf] (!%p4395_p2)  ;;  %vm6123_vm4 = vmor (!%p4395_p2), %vm527_vm2, %vm528_vm3 }
  0x29   : > { %5138 = vmatmul.mubr.msk.bf16.vlgmr.msra.gmra.mrb[0].mxu0 (!%p4395_p2), %vm329_vm1, %v5641_v10  ;;  %5106 = vmatpush3.bf16.msra.mxu1 (!%p4395_p2), %v444_v12  ;;  %v4465_v17 = vld [vmem:[%s6066_s20 + $0x94] sm:$0x1] (!%p4395_p2)  ;;  %v4466_v18 = vld [vmem:[%s6066_s20 + $0x98] sm:$0xf] (!%p4395_p2)  ;;  %v4467_v19 = vld [vmem:[%s6066_s20 + $0x9c] sm:$0x1] (!%p4395_p2) }
  0x2a   : > { %5146 = vmatpush3.bf16.msra.mxu0 (!%p4395_p2), %v1137_v13  ;;  %5101 = vmatprep.mubr.msk.bf16.mxu1 (!%p4395_p2), %vm329_vm1, %v5642_v14  ;;  %v999_v20 = vshrl.u32 (!%p4395_p2), %v4464_v16, 16  ;;  %v1002_v21 = vshll.u32 (!%p4395_p2), %v4464_v16, 16  ;;  %v1008_v22 = vshll.u32 (!%p4395_p2), %v4465_v17, 16  ;;  %v1013_v23 = vshrl.u32 (!%p4395_p2), %v4466_v18, 16  ;;  %v4468_v26 = vld [vmem:[%s6066_s20 + $0xa0] sm:$0xf] (!%p4395_p2) }
  0x2b   : > { %v1016_v24 = vshll.u32 %v4466_v18, 16  ;;  %v1022_v25 = vshll.u32 %v4467_v19, 16  ;;  %v4469_v29 = vld [vmem:[%s6066_s20 + $0xa4] sm:$0x1]  ;;  %v4470_v30 = vld [vmem:[%s6066_s20 + $0xa8] sm:$0xf] }
  0x2c   : > { %v1001_v27 = vrot.slane %v999_v20, 4  ;;  %v1004_v28 = vrot.slane %v1002_v21, 5  ;;  %v1010_v31 = vrot.slane %v1008_v22, 5  ;;  %v1015_v32 = vrot.slane %v1013_v23, 4  ;;  %v4471_v35 = vld [vmem:[%s6066_s20 + $0xac] sm:$0x1] }
  0x2d   : > { %v1018_v33 = vrot.slane %v1016_v24, 5  ;;  %v1024_v34 = vrot.slane %v1022_v25, 5  ;;  %v1027_v37 = vshrl.u32 %v4468_v26, 16  ;;  %v1030_v38 = vshll.u32 %v4468_v26, 16  ;;  %v4497_v40 = vld [vmem:[%s6851_s1 + $0x18] sm:$0xf] }
  0x2e   : > { %v1005_v36 = vor.u32 %v1004_v28, %v1001_v27  ;;  %v1036_v39 = vshll.u32 %v4469_v29, 16  ;;  %v1041_v43 = vshrl.u32 %v4470_v30, 16  ;;  %v1044_v44 = vshll.u32 %v4470_v30, 16  ;;  %5556 = vmatprep.subr.msk.bf16.mxu0 %vm342_vm0, %v4497_v40  ;;  %v5644_v53 = vld [vmem:[%s6066_s20] ss:$8 sps:$4 sm:$0xff]  }
  0x2f   : > { %v1019_v42 = vor.u32 %v1018_v33, %v1015_v32  ;;  %v1050_v45 = vshll.u32 %v4471_v35, 16  ;;  %v1029_v47 = vrot.slane %v1027_v37, 4  ;;  %v1032_v48 = vrot.slane %v1030_v38, 5  ;;  %v5645_v60 = vld [vmem:[%s6066_s20 + $0x10] ss:$8 sps:$4 sm:$0xff]  }
  0x30   : > { %5102 = vmatmul.mubr.msk.bf16.gmra.mrb[4].mxu1 %vm329_vm1, %v5643_v15  ;;  %v1006_v46 = vrot.slane %v1005_v36, 4  ;;  %v1038_v50 = vrot.slane %v1036_v39, 5  ;;  %v1043_v51 = vrot.slane %v1041_v43, 4  ;;  %v1046_v52 = vrot.slane %v1044_v44, 5  ;;  %v4421_v61 = vld [vmem:[%s6851_s1 + $0x8] sm:$0xf] }
  0x31   : > { %v1020_v49 = vrot.slane %v1019_v42, 4  ;;  %v1033_v55 = vor.u32 %v1032_v48, %v1029_v47  ;;  %v1052_v56 = vrot.slane %v1050_v45, 5  ;;  %v1256_v57 = vsel %vm342_vm0, %v4497_v40, 0  ;;  %5107 = vmatprep.mubr.msk.bf16.mxu1 %vm329_vm1, %v5644_v53  ;;  %v4472_v62 = vld [vmem:[%s6066_s20 + $0xb0] sm:$0xf]  ;;  %5551 = vmatprep.subr.msk.bf16.mxu1 %vm342_vm0, %v4421_v61 }
  0x32   : > { %v1011_v54 = vsel %vm6123_vm4, %v1006_v46, %v1010_v31  ;;  %v1047_v59 = vor.u32 %v1046_v52, %v1043_v51  ;;  %v669_v1 = vsel %vm342_vm0, %v4421_v61, 0  ;;  %v4473_v2 = vld [vmem:[%s6066_s20 + $0xb4] sm:$0x1]  ;;  %v4474_v4 = vld [vmem:[%s6066_s20 + $0xb8] sm:$0xf]  ;;  %v1055_v8 = vshrl.u32 %v4472_v62, 16 }
  0x33   : > { %v1025_v58 = vsel %vm6123_vm4, %v1020_v49, %v1024_v34  ;;  %v1034_v0 = vrot.slane %v1033_v55, 4  ;;  %v4475_v7 = vld [vmem:[%s6066_s20 + $0xbc] sm:$0x1]  ;;  %v1058_v9 = vshll.u32 %v4472_v62, 16  ;;  %v1064_v10 = vshll.u32 %v4473_v2, 16 }
  0x34   : > { %v4481_v63 = vcombine.low %v1011_v54, %v1025_v58  ;;  %v1048_v6 = vrot.slane %v1047_v59, 4  ;;  %v1069_v12 = vshrl.u32 %v4474_v4, 16  ;;  %v1072_v13 = vshll.u32 %v4474_v4, 16  ;;  %v4476_v15 = vld [vmem:[%s6066_s20 + $0xc0] sm:$0xf] }
  0x35   : > { %v1039_v11 = vsel %vm6123_vm4, %v1034_v0, %v1038_v50  ;;  %v1078_v14 = vshll.u32 %v4475_v7, 16  ;;  %v1057_v17 = vrot.slane %v1055_v8, 4  ;;  %v1060_v18 = vrot.slane %v1058_v9, 5  ;;  %v4477_v20 = vld [vmem:[%s6066_s20 + $0xc4] sm:$0x1] }
  0x36   : > { %5147 = vmatprep.mubr.msk.bf16.mxu0 %vm329_vm1, %v4481_v63  ;;  %v1053_v16 = vsel %vm6123_vm4, %v1048_v6, %v1052_v56  ;;  %v1066_v19 = vrot.slane %v1064_v10, 5  ;;  %v1071_v22 = vrot.slane %v1069_v12, 4  ;;  %v1074_v23 = vrot.slane %v1072_v13, 5  ;;  %v4478_v25 = vld [vmem:[%s6066_s20 + $0xc8] sm:$0xf] }
  0x37   : > { %v4482_v21 = vcombine.low %v1039_v11, %v1053_v16  ;;  %v1080_v24 = vrot.slane %v1078_v14, 5  ;;  %v1061_v26 = vor.u32 %v1060_v18, %v1057_v17  ;;  %v4479_v27 = vld [vmem:[%s6066_s20 + $0xcc] sm:$0x1]  ;;  %v1083_v28 = vshrl.u32 %v4476_v15, 16  ;;  %v5646_v43 = vld [vmem:[%s6066_s20 + $0x20] ss:$8 sps:$4 sm:$0xff]  }
  0x38   : > { %5108 = vmatmul.mubr.msk.bf16.vlgmr.msra.gmra.mrb[0].mxu1 %vm329_vm1, %v5645_v60  ;;  %v1086_v29 = vshll.u32 %v4476_v15, 16  ;;  %v1092_v30 = vshll.u32 %v4477_v20, 16  ;;  %v1075_v31 = vor.u32 %v1074_v23, %v1071_v22  ;;  %v1097_v32 = vshrl.u32 %v4478_v25, 16  ;;  %v5647_v46 = vld [vmem:[%s6066_s20 + $0x30] ss:$8 sps:$4 sm:$0xff]  }
  0x39   : > { %5116 = vmatpush3.bf16.msra.mxu1 %v669_v1  ;;  %5148 = vmatmul.mubr.msk.bf16.vlgmr.msra.gmra.mrb[0].mxu0 %vm329_vm1, %v4482_v21  ;;  %v1100_v33 = vshll.u32 %v4478_v25, 16  ;;  %v1106_v34 = vshll.u32 %v4479_v27, 16  ;;  %v1062_v35 = vrot.slane %v1061_v26, 4  ;;  %v1085_v36 = vrot.slane %v1083_v28, 4  ;;  %v4514_v53 = vld [vmem:[%s6851_s1 + $0x1c] sm:$0xf] }
  0x3a   : > { %5156 = vmatpush3.bf16.msra.mxu0 %v1256_v57  ;;  %v1088_v37 = vrot.slane %v1086_v29, 5  ;;  %v1076_v38 = vrot.slane %v1075_v31, 4  ;;  %v1094_v39 = vrot.slane %v1092_v30, 5  ;;  %v1099_v40 = vrot.slane %v1097_v32, 4  ;;  %5111 = vmatprep.mubr.msk.bf16.mxu1 %vm329_vm1, %v5646_v43  ;;  %v5648_v55 = vld [vmem:[%s6066_s20 + $0x8] ss:$8 sps:$4 sm:$0xff]  }
  0x3b   : > { %v1102_v42 = vrot.slane %v1100_v33, 5  ;;  %v1067_v44 = vsel %vm6123_vm4, %v1062_v35, %v1066_v19  ;;  %v1108_v49 = vrot.slane %v1106_v34, 5  ;;  %5557 = vmatprep.subr.msk.bf16.mxu0 %vm342_vm0, %v4514_v53  ;;  %v511_v56 = vld [vmem:[%s6066_s20] sm:$0xf]  ;;  %v512_v57 = vld [vmem:[%s6066_s20 + $0x4] sm:$0x1] }
  0x3c   : > { %v1089_v45 = vor.u32 %v1088_v37, %v1085_v36  ;;  %v1081_v47 = vsel %vm6123_vm4, %v1076_v38, %v1080_v24  ;;  %v513_v59 = vld [vmem:[%s6066_s20 + $0x8] sm:$0xf]  ;;  %v514_v60 = vld [vmem:[%s6066_s20 + $0xc] sm:$0x1]  ;;  %v531_v61 = vshrl.u32 %v511_v56, 16  ;;  %v534_v62 = vshll.u32 %v511_v56, 16 }
  0x3d   : > { %v1103_v48 = vor.u32 %v1102_v42, %v1099_v40  ;;  %v4483_v50 = vcombine.low %v1067_v44, %v1081_v47  ;;  %v540_v0 = vshll.u32 %v512_v57, 16  ;;  %v545_v1 = vshrl.u32 %v513_v59, 16  ;;  %v515_v4 = vld [vmem:[%s6066_s20 + $0x10] sm:$0xf]  ;;  %v516_v9 = vld [vmem:[%s6066_s20 + $0x14] sm:$0x1] }
  0x3e   : > { %v1090_v51 = vrot.slane %v1089_v45, 4  ;;  %v548_v2 = vshll.u32 %v513_v59, 16  ;;  %v533_v6 = vrot.slane %v531_v61, 4  ;;  %v536_v7 = vrot.slane %v534_v62, 5  ;;  %v517_v14 = vld [vmem:[%s6066_s20 + $0x18] sm:$0xf] }
  0x3f   : > { %v1104_v52 = vrot.slane %v1103_v48, 4  ;;  %5151 = vmatprep.mubr.msk.bf16.mxu0 %vm329_vm1, %v4483_v50  ;;  %v554_v8 = vshll.u32 %v514_v60, 16  ;;  %v559_v10 = vshrl.u32 %v515_v4, 16  ;;  %v542_v11 = vrot.slane %v540_v0, 5  ;;  %v518_v18 = vld [vmem:[%s6066_s20 + $0x1c] sm:$0x1] }
  0x40   : > { %5112 = vmatmul.mubr.msk.bf16.gmra.mrb[4].mxu1 %vm329_vm1, %v5647_v46  ;;  %v1095_v54 = vsel %vm6123_vm4, %v1090_v51, %v1094_v39  ;;  %v547_v12 = vrot.slane %v545_v1, 4  ;;  %v550_v13 = vrot.slane %v548_v2, 5  ;;  %v562_v15 = vshll.u32 %v515_v4, 16  ;;  %v5649_v21 = vld [vmem:[%s6066_s20 + $0x18] ss:$8 sps:$4 sm:$0xff]  }
  0x41   : > { %v1109_v58 = vsel %vm6123_vm4, %v1104_v52, %v1108_v49  ;;  %v537_v16 = vor.u32 %v536_v7, %v533_v6  ;;  %v556_v17 = vrot.slane %v554_v8, 5  ;;  %v561_v19 = vrot.slane %v559_v10, 4  ;;  %v4438_v26 = vld [vmem:[%s6851_s1 + $0xc] sm:$0xf]  ;;  %v5650_v42 = vld [vmem:[%s6066_s20 + $0x28] ss:$8 sps:$4 sm:$0xff]  }
  0x42   : > { %v4484_v63 = vcombine.low %v1095_v54, %v1109_v58  ;;  %v568_v20 = vshll.u32 %v516_v9, 16  ;;  %v551_v22 = vor.u32 %v550_v13, %v547_v12  ;;  %v564_v23 = vrot.slane %v562_v15, 5  ;;  %5552 = vmatprep.subr.msk.bf16.mxu1 %vm342_vm0, %v4438_v26  ;;  %v519_v44 = vld [vmem:[%s6066_s20 + $0x20] sm:$0xf]  ;;  %v520_v45 = vld [vmem:[%s6066_s20 + $0x24] sm:$0x1] }
  0x43   : > { %v573_v24 = vshrl.u32 %v517_v14, 16  ;;  %v576_v25 = vshll.u32 %v517_v14, 16  ;;  %v538_v27 = vrot.slane %v537_v16, 4  ;;  %v582_v29 = vshll.u32 %v518_v18, 16  ;;  %v521_v46 = vld [vmem:[%s6066_s20 + $0x28] sm:$0xf] }
  0x44   : > { %5152 = vmatmul.mubr.msk.bf16.gmra.mrb[4].mxu0 %vm329_vm1, %v4484_v63  ;;  %v570_v28 = vrot.slane %v568_v20, 5  ;;  %v552_v30 = vrot.slane %v551_v22, 4  ;;  %v565_v31 = vor.u32 %v564_v23, %v561_v19  ;;  %v1375_v34 = vsel %vm342_vm0, %v4514_v53, 0  ;;  %v522_v49 = vld [vmem:[%s6066_s20 + $0x2c] sm:$0x1] }
  0x45   : > { %5157 = vmatprep.mubr.msk.bf16.mxu0 %vm329_vm1, %v5648_v55  ;;  %v575_v32 = vrot.slane %v573_v24, 4  ;;  %v578_v33 = vrot.slane %v576_v25, 5  ;;  %v543_v35 = vsel %vm6123_vm4, %v538_v27, %v542_v11  ;;  %v788_v36 = vsel %vm342_vm0, %v4438_v26, 0  ;;  %v523_v56 = vld [vmem:[%s6066_s20 + $0x30] sm:$0xf] }
  0x46   : > { %v557_v37 = vsel %vm6123_vm4, %v552_v30, %v556_v17  ;;  %v566_v38 = vrot.slane %v565_v31, 4  ;;  %v584_v40 = vrot.slane %v582_v29, 5  ;;  %v587_v50 = vshrl.u32 %v519_v44, 16  ;;  %v5651_v58 = vld [vmem:[%s6066_s20 + $0x38] ss:$8 sps:$4 sm:$0xff]  }
  0x47   : > { %v579_v39 = vor.u32 %v578_v33, %v575_v32  ;;  %v4422_v43 = vcombine.low %v543_v35, %v557_v37  ;;  %v590_v51 = vshll.u32 %v519_v44, 16  ;;  %v596_v52 = vshll.u32 %v520_v45, 16  ;;  %v524_v61 = vld [vmem:[%s6066_s20 + $0x34] sm:$0x1]  ;;  %v525_v62 = vld [vmem:[%s6066_s20 + $0x38] sm:$0xf] }
  0x48   : > { %v571_v47 = vsel %vm6123_vm4, %v566_v38, %v570_v28  ;;  %v601_v53 = vshrl.u32 %v521_v46, 16  ;;  %v604_v54 = vshll.u32 %v521_v46, 16  ;;  %v610_v55 = vshll.u32 %v522_v49, 16  ;;  %v526_v4 = vld [vmem:[%s6066_s20 + $0x3c] sm:$0x1] }
  0x49   : > { %v580_v48 = vrot.slane %v579_v39, 4  ;;  %5117 = vmatprep.mubr.msk.bf16.mxu1 %vm329_vm1, %v4422_v43  ;;  %v589_v59 = vrot.slane %v587_v50, 4  ;;  %v592_v60 = vrot.slane %v590_v51, 5  ;;  %v598_v0 = vrot.slane %v596_v52, 5  ;;  %v5652_v18 = vld [vmem:[%s6066_s20 + $0x50] ss:$8 sps:$4 sm:$0xff]  }
  0x4a   : > { %v603_v1 = vrot.slane %v601_v53, 4  ;;  %v606_v2 = vrot.slane %v604_v54, 5  ;;  %v612_v7 = vrot.slane %v610_v55, 5  ;;  %v615_v8 = vshrl.u32 %v523_v56, 16  ;;  %v5653_v31 = vld [vmem:[%s6066_s20 + $0x60] ss:$8 sps:$4 sm:$0xff]  }
  0x4b   : > { %v585_v57 = vsel %vm6123_vm4, %v580_v48, %v584_v40  ;;  %v593_v6 = vor.u32 %v592_v60, %v589_v59  ;;  %v618_v9 = vshll.u32 %v523_v56, 16  ;;  %v624_v11 = vshll.u32 %v524_v61, 16  ;;  %v5654_v35 = vld [vmem:[%s6066_s20 + $0x90] ss:$8 sps:$4 sm:$0xff]   ;;  %v4523_v38 = vld [vmem:[%s6066_s20 + $0x8] sm:$0xf] }
  0x4c   : > { %5158 = vmatmul.mubr.msk.bf16.vlgmr.msra.gmra.mrb[0].mxu0 %vm329_vm1, %v5649_v21  ;;  %v4423_v63 = vcombine.low %v571_v47, %v585_v57  ;;  %v607_v10 = vor.u32 %v606_v2, %v603_v1  ;;  %v629_v12 = vshrl.u32 %v525_v62, 16  ;;  %v632_v13 = vshll.u32 %v525_v62, 16  ;;  %v5656_v37 = vld [vmem:[%s6066_s20 + $0x70] ss:$8 sps:$4 sm:$0xff]   ;;  %v4524_v39 = vld [vmem:[%s6066_s20 + $0xc] sm:$0x1] }
  0x4d   : > { %5166 = vmatpush3.bf16.msra.mxu0 %v1375_v34  ;;  %5161 = vmatprep.mubr.msk.bf16.mxu0 %vm329_vm1, %v5650_v42  ;;  %v594_v14 = vrot.slane %v593_v6, 4  ;;  %v617_v15 = vrot.slane %v615_v8, 4  ;;  %v620_v16 = vrot.slane %v618_v9, 5  ;;  %v638_v17 = vshll.u32 %v526_v4, 16  ;;  %v4525_v40 = vld [vmem:[%s6066_s20 + $0x10] sm:$0xf] }
  0x4e   : > { %5118 = vmatmul.mubr.msk.bf16.vlgmr.msra.gmra.mrb[0].mxu1 %vm329_vm1, %v4423_v63  ;;  %v608_v19 = vrot.slane %v607_v10, 4  ;;  %v631_v20 = vrot.slane %v629_v12, 4  ;;  %v634_v21 = vrot.slane %v632_v13, 5  ;;  %v626_v24 = vrot.slane %v624_v11, 5  ;;  %v4526_v42 = vld [vmem:[%s6066_s20 + $0x14] sm:$0x1] }
  0x4f   : > { %5126 = vmatpush3.bf16.msra.mxu1 %v788_v36  ;;  %v599_v22 = vsel %vm6123_vm4, %v594_v14, %v598_v0  ;;  %v621_v23 = vor.u32 %v620_v16, %v617_v15  ;;  %v640_v25 = vrot.slane %v638_v17, 5  ;;  %v1467_v43 = vshrl.u32 %v4523_v38, 16  ;;  %v5655_v47 = vld [vmem:[%s6066_s20 + $0xa0] ss:$8 sps:$4 sm:$0xff]   ;;  %v4527_v51 = vld [vmem:[%s6066_s20 + $0x18] sm:$0xf] }
  0x50   : > { %5554 = vmatprep.subr.msk.bf16.mxu1 %vm342_vm0, %v6077_v3  ;;  %v613_v26 = vsel %vm6123_vm4, %v608_v19, %v612_v7  ;;  %v635_v27 = vor.u32 %v634_v21, %v631_v20  ;;  %v4539_v3 = vld [vmem:[%s6851_s1 + $0x20] sm:$0xf]  ;;  %v1470_v44 = vshll.u32 %v4523_v38, 16  ;;  %v1476_v45 = vshll.u32 %v4524_v39, 16  ;;  %v4528_v52 = vld [vmem:[%s6066_s20 + $0x1c] sm:$0x1] }
  0x51   : > { %v4424_v28 = vcombine.low %v599_v22, %v613_v26  ;;  %v622_v29 = vrot.slane %v621_v23, 4  ;;  %5558 = vmatprep.subr.msk.bf16.mxu0 %vm342_vm0, %v4539_v3  ;;  %v1605_v33 = vsel %vm342_vm0, %v4539_v3, 0  ;;  %v1481_v46 = vshrl.u32 %v4525_v40, 16  ;;  %v5657_v48 = vld [vmem:[%s6066_s20 + $0x80] ss:$8 sps:$4 sm:$0xff]  }
  0x52   : > { %v636_v30 = vrot.slane %v635_v27, 4  ;;  %v1484_v49 = vshll.u32 %v4525_v40, 16  ;;  %v1490_v50 = vshll.u32 %v4526_v42, 16  ;;  %v5658_v53 = vld [vmem:[%s6066_s20 + $0xb0] ss:$8 sps:$4 sm:$0xff]   ;;  %v1469_v54 = vrot.slane %v1467_v43, 4 }
  0x53   : > { %5121 = vmatprep.mubr.msk.bf16.mxu1 %vm329_vm1, %v4424_v28  ;;  %v627_v32 = vsel %vm6123_vm4, %v622_v29, %v626_v24  ;;  %v1472_v55 = vrot.slane %v1470_v44, 5  ;;  %v1478_v56 = vrot.slane %v1476_v45, 5  ;;  %v1483_v57 = vrot.slane %v1481_v46, 4  ;;  %v4530_v61 = vld [vmem:[%s6066_s20 + $0x24] sm:$0x1] }
  0x54   : > { %5162 = vmatmul.mubr.msk.bf16.gmra.mrb[4].mxu0 %vm329_vm1, %v5651_v58  ;;  %v641_v34 = vsel %vm6123_vm4, %v636_v30, %v640_v25  ;;  %v4529_v58 = vld [vmem:[%s6066_s20 + $0x20] sm:$0xf]  ;;  %v1486_v59 = vrot.slane %v1484_v49, 5  ;;  %v1492_v60 = vrot.slane %v1490_v50, 5  ;;  %v1495_v62 = vshrl.u32 %v4527_v51, 16 }
  0x55   : > { %5167 = vmatprep.mubr.msk.bf16.mxu0 %vm329_vm1, %v5652_v18  ;;  %v4425_v36 = vcombine.low %v627_v32, %v641_v34  ;;  %v1498_v63 = vshll.u32 %v4527_v51, 16  ;;  %v1473_v0 = vor.u32 %v1472_v55, %v1469_v54  ;;  %v1504_v1 = vshll.u32 %v4528_v52, 16  ;;  %v4531_v17 = vld [vmem:[%s6066_s20 + $0x28] sm:$0xf]  ;;  %v4532_v18 = vld [vmem:[%s6066_s20 + $0x2c] sm:$0x1] }
  0x56   : > { %v1509_v2 = vshrl.u32 %v4529_v58, 16  ;;  %v1512_v4 = vshll.u32 %v4529_v58, 16  ;;  %v1487_v6 = vor.u32 %v1486_v59, %v1483_v57  ;;  %v1497_v7 = vrot.slane %v1495_v62, 4  ;;  %v4533_v21 = vld [vmem:[%s6066_s20 + $0x30] sm:$0xf] }
  0x57   : > { %5122 = vmatmul.mubr.msk.bf16.gmra.mrb[4].mxu1 %vm329_vm1, %v4425_v36  ;;  %v1500_v8 = vrot.slane %v1498_v63, 5  ;;  %v1518_v9 = vshll.u32 %v4530_v61, 16  ;;  %v1474_v10 = vrot.slane %v1473_v0, 4  ;;  %v1506_v11 = vrot.slane %v1504_v1, 5  ;;  %v4534_v22 = vld [vmem:[%s6066_s20 + $0x34] sm:$0x1] }
  0x58   : > { %5127 = vmatprep.mubr.msk.bf16.mxu1 %vm329_vm1, %v5654_v35  ;;  %v1511_v12 = vrot.slane %v1509_v2, 4  ;;  %v1514_v13 = vrot.slane %v1512_v4, 5  ;;  %v1488_v14 = vrot.slane %v1487_v6, 4  ;;  %v1523_v23 = vshrl.u32 %v4531_v17, 16  ;;  %v4535_v40 = vld [vmem:[%s6066_s20 + $0x38] sm:$0xf] }
  0x59   : > { %v1501_v15 = vor.u32 %v1500_v8, %v1497_v7  ;;  %v1520_v16 = vrot.slane %v1518_v9, 5  ;;  %v1479_v19 = vsel %vm6123_vm4, %v1474_v10, %v1478_v56  ;;  %v1526_v24 = vshll.u32 %v4531_v17, 16  ;;  %v4536_v42 = vld [vmem:[%s6066_s20 + $0x3c] sm:$0x1]  ;;  %v4537_v45 = vld [vmem:[%s6066_s20 + $0x40] sm:$0xf] }
  0x5a   : > { %v1515_v20 = vor.u32 %v1514_v13, %v1511_v12  ;;  %v1493_v25 = vsel %vm6123_vm4, %v1488_v14, %v1492_v60  ;;  %v1532_v27 = vshll.u32 %v4532_v18, 16  ;;  %v1537_v3 = vshrl.u32 %v4533_v21, 16  ;;  %v4538_v46 = vld [vmem:[%s6066_s20 + $0x44] sm:$0x1]  ;;  %v5661_v9 = vld [vmem:[%s6066_s20 + $0x108] ss:$8 sps:$4 sm:$0xff]  }
  0x5b   : > { %v1502_v26 = vrot.slane %v1501_v15, 4  ;;  %v1525_v29 = vrot.slane %v1523_v23, 4  ;;  %v1528_v30 = vrot.slane %v1526_v24, 5  ;;  %v1540_v35 = vshll.u32 %v4533_v21, 16 }
  0x5c   : > { %5168 = vmatmul.mubr.msk.bf16.vlgmr.msra.gmra.mrb[0].mxu0 %vm329_vm1, %v5653_v31  ;;  %v1516_v28 = vrot.slane %v1515_v20, 4  ;;  %v5659_v31 = vld [vmem:[%s6066_s20 + $0xc0] ss:$8 sps:$4 sm:$0xff]   ;;  %v1539_v34 = vrot.slane %v1537_v3, 4  ;;  %v1534_v38 = vrot.slane %v1532_v27, 5  ;;  %v1546_v39 = vshll.u32 %v4534_v22, 16 }
  0x5d   : > { %5176 = vmatpush3.bf16.msra.mxu0 %v1605_v33  ;;  %5171 = vmatprep.mubr.msk.bf16.mxu0 %vm329_vm1, %v5656_v37  ;;  %v1507_v32 = vsel %vm6123_vm4, %v1502_v26, %v1506_v11  ;;  %v5660_v33 = vld [vmem:[%s6066_s20 + $0xf8] ss:$8 sps:$4 sm:$0xff]   ;;  %v1529_v37 = vor.u32 %v1528_v30, %v1525_v29  ;;  %v1542_v44 = vrot.slane %v1540_v35, 5  ;;  %v1554_v50 = vshll.u32 %v4535_v40, 16 }
  0x5e   : > { %v1521_v36 = vsel %vm6123_vm4, %v1516_v28, %v1520_v16  ;;  %v1548_v49 = vrot.slane %v1546_v39, 5  ;;  %v1560_v51 = vshll.u32 %v4536_v42, 16  ;;  %v1565_v54 = vshrl.u32 %v4537_v45, 16 }
  0x5f   : > { %5128 = vmatmul.mubr.msk.bf16.vlgmr.msra.gmra.mrb[0].mxu1 %vm329_vm1, %v5655_v47  ;;  %v4541_v43 = vcombine.low %v1507_v32, %v1521_v36  ;;  %v1551_v47 = vshrl.u32 %v4535_v40, 16  ;;  %v1543_v52 = vor.u32 %v1542_v44, %v1539_v34  ;;  %v1568_v55 = vshll.u32 %v4537_v45, 16 }
  0x60   : > { %5412 = vmatpush3.bf16.msra.mxu1 %v6085_v5  ;;  %5131 = vmatprep.mubr.msk.bf16.mxu1 %vm329_vm1, %v5658_v53  ;;  %v4540_v5 = vcombine.low %v1479_v19, %v1493_v25  ;;  %v1556_v56 = vrot.slane %v1554_v50, 5  ;;  %v1574_v57 = vshll.u32 %v4538_v46, 16  ;;  %v1567_v60 = vrot.slane %v1565_v54, 4 }
  0x61   : > { %v1553_v53 = vrot.slane %v1551_v47, 4  ;;  %v1544_v59 = vrot.slane %v1543_v52, 4  ;;  %v1570_v61 = vrot.slane %v1568_v55, 5  ;;  %v1562_v63 = vrot.slane %v1560_v51, 5 }
  0x62   : > { %v1576_v2 = vrot.slane %v1574_v57, 5 }
  0x63   : > { %v1557_v62 = vor.u32 %v1556_v56, %v1553_v53  ;;  %v1549_v0 = vsel %vm6123_vm4, %v1544_v59, %v1548_v49  ;;  %v1571_v1 = vor.u32 %v1570_v61, %v1567_v60 }
  0x64   : > { %5172 = vmatmul.mubr.msk.bf16.gmra.mrb[4].mxu0 %vm329_vm1, %v5657_v48  ;;  %v1530_v48 = vrot.slane %v1529_v37, 4 }
  0x65   : > { %5177 = vmatprep.mubr.msk.bf16.mxu0 %vm329_vm1, %v4540_v5  ;;  %v1558_v6 = vrot.slane %v1557_v62, 4  ;;  %v1572_v7 = vrot.slane %v1571_v1, 4  ;;  %v1690_v1 = vld [vmem:[#allocation4] sm:$0x1] }
  0x66   : > { %v1535_v58 = vsel %vm6123_vm4, %v1530_v48, %v1534_v38 }
  0x67   : > { %5132 = vmatmul.mubr.msk.bf16.gmra.mrb[4].mxu1 %vm329_vm1, %v5659_v31  ;;  %v4542_v4 = vcombine.low %v1535_v58, %v1549_v0  ;;  %v1563_v8 = vsel %vm6123_vm4, %v1558_v6, %v1562_v63  ;;  %v1577_v10 = vsel %vm6123_vm4, %v1572_v7, %v1576_v2  ;;  %v1706_v6 = vld [vmem:[#allocation5] sm:$0x1] }
  0x68   : > { %5141 = vmatprep.mubr.msk.bf16.mxu1 %vm329_vm1, %v5660_v33  ;;  %v4543_v11 = vcombine.low %v1563_v8, %v1577_v10 }
  0x6c   : > { %5178 = vmatmul.mubr.msk.bf16.vlgmr.msra.gmra.mrb[0].mxu0 %vm329_vm1, %v4541_v43 }
  0x6d   : > { %5181 = vmatprep.mubr.msk.bf16.mxu0 %vm329_vm1, %v4542_v4 }
  0x73   : > { %5142 = vmatmul.mubr.msk.bf16.vlgmr.msra.gmra.mrb[4].mxu1 %vm329_vm1, %v5661_v9 }
  0x74   : > { %5182 = vmatmul.mubr.msk.bf16.gmra.mrb[4].mxu0 %vm329_vm1, %v4543_v11 }
 0x132   : > { %v5129_v12 = vpop.f32.mrb[0].mxu1 }
 0x133   : > { %v824_v13 = vpop.f32.mrb[1].mxu1 }
 0x134   : > { %v5130_v14 = vpop.f32.mrb[2].mxu1 }
 0x135   : > { %v827_v15 = vpop.f32.mrb[3].mxu1 }
 0x13f   : > { %v5179_v16 = vpop.f32.mrb[0].mxu0 }
 0x140   : > { %v5413_v17 = vadd.f32 %v5179_v16, %v5129_v12  ;;  %v1641_v18 = vpop.f32.mrb[1].mxu0 }
 0x141   : > { %v5414_v19 = vadd.f32 %v1641_v18, %v824_v13  ;;  %v5180_v20 = vpop.f32.mrb[2].mxu0 }
 0x142   : > { %1684 = vst [vmem:[%s6289_s15 + $0x10] sm:$0xff] %v5413_v17  ;;  %v5415_v41 = vadd.f32 %v5180_v20, %v5130_v14  ;;  %v1644_v21 = vpop.f32.mrb[3].mxu0  ;;  %v1709_v26 = vmul.f32 %v5413_v17, %v5413_v17 }
 0x143   : > { %1682 = vst [vmem:[%s6289_s15] sm:$0xff] %v5414_v19  ;;  %v5416_v22 = vadd.f32 %v1644_v21, %v827_v15  ;;  %v1707_v23 = vmul.f32 %v5414_v19, %v5414_v19 }
 0x144   : > { %1685 = vst [vmem:[%s6289_s15 + $0x18] sm:$0xff] %v5415_v41  ;;  %v1710_v5 = vmul.f32 %v5415_v41, %v5415_v41 }
 0x145   : > { %1683 = vst [vmem:[%s6289_s15 + $0x8] sm:$0xff] %v5416_v22  ;;  %v1691_v24 = vadd.f32 %v5416_v22, %v5414_v19  ;;  %v1708_v25 = vmul.f32 %v5416_v22, %v5416_v22 }
 0x146   : > { %v5143_v31 = vpop.f32.mrb[4].mxu1 }
 0x147   : > { %v1692_v27 = vadd.f32 %v5413_v17, %v1691_v24  ;;  %v1715_v3 = vadd.f32 %v1708_v25, %v1707_v23  ;;  %v5183_v30 = vpop.f32.mrb[4].mxu0  ;;  %v959_v35 = vpop.f32.mrb[5].mxu1 }
 0x148   : > { %v1657_v32 = vpop.f32.mrb[5].mxu0  ;;  %v5417_v34 = vadd.f32 %v5183_v30, %v5143_v31  ;;  %v5144_v38 = vpop.f32.mrb[6].mxu1 }
 0x149   : > { %v1716_v28 = vadd.f32 %v1715_v3, %v1709_v26  ;;  %v1693_v29 = vadd.f32 %v5415_v41, %v1692_v27  ;;  %v5184_v36 = vpop.f32.mrb[6].mxu0  ;;  %v5418_v37 = vadd.f32 %v1657_v32, %v959_v35  ;;  %v962_v42 = vpop.f32.mrb[7].mxu1 }
 0x14a   : > { %v1660_v39 = vpop.f32.mrb[7].mxu0  ;;  %1688 = vst [vmem:[%s6289_s15 + $0x30] sm:$0xff] %v5417_v34  ;;  %v5419_v40 = vadd.f32 %v5184_v36, %v5144_v38  ;;  %v1713_v49 = vmul.f32 %v5417_v34, %v5417_v34 }
 0x14b   : > { %v1717_v33 = vadd.f32 %v1716_v28, %v1710_v5  ;;  %1686 = vst [vmem:[%s6289_s15 + $0x20] sm:$0xff] %v5418_v37  ;;  %v1694_v43 = vadd.f32 %v5418_v37, %v1693_v29  ;;  %v1711_v44 = vmul.f32 %v5418_v37, %v5418_v37  ;;  %v5420_v45 = vadd.f32 %v1660_v39, %v962_v42 }
 0x14c   : > { %1689 = vst [vmem:[%s6289_s15 + $0x38] sm:$0xff] %v5419_v40  ;;  %v1714_v52 = vmul.f32 %v5419_v40, %v5419_v40 }
 0x14d   : > { %v1718_v46 = vadd.f32 %v1717_v33, %v1711_v44  ;;  %1687 = vst [vmem:[%s6289_s15 + $0x28] sm:$0xff] %v5420_v45  ;;  %v1695_v47 = vadd.f32 %v5420_v45, %v1694_v43  ;;  %v1712_v48 = vmul.f32 %v5420_v45, %v5420_v45 }
 0x14f   : > { %v1696_v50 = vadd.f32 %v5417_v34, %v1695_v47  ;;  %v1719_v51 = vadd.f32 %v1718_v46, %v1712_v48 }
 0x151   : > { %v1697_v53 = vadd.f32 %v5419_v40, %v1696_v50  ;;  %v1720_v54 = vadd.f32 %v1719_v51, %v1713_v49 }
 0x153   : > { %v1698_v55 = vrot.slane %v1697_v53, 4  ;;  %v1721_v56 = vadd.f32 %v1720_v54, %v1714_v52 }
 0x155   : > { %v1699_v57 = vadd.f32 %v1698_v55, %v1697_v53  ;;  %v1722_v58 = vrot.slane %v1721_v56, 4 }
 0x157   : > { %v1700_v59 = vrot.slane %v1699_v57, 2  ;;  %v1723_v60 = vadd.f32 %v1722_v58, %v1721_v56 }
 0x159   : > { %v1701_v61 = vadd.f32 %v1700_v59, %v1699_v57  ;;  %v1724_v62 = vrot.slane %v1723_v60, 2 }
 0x15b   : > { %v1702_v63 = vrot.slane %v1701_v61, 1  ;;  %v1725_v0 = vadd.f32 %v1724_v62, %v1723_v60 }
 0x15d   : > { %v1703_v2 = vadd.f32 %v1702_v63, %v1701_v61  ;;  %v1726_v4 = vrot.slane %v1725_v0, 1 }
 0x15f   : > { %v1704_v7 = vadd.f32 %v1703_v2, %v1690_v1  ;;  %v1727_v8 = vadd.f32 %v1726_v4, %v1725_v0 }
 0x161   : > { %1705 = vst [vmem:[#allocation4] sm:$0x1] %v1704_v7  ;;  %v1728_v9 = vadd.f32 %v1727_v8, %v1706_v6 }
 0x163   : > { %1729 = vst [vmem:[#allocation5] sm:$0x1] %v1728_v9 }
 0x164 PF: > { %p4549_p4 = scmp.ne.s32.totalorder %s5932_s25, 1 }
 0x165   : > { %p4550_p5 = scmp.ne.s32.totalorder (!%p4549_p4), %s5928_s24, 0 }
 0x166   : > { %1733 = sbr.rel (%p4549_p4) target bundleno = 823 (0x337), region = 56 }
 0x16d   : > { %1736 = sbr.rel (%p4550_p5) target bundleno = 392 (0x188), region = 60  ;;  %v1737_v10 = vld [vmem:[#allocation4] sm:$0x1] (!%p4550_p5)  ;;  %v1739_v11 = vld [vmem:[#allocation5] sm:$0x1] (!%p4550_p5)  ;;  %v5948_v14 = vmov (!%p4550_p5), 0.0  }
 0x16e   : > { %v1738_v12 = vmul.f32 (!%p4550_p5), 0.0078125, %v1737_v10  ;;  %v1740_v13 = vmul.f32 (!%p4550_p5), 0.0078125, %v1739_v11  ;;  %1752 = vst [vmem:[#allocation4] sm:$0x1] (!%p4550_p5), %v5948_v14  ;;  %1753 = vst [vmem:[#allocation5] sm:$0x1] (!%p4550_p5), %v5948_v14 }
 0x16f   : > { %v1743_v18 = vld [vmem:[%s6854_s4] sm:$0x1] (!%p4550_p5) }
 0x170   : > { %v1741_v15 = vmul.f32 (!%p4550_p5), %v1738_v12, %v1738_v12  ;;  %v1748_v41 = vld [vmem:[%s6855_s5] sm:$0x1] (!%p4550_p5) }
 0x172   : > { %v1742_v16 = vsub.f32 (!%p4550_p5), %v1740_v13, %v1741_v15 }
 0x174   : > { %v1744_v17 = vadd.f32 1e-05, %v1742_v16 }
 0x176   : > { %5662 = vrsqrt.f32 %v1744_v17 }
 0x180   : > { %v5663_v19 = vpop.eup %5662 }
 0x181   : > { %v1746_v20 = vmul.f32 %v5663_v19, %v1743_v18 }
 0x183   : > { %1747 = vst [vmem:[#allocation6] sm:$0x1] %v1746_v20  ;;  %v1749_v21 = vmul.f32 %v1746_v20, %v1738_v12 }
 0x185   : > { %v1750_v22 = vsub.f32 %v1748_v41, %v1749_v21 }
 0x187   : > { %1751 = vst [vmem:[#allocation7] sm:$0x1] %v1750_v22 }
 0x188 PF: > { %v5664_v23 = vld [vmem:[%s6852_s2 + $0x140] sm:$0xff]   ;;  %v5666_v25 = vld [vmem:[%s6852_s2 + $0x148] sm:$0xff]   ;;  %v5668_v27 = vld [vmem:[%s6852_s2 + $0x150] sm:$0xff]   ;;  %s4551_s14 = sshll.u32 %s5928_s24, 6  ;;  %vm1875_vm5 = vcmask 1044480   ;;  %vm2420_vm11 = vcmask 1042432  }
 0x189   : > { %v5665_v24 = vld [vmem:[%s6852_s2 + $0x40] sm:$0xff]   ;;  %5305 = vmatprep.subr.bf16.mxu0 %v5664_v23  ;;  %v5667_v26 = vld [vmem:[%s6852_s2 + $0x48] sm:$0xff]   ;;  %v5669_v3 = vld [vmem:[%s6852_s2 + $0x50] sm:$0xff]   ;;  %s6341_s18 = scalar_lea.vmem [#allocation2], %s4551_s14  ;;  %vm1876_vm6 = vsmask.f32 4354 }
 0x18a   : > { %5306 = vmatpush3.bf16.msra.mxu0 %v5664_v23  ;;  %5185 = vmatprep.subr.bf16.mxu1 %v5665_v24  ;;  %v5670_v5 = vld [vmem:[%s6852_s2 + $0x158] sm:$0xff]   ;;  %v5672_v29 = vld [vmem:[%s6852_s2 + $0x160] sm:$0xff]   ;;  %v5674_v31 = vld [vmem:[%s6852_s2 + $0x168] sm:$0xff]   ;;  %vm1974_vm7 = vsmask.f32 3328  ;;  %vm2421_vm12 = vcmask 1046532  }
 0x18b   : > { %5307 = vmatprep.subr.bf16.mxu0 %v5666_v25  ;;  %5186 = vmatpush3.bf16.msra.mxu1 %v5665_v24  ;;  %v5671_v28 = vld [vmem:[%s6852_s2 + $0x58] sm:$0xff]   ;;  %v5673_v30 = vld [vmem:[%s6852_s2 + $0x60] sm:$0xff]   ;;  %v1757_v33 = vld [vmem:[%s6341_s18 + $0x8] sm:$0xff]  ;;  %vm1975_vm8 = vsmask.f32 7440  ;;  %vm4089_vm14 = vcmask 1043456  }
 0x18c   : > { %5187 = vmatprep.subr.bf16.mxu1 %v5667_v26  ;;  %v1756_v32 = vld [vmem:[%s6341_s18] sm:$0xff]  ;;  %v6345_v34 = vld [vmem:[#allocation6] ss:$0 sm:$0xff]  ;;  %v5675_v35 = vld [vmem:[%s6852_s2 + $0x68] sm:$0xff]   ;;  %vm4076_vm15 = vcmask 64512  }
 0x18d   : > { %v1771_v36 = vmul.f32 %v6345_v34, %v1756_v32  ;;  %v1772_v37 = vmul.f32 %v6345_v34, %v1757_v33  ;;  %v1758_v42 = vld [vmem:[%s6341_s18 + $0x10] sm:$0xff]  ;;  %v1759_v45 = vld [vmem:[%s6341_s18 + $0x18] sm:$0xff]  ;;  %v1926_v50 = vld [vmem:[#allocation3] sm:$0x1f] }
 0x18e   : > { %5308 = vmatpush3.bf16.msra.mxu0 %v5666_v25  ;;  %v6352_v38 = vld [vmem:[#allocation7] ss:$0 sm:$0xff]  ;;  %v1773_v46 = vmul.f32 %v6345_v34, %v1758_v42  ;;  %v1774_v49 = vmul.f32 %v6345_v34, %v1759_v45  ;;  %v4554_v52 = vcombine.low %v1926_v50, %v1926_v50  ;;  %v4555_v56 = vcombine.high %v1926_v50, %v1926_v50  ;;  %v5678_v57 = vld [vmem:[%s6852_s2 + $0x178] sm:$0xff]   ;;  %v1878_v2 = vld [vmem:[#allocation3 + $0x8] sm:$0x1f] }
 0x18f   : > { %5309 = vmatprep.subr.bf16.mxu0 %v5668_v27  ;;  %5188 = vmatpush3.bf16.msra.mxu1 %v5667_v26  ;;  %v1786_v39 = vadd.f32 %v6352_v38, %v1771_v36  ;;  %v1787_v40 = vadd.f32 %v6352_v38, %v1772_v37  ;;  %v5676_v43 = vld [vmem:[%s6852_s2 + $0x170] sm:$0xff]   ;;  %v5679_v61 = vld [vmem:[%s6852_s2 + $0x78] sm:$0xff]   ;;  %v6377_v6 = vld [vmem:[%s6852_s2 + $0x180] sm:$0xff]  }
 0x190   : > { %5189 = vmatprep.subr.bf16.mxu1 %v5669_v3  ;;  %v5677_v44 = vld [vmem:[%s6852_s2 + $0x70] sm:$0xff]   ;;  %v1788_v51 = vadd.f32 %v6352_v38, %v1773_v46  ;;  %v1789_v55 = vadd.f32 %v6352_v38, %v1774_v49  ;;  %v1978_v59 = vshrl.u32 %v4554_v52, 16  ;;  %v1981_v60 = vshll.u32 %v4554_v52, 16  ;;  %v6382_v14 = vld [vmem:[%s6852_s2] sm:$0xff]   ;;  %vm6386_vm9 = vmand %vm1875_vm5, %vm1876_vm6 }
 0x191   : > { %v1794_v47 = vmax.f32 %v1786_v39, 0.0  ;;  %v1795_v48 = vmax.f32 %v1787_v40, 0.0  ;;  %v1881_v4 = vld [vmem:[#allocation3 + $0x10] sm:$0x1f]  ;;  %v1987_v13 = vshll.u32 %v4555_v56, 16  ;;  %vm6400_vm10 = vmor %vm1974_vm7, %vm1975_vm8  ;;  %v1760_v33 = vld [vmem:[%s6341_s18 + $0x20] sm:$0xff] }
 0x192   : > { %5310 = vmatpush3.bf16.msra.mxu0 %v5668_v27  ;;  %v1796_v58 = vmax.f32 %v1788_v51, 0.0  ;;  %v1797_v7 = vmax.f32 %v1789_v55, 0.0  ;;  %v1980_v9 = vrot.slane %v1978_v59, 4  ;;  %v1983_v10 = vrot.slane %v1981_v60, 5  ;;  %v1884_v26 = vld [vmem:[#allocation3 + $0x18] sm:$0x1f]  ;;  %vm6428_vm13 = vmor %vm2420_vm11, %vm2421_vm12 }
 0x193   : > { %5311 = vmatprep.subr.bf16.mxu0 %v5670_v5  ;;  %5190 = vmatpush3.bf16.msra.mxu1 %v5669_v3  ;;  %v1802_v53 = vpack.c.bf16 %v1794_v47, %v1794_v47  ;;  %v1803_v54 = vpack.c.bf16 %v1795_v48, %v1795_v48  ;;  %v1775_v37 = vmul.f32 %v6345_v34, %v1760_v33  ;;  %v1762_v40 = vld [vmem:[%s6341_s18 + $0x30] sm:$0xff]  ;;  %v5815_v56 = vld [vmem:[%s6852_s2 + $0x108] sm:$0xff]  }
 0x194   : > { %5191 = vmatprep.subr.bf16.mxu1 %v5671_v28  ;;  %v1804_v8 = vpack.c.bf16 %v1796_v58, %v1796_v58  ;;  %v1805_v16 = vpack.c.bf16 %v1797_v7, %v1797_v7  ;;  %v1984_v23 = vor.u32 %v1983_v10, %v1980_v9  ;;  %v1777_v49 = vmul.f32 %v6345_v34, %v1762_v40  ;;  %v5712_v15 = vld [vmem:[%s6852_s2 + $0x1b0] sm:$0xff]  }
 0x195   : > { %v1811_v62 = vshrl.u32 %v1802_v53, 16  ;;  %v1814_v63 = vshll.u32 %v1802_v53, 16  ;;  %v1818_v0 = vshrl.u32 %v1803_v54, 16  ;;  %v1821_v1 = vshll.u32 %v1803_v54, 16 }
 0x196   : > { %5312 = vmatpush3.bf16.msra.mxu0 %v5670_v5  ;;  %v1825_v17 = vshrl.u32 %v1804_v8, 16  ;;  %v1828_v18 = vshll.u32 %v1804_v8, 16  ;;  %v1832_v21 = vshrl.u32 %v1805_v16, 16  ;;  %v1835_v22 = vshll.u32 %v1805_v16, 16  ;;  %v1887_v5 = vld [vmem:[#allocation3 + $0x20] sm:$0x1f] }
 0x197   : > { %5313 = vmatprep.subr.bf16.mxu0 %v5672_v29  ;;  %5192 = vmatpush3.bf16.msra.mxu1 %v5671_v28  ;;  %v1813_v11 = vrot.slane %v1811_v62, 7  ;;  %v1820_v12 = vrot.slane %v1818_v0, 7  ;;  %v6417_v47 = vadd.f32 %v6352_v38, %v1775_v37  ;;  %v5694_v37 = vld [vmem:[%s6852_s2 + $0x188] sm:$0xff]  }
 0x198   : > { %5193 = vmatprep.subr.bf16.mxu1 %v5673_v30  ;;  %v1827_v41 = vrot.slane %v1825_v17, 7  ;;  %v1834_v3 = vrot.slane %v1832_v21, 7 }
 0x199   : > { %v1816_v19 = vor.u32 %v1814_v63, %v1813_v11  ;;  %v1823_v20 = vor.u32 %v1821_v1, %v1820_v12 }
 0x19a   : > { %5314 = vmatpush3.bf16.msra.mxu0 %v5672_v29  ;;  %v1830_v27 = vor.u32 %v1828_v18, %v1827_v41  ;;  %v1837_v28 = vor.u32 %v1835_v22, %v1834_v3 }
 0x19b   : > { %5315 = vmatprep.subr.bf16.mxu0 %v5674_v31  ;;  %5194 = vmatpush3.bf16.msra.mxu1 %v5673_v30  ;;  %v1879_v24 = vsel %vm6386_vm9, %v1816_v19, %v1878_v2  ;;  %v1882_v25 = vsel %vm6386_vm9, %v1823_v20, %v1881_v4  ;;  %v1985_v30 = vrot.slane %v1984_v23, 4 }
 0x19c   : > { %5195 = vmatprep.subr.bf16.mxu1 %v5675_v35  ;;  %1880 = vst [vmem:[#allocation3 + $0x8] sm:$0x1f] %v1879_v24  ;;  %1883 = vst [vmem:[#allocation3 + $0x10] sm:$0x1f] %v1882_v25  ;;  %v1885_v29 = vsel %vm6386_vm9, %v1830_v27, %v1884_v26  ;;  %v1888_v36 = vsel %vm6386_vm9, %v1837_v28, %v1887_v5 }
 0x19d   : > { %1886 = vst [vmem:[#allocation3 + $0x18] sm:$0x1f] %v1885_v29  ;;  %1889 = vst [vmem:[#allocation3 + $0x20] sm:$0x1f] %v1888_v36 }
 0x19e   : > { %5316 = vmatpush3.bf16.msra.mxu0 %v5674_v31  ;;  %v1989_v31 = vrot.slane %v1987_v13, 5 }
 0x19f   : > { %5317 = vmatprep.subr.bf16.mxu0 %v5676_v43  ;;  %5196 = vmatpush3.bf16.msra.mxu1 %v5675_v35  ;;  %v1761_v35 = vld [vmem:[%s6341_s18 + $0x28] sm:$0xff] }
 0x1a0   : > { %5197 = vmatprep.subr.bf16.mxu1 %v5677_v44  ;;  %v1776_v39 = vmul.f32 %v6345_v34, %v1761_v35  ;;  %v6413_v42 = vsel %vm6400_vm10, %v1985_v30, %v1989_v31 }
 0x1a2   : > { %5318 = vmatpush3.bf16.msra.mxu0 %v5676_v43  ;;  %v1763_v43 = vld [vmem:[%s6341_s18 + $0x38] sm:$0xff]  ;;  %v6420_v48 = vadd.f32 %v6352_v38, %v1776_v39 }
 0x1a3   : > { %5319 = vmatprep.subr.bf16.mxu0 %v5678_v57  ;;  %5198 = vmatpush3.bf16.msra.mxu1 %v5677_v44  ;;  %v3093_v44 = vld [vmem:[#allocation3 + $0x8] sm:$0x1e]  ;;  %v3094_v45 = vld [vmem:[#allocation3 + $0x10] sm:$0x1e]  ;;  %v6424_v50 = vmul.f32 %v6345_v34, %v1763_v43 }
 0x1a4   : > { %5199 = vmatprep.subr.bf16.mxu1 %v5679_v61  ;;  %v1927_v46 = vld [vmem:[#allocation3 + $0x8] sm:$0x1f]  ;;  %v4734_v51 = vcombine.low %v3093_v44, %v3093_v44  ;;  %v4735_v52 = vcombine.high %v3093_v44, %v3093_v44  ;;  %v4736_v53 = vcombine.low %v3094_v45, %v3094_v45  ;;  %v4737_v54 = vcombine.high %v3094_v45, %v3094_v45  ;;  %v1928_v55 = vld [vmem:[#allocation3 + $0x10] sm:$0x1f]  ;;  %v3095_v0 = vld [vmem:[#allocation3 + $0x18] sm:$0x1e] }
 0x1a5   : > { %v4557_v58 = vcombine.high %v1927_v46, %v1927_v46  ;;  %v4558_v59 = vcombine.low %v1928_v55, %v1928_v55  ;;  %v4559_v60 = vcombine.high %v1928_v55, %v1928_v55  ;;  %v4738_v1 = vcombine.low %v3095_v0, %v3095_v0  ;;  %v1929_v8 = vld [vmem:[#allocation3 + $0x18] sm:$0x1f]  ;;  %v3096_v11 = vld [vmem:[#allocation3 + $0x20] sm:$0x1e] }
 0x1a6   : > { %5320 = vmatpush3.bf16.msra.mxu0 %v5678_v57  ;;  %v4556_v57 = vcombine.low %v1927_v46, %v1927_v46  ;;  %v3143_v62 = vrot.slane %v4735_v52, 5  ;;  %v4751_v63 = vrot.slane %v4736_v53, 9  ;;  %v3147_v34 = vrot.slane %v4737_v54, 5  ;;  %v1930_v55 = vld [vmem:[#allocation3 + $0x20] sm:$0x1f] }
 0x1a7   : > { %5329 = vmatprep.subr.bf16.mxu0 %v6377_v6  ;;  %5200 = vmatpush3.bf16.msra.mxu1 %v5679_v61  ;;  %v4750_v61 = vrot.slane %v4734_v51, 9  ;;  %v4739_v2 = vcombine.high %v3095_v0, %v3095_v0  ;;  %v2001_v12 = vshll.u32 %v4557_v58, 16  ;;  %v4560_v13 = vcombine.low %v1929_v8, %v1929_v8 }
 0x1a8   : > { %5209 = vmatprep.subr.bf16.mxu1 %v6382_v14  ;;  %v1992_v4 = vshrl.u32 %v4556_v57, 16  ;;  %v1995_v7 = vshll.u32 %v4556_v57, 16  ;;  %v3148_v10 = vsel %vm6428_vm13, %v4751_v63, %v3147_v34  ;;  %v4740_v17 = vcombine.low %v3096_v11, %v3096_v11 }
 0x1a9   : > { %v3144_v9 = vsel %vm6428_vm13, %v4750_v61, %v3143_v62  ;;  %v4741_v18 = vcombine.high %v3096_v11, %v3096_v11  ;;  %v4752_v19 = vrot.slane %v4738_v1, 9  ;;  %v3151_v20 = vrot.slane %v4739_v2, 5  ;;  %v5699_v1 = vld [vmem:[%s6852_s2 + $0x8] sm:$0xff]  }
 0x1aa   : > { %v4774_v16 = vcombine.low %v3144_v9, %v3148_v10  ;;  %v1994_v41 = vrot.slane %v1992_v4, 4  ;;  %v1997_v21 = vrot.slane %v1995_v7, 5  ;;  %v2003_v22 = vrot.slane %v2001_v12, 5  ;;  %v1890_v7 = vld [vmem:[#allocation3 + $0x28] sm:$0x1f] }
 0x1ab   : > { %v4753_v23 = vrot.slane %v4740_v17, 9  ;;  %v3155_v24 = vrot.slane %v4741_v18, 5  ;;  %v4561_v25 = vcombine.high %v1929_v8, %v1929_v8  ;;  %v2006_v26 = vshrl.u32 %v4558_v59, 16  ;;  %v1893_v10 = vld [vmem:[#allocation3 + $0x30] sm:$0x1f] }
 0x1ac   : > { %5321 = vmatprep.mubr.bf16.mxu0 %v4774_v16  ;;  %v3152_v27 = vsel %vm6428_vm13, %v4752_v19, %v3151_v20  ;;  %v1998_v3 = vor.u32 %v1997_v21, %v1994_v41  ;;  %v2009_v5 = vshll.u32 %v4558_v59, 16  ;;  %v2015_v28 = vshll.u32 %v4559_v60, 16 }
 0x1ad   : > { %v3156_v29 = vsel %vm6428_vm13, %v4753_v23, %v3155_v24  ;;  %v2008_v30 = vrot.slane %v2006_v26, 4  ;;  %v2020_v31 = vshrl.u32 %v4560_v13, 16  ;;  %v2023_v33 = vshll.u32 %v4560_v13, 16 }
 0x1ae   : > { %v4775_v35 = vcombine.low %v3152_v27, %v3156_v29  ;;  %v1999_v36 = vrot.slane %v1998_v3, 4  ;;  %v2011_v39 = vrot.slane %v2009_v5, 5  ;;  %v2017_v40 = vrot.slane %v2015_v28, 5  ;;  %v5701_v27 = vld [vmem:[%s6852_s2 + $0x10] sm:$0xff]  }
 0x1af   : > { %v2022_v43 = vrot.slane %v2020_v31, 4  ;;  %v2025_v44 = vrot.slane %v2023_v33, 5  ;;  %v2029_v45 = vshll.u32 %v4561_v25, 16  ;;  %v1798_v46 = vmax.f32 %v6417_v47, 0.0  ;;  %v5700_v47 = vld [vmem:[%s6852_s2 + $0x190] sm:$0xff]  }
 0x1b0   : > { %5322 = vmatmul.mubr.bf16.vlgmr.msra.gmra.mrb[0].mxu0 %v4775_v35  ;;  %v2004_v51 = vsel %vm6400_vm10, %v1999_v36, %v2003_v22  ;;  %v2012_v52 = vor.u32 %v2011_v39, %v2008_v30  ;;  %v1799_v53 = vmax.f32 %v6420_v48, 0.0  ;;  %v1792_v54 = vadd.f32 %v6352_v38, %v1777_v49  ;;  %v1896_v25 = vld [vmem:[#allocation3 + $0x38] sm:$0x1f]  ;;  %v5704_v30 = vld [vmem:[%s6852_s2 + $0x1a0] sm:$0xff]   ;;  %v5706_v39 = vld [vmem:[%s6852_s2 + $0x1a8] sm:$0xff]  }
 0x1b1   : > { %5330 = vmatpush3.bf16.msra.mxu0 %v6377_v6  ;;  %v4586_v57 = vcombine.low %v6413_v42, %v2004_v51  ;;  %v2026_v58 = vor.u32 %v2025_v44, %v2022_v43  ;;  %v2031_v59 = vrot.slane %v2029_v45, 5  ;;  %v1806_v60 = vpack.c.bf16 %v1798_v46, %v1798_v46  ;;  %v1899_v35 = vld [vmem:[#allocation3 + $0x40] sm:$0x1f] }
 0x1b2   : > { %5331 = vmatprep.subr.bf16.mxu0 %v5694_v37  ;;  %v2013_v61 = vrot.slane %v2012_v52, 4  ;;  %v1807_v62 = vpack.c.bf16 %v1799_v53, %v1799_v53  ;;  %v1793_v48 = vadd.f32 %v6352_v38, %v6424_v50  ;;  %v1800_v63 = vmax.f32 %v1792_v54, 0.0  ;;  %v5702_v50 = vld [vmem:[%s6852_s2 + $0x198] sm:$0xff]   ;;  %v5705_v51 = vld [vmem:[%s6852_s2 + $0x20] sm:$0xff]  }
 0x1b3   : > { %5201 = vmatprep.mubr.bf16.mxu1 %v4586_v57  ;;  %v2027_v49 = vrot.slane %v2026_v58, 4  ;;  %v1839_v34 = vshrl.u32 %v1806_v60, 16  ;;  %v1842_v6 = vshll.u32 %v1806_v60, 16  ;;  %v4562_v0 = vcombine.low %v1930_v55, %v1930_v55 }
 0x1b4   : > { %v2018_v42 = vsel %vm6400_vm10, %v2013_v61, %v2017_v40  ;;  %v1846_v2 = vshrl.u32 %v1807_v62, 16  ;;  %v1849_v4 = vshll.u32 %v1807_v62, 16  ;;  %v1801_v8 = vmax.f32 %v1793_v48, 0.0 }
 0x1b5   : > { %v2032_v38 = vsel %vm6400_vm10, %v2027_v49, %v2031_v59  ;;  %5332 = vmatpush3.bf16.msra.mxu0 %v5694_v37  ;;  %v1841_v9 = vrot.slane %v1839_v34, 7  ;;  %v1808_v11 = vpack.c.bf16 %v1800_v63, %v1800_v63  ;;  %v4563_v12 = vcombine.high %v1930_v55, %v1930_v55  ;;  %v5703_v37 = vld [vmem:[%s6852_s2 + $0x18] sm:$0xff]  }
 0x1b6   : > { %v4587_v13 = vcombine.low %v2018_v42, %v2032_v38  ;;  %5333 = vmatprep.subr.bf16.mxu0 %v5700_v47  ;;  %v1848_v16 = vrot.slane %v1846_v2, 7  ;;  %v1809_v17 = vpack.c.bf16 %v1801_v8, %v1801_v8  ;;  %v2034_v18 = vshrl.u32 %v4562_v0, 16 }
 0x1b7   : > { %v1844_v19 = vor.u32 %v1842_v6, %v1841_v9  ;;  %v1853_v20 = vshrl.u32 %v1808_v11, 16  ;;  %v1856_v41 = vshll.u32 %v1808_v11, 16  ;;  %v2037_v21 = vshll.u32 %v4562_v0, 16 }
 0x1b8   : > { %5202 = vmatmul.mubr.bf16.vlgmr.msra.gmra.mrb[0].mxu1 %v4587_v13  ;;  %v1851_v22 = vor.u32 %v1849_v4, %v1848_v16  ;;  %v1860_v23 = vshrl.u32 %v1809_v17, 16  ;;  %v1863_v24 = vshll.u32 %v1809_v17, 16  ;;  %v2036_v26 = vrot.slane %v2034_v18, 4  ;;  %v5722_v18 = vld [vmem:[%s6852_s2 + $0x1b8] sm:$0xff]  }
 0x1b9   : > { %5210 = vmatpush3.bf16.msra.mxu1 %v6382_v14  ;;  %5334 = vmatpush3.bf16.msra.mxu0 %v5700_v47  ;;  %v1891_v3 = vsel %vm6386_vm9, %v1844_v19, %v1890_v7  ;;  %v1855_v5 = vrot.slane %v1853_v20, 7  ;;  %v2039_v28 = vrot.slane %v2037_v21, 5  ;;  %v2043_v29 = vshll.u32 %v4563_v12, 16  ;;  %v5707_v7 = vld [vmem:[%s6852_s2 + $0x28] sm:$0xff]  }
 0x1ba   : > { %5211 = vmatprep.subr.bf16.mxu1 %v5699_v1  ;;  %5335 = vmatprep.subr.bf16.mxu0 %v5702_v50  ;;  %1892 = vst [vmem:[#allocation3 + $0x28] sm:$0x1f] %v1891_v3  ;;  %v1894_v14 = vsel %vm6386_vm9, %v1851_v22, %v1893_v10  ;;  %v1862_v31 = vrot.slane %v1860_v23, 7 }
 0x1bb   : > { %1895 = vst [vmem:[#allocation3 + $0x30] sm:$0x1f] %v1894_v14  ;;  %v1858_v33 = vor.u32 %v1856_v41, %v1855_v5  ;;  %v2040_v36 = vor.u32 %v2039_v28, %v2036_v26  ;;  %v2045_v45 = vrot.slane %v2043_v29, 5 }
 0x1bc   : > { %v1865_v40 = vor.u32 %v1863_v24, %v1862_v31 }
 0x1bd   : > { %5212 = vmatpush3.bf16.msra.mxu1 %v5699_v1  ;;  %5336 = vmatpush3.bf16.msra.mxu0 %v5702_v50  ;;  %v1897_v43 = vsel %vm6386_vm9, %v1858_v33, %v1896_v25  ;;  %v2041_v44 = vrot.slane %v2040_v36, 4  ;;  %v5721_v25 = vld [vmem:[%s6852_s2 + $0x30] sm:$0xff]  }
 0x1be   : > { %5213 = vmatprep.subr.bf16.mxu1 %v5701_v27  ;;  %5337 = vmatprep.subr.bf16.mxu0 %v5704_v30  ;;  %1898 = vst [vmem:[#allocation3 + $0x38] sm:$0x1f] %v1897_v43  ;;  %v1900_v46 = vsel %vm6386_vm9, %v1865_v40, %v1899_v35  ;;  %v5728_v33 = vld [vmem:[#allocation3 + $0x10] ss:$8 sps:$4 sm:$0xff]   ;;  %v5729_v35 = vld [vmem:[%s6852_s2 + $0x1c0] sm:$0xff]  }
 0x1bf   : > { %1901 = vst [vmem:[#allocation3 + $0x40] sm:$0x1f] %v1900_v46  ;;  %v6491_v54 = vsel %vm6400_vm10, %v2041_v44, %v2045_v45  ;;  %v5727_v46 = vld [vmem:[%s6852_s2 + $0x38] sm:$0xff]  }
 0x1c1   : > { %5214 = vmatpush3.bf16.msra.mxu1 %v5701_v27  ;;  %5338 = vmatpush3.bf16.msra.mxu0 %v5704_v30  ;;  %v3097_v52 = vld [vmem:[#allocation3 + $0x28] sm:$0x1e] }
 0x1c2   : > { %v1931_v53 = vld [vmem:[#allocation3 + $0x28] sm:$0x1f]  ;;  %5215 = vmatprep.subr.bf16.mxu1 %v5703_v37  ;;  %5339 = vmatprep.subr.bf16.mxu0 %v5706_v39  ;;  %v3098_v55 = vld [vmem:[#allocation3 + $0x30] sm:$0x1e]  ;;  %v4742_v57 = vcombine.low %v3097_v52, %v3097_v52  ;;  %v4743_v58 = vcombine.high %v3097_v52, %v3097_v52 }
 0x1c3   : > { %v4564_v59 = vcombine.low %v1931_v53, %v1931_v53  ;;  %v1932_v47 = vld [vmem:[#allocation3 + $0x30] sm:$0x1f]  ;;  %v4744_v60 = vcombine.low %v3098_v55, %v3098_v55  ;;  %v4745_v61 = vcombine.high %v3098_v55, %v3098_v55  ;;  %v4565_v62 = vcombine.high %v1931_v53, %v1931_v53 }
 0x1c4   : > { %v4566_v48 = vcombine.low %v1932_v47, %v1932_v47  ;;  %v4754_v63 = vrot.slane %v4742_v57, 9  ;;  %v3159_v49 = vrot.slane %v4743_v58, 5  ;;  %v4567_v4 = vcombine.high %v1932_v47, %v1932_v47  ;;  %v3498_v57 = vld [vmem:[#allocation3 + $0x10] sm:$0x1f]  ;;  %v3499_v58 = vld [vmem:[#allocation3 + $0x18] sm:$0x1f] }
 0x1c5   : > { %v2048_v34 = vshrl.u32 %v4564_v59, 16  ;;  %v2051_v6 = vshll.u32 %v4564_v59, 16  ;;  %5216 = vmatpush3.bf16.msra.mxu1 %v5703_v37  ;;  %5340 = vmatpush3.bf16.msra.mxu0 %v5706_v39  ;;  %v4755_v0 = vrot.slane %v4744_v60, 9  ;;  %v3163_v42 = vrot.slane %v4745_v61, 5  ;;  %v3099_v1 = vld [vmem:[#allocation3 + $0x38] sm:$0x1e] }
 0x1c6   : > { %v2057_v2 = vshll.u32 %v4565_v62, 16  ;;  %5217 = vmatprep.subr.bf16.mxu1 %v5705_v51  ;;  %v3160_v8 = vsel %vm6428_vm13, %v4754_v63, %v3159_v49  ;;  %5341 = vmatprep.subr.bf16.mxu0 %v5712_v15  ;;  %v3100_v38 = vld [vmem:[#allocation3 + $0x40] sm:$0x1e]  ;;  %v4746_v50 = vcombine.low %v3099_v1, %v3099_v1  ;;  %v4747_v9 = vcombine.high %v3099_v1, %v3099_v1  ;;  %v1933_v11 = vld [vmem:[#allocation3 + $0x38] sm:$0x1f] }
 0x1c7   : > { %v2050_v10 = vrot.slane %v2048_v34, 4  ;;  %v3164_v12 = vsel %vm6428_vm13, %v4755_v0, %v3163_v42  ;;  %v4748_v13 = vcombine.low %v3100_v38, %v3100_v38  ;;  %v4749_v16 = vcombine.high %v3100_v38, %v3100_v38  ;;  %v5730_v63 = vld [vmem:[#allocation3 + $0x20] ss:$8 sps:$4 sm:$0xff]  }
 0x1c8   : > { %v2053_v17 = vrot.slane %v2051_v6, 5  ;;  %v4776_v19 = vcombine.low %v3160_v8, %v3164_v12  ;;  %v4756_v20 = vrot.slane %v4746_v50, 9  ;;  %v3167_v41 = vrot.slane %v4747_v9, 5  ;;  %v5731_v42 = vld [vmem:[#allocation3] ss:$8 sps:$4 sm:$0xff]  }
 0x1c9   : > { %v2059_v21 = vrot.slane %v2057_v2, 5  ;;  %5218 = vmatpush3.bf16.msra.mxu1 %v5705_v51  ;;  %v4757_v22 = vrot.slane %v4748_v13, 9  ;;  %v3171_v23 = vrot.slane %v4749_v16, 5  ;;  %5342 = vmatpush3.bf16.msra.mxu0 %v5712_v15  ;;  %v4568_v26 = vcombine.low %v1933_v11, %v1933_v11  ;;  %v6527_v1 = vld [vmem:[%s6852_s2 + $0x80] sm:$0xff]   ;;  %v5744_v16 = vld [vmem:[#allocation3 + $0x30] ss:$8 sps:$4 sm:$0xff]  }
 0x1ca   : > { %v2054_v24 = vor.u32 %v2053_v17, %v2050_v10  ;;  %5219 = vmatprep.subr.bf16.mxu1 %v5707_v7  ;;  %5325 = vmatprep.mubr.bf16.mxu0 %v4776_v19  ;;  %v3168_v27 = vsel %vm6428_vm13, %v4756_v20, %v3167_v41  ;;  %v4569_v3 = vcombine.high %v1933_v11, %v1933_v11  ;;  %v2062_v5 = vshrl.u32 %v4566_v48, 16  ;;  %v5733_v11 = vld [vmem:[%s6852_s2 + $0x1c8] sm:$0xff]   ;;  %v2372_v41 = vld [vmem:[#allocation3] sm:$0x1e] }
 0x1cb   : > { %v2065_v28 = vshll.u32 %v4566_v48, 16  ;;  %v3172_v29 = vsel %vm6428_vm13, %v4757_v22, %v3171_v23  ;;  %5343 = vmatprep.subr.bf16.mxu0 %v5722_v18  ;;  %v2071_v14 = vshll.u32 %v4567_v4, 16  ;;  %v2076_v31 = vshrl.u32 %v4568_v26, 16 }
 0x1cc   : > { %v2055_v30 = vrot.slane %v2054_v24, 4  ;;  %v4777_v36 = vcombine.low %v3168_v27, %v3172_v29  ;;  %v2064_v37 = vrot.slane %v2062_v5, 4  ;;  %v2079_v40 = vshll.u32 %v4568_v26, 16  ;;  %v5736_v24 = vld [vmem:[%s6852_s2 + $0x1d0] sm:$0xff]   ;;  %v2373_v27 = vld [vmem:[#allocation3 + $0x8] sm:$0x1e] }
 0x1cd   : > { %v2067_v39 = vrot.slane %v2065_v28, 5  ;;  %5220 = vmatpush3.bf16.msra.mxu1 %v5707_v7  ;;  %v2078_v44 = vrot.slane %v2076_v31, 4  ;;  %v2085_v45 = vshll.u32 %v4569_v3, 16  ;;  %5344 = vmatpush3.bf16.msra.mxu0 %v5722_v18  ;;  %v2073_v53 = vrot.slane %v2071_v14, 5  ;;  %v3500_v7 = vld [vmem:[#allocation3 + $0x20] sm:$0x1f] }
 0x1ce   : > { %v2060_v43 = vsel %vm6400_vm10, %v2055_v30, %v2059_v21  ;;  %5326 = vmatmul.mubr.bf16.gmra.mrb[4].mxu0 %v4777_v36  ;;  %5221 = vmatprep.subr.bf16.mxu1 %v5721_v25  ;;  %v2081_v55 = vrot.slane %v2079_v40, 5  ;;  %v4814_v15 = vcombine.low %v3498_v57, %v3498_v57  ;;  %v4815_v59 = vcombine.high %v3498_v57, %v3498_v57  ;;  %v3501_v18 = vld [vmem:[#allocation3 + $0x28] sm:$0x1f]  ;;  %v5734_v3 = vld [vmem:[#allocation3 + $0x10] ss:$8 sps:$4 sm:$0xff]  }
 0x1cf   : > { %v4588_v51 = vcombine.low %v6491_v54, %v2060_v43  ;;  %v2068_v52 = vor.u32 %v2067_v39, %v2064_v37  ;;  %5345 = vmatprep.mubr.bf16.mxu0 %v5728_v33  ;;  %5353 = vmatprep.subr.bf16.mxu0 %v5729_v35  ;;  %v4816_v47 = vcombine.low %v3499_v58, %v3499_v58  ;;  %v2087_v62 = vrot.slane %v2085_v45, 5  ;;  %v5746_v5 = vld [vmem:[#allocation3 + $0x40] ss:$8 sps:$4 sm:$0xff]   ;;  %v5738_v29 = vld [vmem:[%s6852_s2 + $0x1d8] sm:$0xff]  }
 0x1d0   : > { %v2082_v61 = vor.u32 %v2081_v55, %v2078_v44  ;;  %v4817_v48 = vcombine.high %v3499_v58, %v3499_v58  ;;  %v3547_v49 = vshrl.u32 %v4814_v15, 16  ;;  %v3550_v54 = vshll.u32 %v4814_v15, 16  ;;  %v5747_v33 = vld [vmem:[#allocation3 + $0x20] ss:$8 sps:$4 sm:$0xff]  }
 0x1d1   : > { %5205 = vmatprep.mubr.bf16.mxu1 %v4588_v51  ;;  %v2069_v60 = vrot.slane %v2068_v52, 4  ;;  %5222 = vmatpush3.bf16.msra.mxu1 %v5721_v25  ;;  %v3561_v34 = vshrl.u32 %v4816_v47, 16  ;;  %v3556_v2 = vshll.u32 %v4815_v59, 16  ;;  %v3564_v4 = vshll.u32 %v4816_v47, 16  ;;  %v5735_v45 = vld [vmem:[%s6852_s2 + $0x88] sm:$0xff]   ;;  %v5740_v55 = vld [vmem:[%s6852_s2 + $0x1e0] sm:$0xff]  }
 0x1d2   : > { %v2083_v0 = vrot.slane %v2082_v61, 4  ;;  %5223 = vmatprep.subr.bf16.mxu1 %v5727_v46  ;;  %v3549_v8 = vrot.slane %v3547_v49, 4  ;;  %v3552_v38 = vrot.slane %v3550_v54, 5  ;;  %v3570_v9 = vshll.u32 %v4817_v48, 16  ;;  %v5737_v59 = vld [vmem:[%s6852_s2 + $0x90] sm:$0xff]  }
 0x1d3   : > { %v2074_v6 = vsel %vm6400_vm10, %v2069_v60, %v2073_v53  ;;  %v3563_v50 = vrot.slane %v3561_v34, 4  ;;  %v3566_v12 = vrot.slane %v3564_v4, 5  ;;  %v4818_v20 = vcombine.low %v3500_v7, %v3500_v7  ;;  %v3502_v61 = vld [vmem:[#allocation3 + $0x30] sm:$0x1f] }
 0x1d4   : > { %v2088_v10 = vsel %vm6400_vm10, %v2083_v0, %v2087_v62  ;;  %v3553_v17 = vor.u32 %v3552_v38, %v3549_v8  ;;  %v3558_v22 = vrot.slane %v3556_v2, 5  ;;  %v3572_v23 = vrot.slane %v3570_v9, 5  ;;  %v5750_v49 = vld [vmem:[#allocation3 + $0x30] ss:$8 sps:$4 sm:$0xff]   ;;  %v6566_v8 = vld [vmem:[#allocation3 + $0x48] sm:$0x1f] }
 0x1d5   : > { %v4589_v13 = vcombine.low %v2074_v6, %v2088_v10  ;;  %5224 = vmatpush3.bf16.msra.mxu1 %v5727_v46  ;;  %v3567_v19 = vor.u32 %v3566_v12, %v3563_v50  ;;  %v4820_v26 = vcombine.low %v3501_v18, %v3501_v18  ;;  %v4819_v28 = vcombine.high %v3500_v7, %v3500_v7  ;;  %v5739_v38 = vld [vmem:[%s6852_s2 + $0x98] sm:$0xff]   ;;  %v2374_v9 = vld [vmem:[#allocation3 + $0x10] sm:$0x1e] }
 0x1d6   : > { %5346 = vmatmul.mubr.bf16.vlgmr.msra.gmra.mrb[0].mxu0 %v5730_v63  ;;  %5233 = vmatprep.subr.bf16.mxu1 %v6527_v1  ;;  %v3554_v21 = vrot.slane %v3553_v17, 4  ;;  %v3575_v30 = vshrl.u32 %v4818_v20, 16  ;;  %v3578_v14 = vshll.u32 %v4818_v20, 16  ;;  %v4610_v31 = vcombine.low %v2372_v41, %v2372_v41  ;;  %v3503_v63 = vld [vmem:[#allocation3 + $0x38] sm:$0x1f] }
 0x1d7   : > { %5206 = vmatmul.mubr.bf16.gmra.mrb[4].mxu1 %v4589_v13  ;;  %5354 = vmatpush3.bf16.msra.mxu0 %v5729_v35  ;;  %v3568_v25 = vrot.slane %v3567_v19, 4  ;;  %v4611_v37 = vcombine.high %v2372_v41, %v2372_v41  ;;  %v4612_v39 = vcombine.low %v2373_v27, %v2373_v27  ;;  %v3589_v40 = vshrl.u32 %v4820_v26, 16  ;;  %v5742_v13 = vld [vmem:[%s6852_s2 + $0x1e8] sm:$0xff]  }
 0x1d8   : > { %5225 = vmatprep.mubr.bf16.mxu1 %v5731_v42  ;;  %5355 = vmatprep.subr.bf16.mxu0 %v5733_v11  ;;  %v3559_v35 = vsel %vm6400_vm10, %v3554_v21, %v3558_v22  ;;  %v3592_v43 = vshll.u32 %v4820_v26, 16  ;;  %v4613_v44 = vcombine.high %v2373_v27, %v2373_v27  ;;  %v4821_v46 = vcombine.high %v3501_v18, %v3501_v18  ;;  %v6562_v42 = vld [vmem:[#allocation3 + $0x40] sm:$0x1f] }
 0x1d9   : > { %5349 = vmatprep.mubr.bf16.mxu0 %v5744_v16  ;;  %v3573_v36 = vsel %vm6400_vm10, %v3568_v25, %v3572_v23  ;;  %v6548_v51 = vshll.u32 %v4819_v28, 16  ;;  %v4626_v52 = vrot.slane %v4610_v31, 9  ;;  %v2425_v53 = vrot.slane %v4611_v37, 5 }
 0x1da   : > { %v4846_v57 = vcombine.low %v3559_v35, %v3573_v36  ;;  %v4627_v58 = vrot.slane %v4612_v39, 9  ;;  %v2429_v15 = vrot.slane %v4613_v44, 5  ;;  %v3577_v47 = vrot.slane %v3575_v30, 4  ;;  %v2375_v30 = vld [vmem:[#allocation3 + $0x18] sm:$0x1e]  ;;  %v5741_v36 = vld [vmem:[%s6852_s2 + $0xa0] sm:$0xff]  }
 0x1db   : > { %5356 = vmatpush3.bf16.msra.mxu0 %v5733_v11  ;;  %v3580_v60 = vrot.slane %v3578_v14, 5  ;;  %v3591_v62 = vrot.slane %v3589_v40, 4  ;;  %v3594_v48 = vrot.slane %v3592_v43, 5  ;;  %v3586_v54 = vrot.slane %v6548_v51, 5 }
 0x1dc   : > { %5357 = vmatprep.subr.bf16.mxu0 %v5736_v24  ;;  %v6558_v34 = vshll.u32 %v4821_v46, 16  ;;  %v2426_v6 = vsel %vm6428_vm13, %v4626_v52, %v2425_v53  ;;  %v4822_v0 = vcombine.low %v3502_v61, %v3502_v61  ;;  %v4823_v2 = vcombine.high %v3502_v61, %v3502_v61  ;;  %v5743_v53 = vld [vmem:[%s6852_s2 + $0xa8] sm:$0xff]  }
 0x1dd   : > { %v4824_v4 = vcombine.low %v3503_v63, %v3503_v63  ;;  %v4825_v7 = vcombine.high %v3503_v63, %v3503_v63  ;;  %v3581_v50 = vor.u32 %v3580_v60, %v3577_v47  ;;  %v4826_v12 = vcombine.low %v6562_v42, %v6562_v42 }
 0x1de   : > { %5350 = vmatmul.mubr.bf16.gmra.mrb[4].mxu0 %v5746_v5  ;;  %v3603_v10 = vshrl.u32 %v4822_v0, 16  ;;  %v3606_v11 = vshll.u32 %v4822_v0, 16  ;;  %v3595_v16 = vor.u32 %v3594_v48, %v3591_v62  ;;  %v3612_v17 = vshll.u32 %v4823_v2, 16  ;;  %v2377_v0 = vld [vmem:[#allocation3 + $0x28] sm:$0x1e] }
 0x1df   : > { %5226 = vmatmul.mubr.bf16.vlgmr.msra.gmra.mrb[0].mxu1 %v5734_v3  ;;  %5358 = vmatpush3.bf16.msra.mxu0 %v5736_v24  ;;  %v3617_v18 = vshrl.u32 %v4824_v4, 16  ;;  %v3620_v19 = vshll.u32 %v4824_v4, 16  ;;  %v4828_v22 = vcombine.low %v6566_v8, %v6566_v8  ;;  %v3600_v23 = vrot.slane %v6558_v34, 5  ;;  %v3812_v4 = vld [vmem:[#allocation3 + $0x10] sm:$0x1e] }
 0x1e0   : > { %5234 = vmatpush3.bf16.msra.mxu1 %v6527_v1  ;;  %5359 = vmatprep.subr.bf16.mxu0 %v5738_v29  ;;  %v2430_v1 = vsel %vm6428_vm13, %v4627_v58, %v2429_v15  ;;  %v3605_v41 = vrot.slane %v3603_v10, 4  ;;  %v3608_v21 = vrot.slane %v3606_v11, 5  ;;  %v3626_v26 = vshll.u32 %v4825_v7, 16  ;;  %v5748_v10 = vld [vmem:[%s6852_s2 + $0xb0] sm:$0xff]  }
 0x1e1   : > { %5235 = vmatprep.subr.bf16.mxu1 %v5735_v45  ;;  %5229 = vmatprep.mubr.bf16.mxu1 %v5747_v33  ;;  %v4650_v20 = vcombine.low %v2426_v6, %v2430_v1  ;;  %v3619_v24 = vrot.slane %v3617_v18, 4  ;;  %v3622_v25 = vrot.slane %v3620_v19, 5  ;;  %v4614_v27 = vcombine.low %v2374_v9, %v2374_v9  ;;  %v2378_v19 = vld [vmem:[#allocation3 + $0x30] sm:$0x1e] }
 0x1e2   : > { %5369 = vmatprep.mubr.bf16.mxu0 %v4846_v57  ;;  %v3609_v3 = vor.u32 %v3608_v21, %v3605_v41  ;;  %v3631_v5 = vshrl.u32 %v4826_v12, 16  ;;  %v3634_v28 = vshll.u32 %v4826_v12, 16  ;;  %v4827_v31 = vcombine.high %v6562_v42, %v6562_v42  ;;  %v5751_v21 = vld [vmem:[%s6852_s2 + $0xb8] sm:$0xff]  }
 0x1e3   : > { %5360 = vmatpush3.bf16.msra.mxu0 %v5738_v29  ;;  %v5745_v29 = vld [vmem:[%s6852_s2 + $0x1f0] sm:$0xff]   ;;  %v3623_v14 = vor.u32 %v3622_v25, %v3619_v24  ;;  %v3645_v33 = vshrl.u32 %v4828_v22, 16  ;;  %v3648_v35 = vshll.u32 %v4828_v22, 16  ;;  %v3582_v37 = vrot.slane %v3581_v50, 4 }
 0x1e4   : > { %5236 = vmatpush3.bf16.msra.mxu1 %v5735_v45  ;;  %5361 = vmatprep.subr.bf16.mxu0 %v5740_v55  ;;  %v3596_v39 = vrot.slane %v3595_v16, 4  ;;  %v4615_v40 = vcombine.high %v2374_v9, %v2374_v9  ;;  %v3614_v43 = vrot.slane %v3612_v17, 5  ;;  %v3610_v44 = vrot.slane %v3609_v3, 4  ;;  %v3813_v9 = vld [vmem:[#allocation3 + $0x18] sm:$0x1e] }
 0x1e5   : > { %5237 = vmatprep.subr.bf16.mxu1 %v5737_v59  ;;  %v3628_v45 = vrot.slane %v3626_v26, 5  ;;  %v4829_v46 = vcombine.high %v6566_v8, %v6566_v8  ;;  %v3633_v52 = vrot.slane %v3631_v5, 4  ;;  %v3624_v57 = vrot.slane %v3623_v14, 4  ;;  %v5766_v26 = vld [vmem:[%s6852_s2 + $0x208] sm:$0xff]   ;;  %v2379_v3 = vld [vmem:[#allocation3 + $0x38] sm:$0x1e] }
 0x1e6   : > { %v3636_v58 = vrot.slane %v3634_v28, 5  ;;  %v3647_v15 = vrot.slane %v3645_v33, 4  ;;  %v4616_v47 = vcombine.low %v2375_v30, %v2375_v30  ;;  %v4617_v60 = vcombine.high %v2375_v30, %v2375_v30 }
 0x1e7   : > { %5362 = vmatpush3.bf16.msra.mxu0 %v5740_v55  ;;  %5230 = vmatmul.mubr.bf16.gmra.mrb[4].mxu1 %v5750_v49  ;;  %v5749_v55 = vld [vmem:[%s6852_s2 + $0x1f8] sm:$0xff]   ;;  %v6595_v61 = vrot.slane %v4614_v27, 9  ;;  %v3640_v62 = vshll.u32 %v4827_v31, 16  ;;  %v3587_v48 = vsel %vm6400_vm10, %v3582_v37, %v3586_v54  ;;  %v3601_v63 = vsel %vm6400_vm10, %v3596_v39, %v3600_v23  ;;  %v2376_v49 = vld [vmem:[#allocation3 + $0x20] sm:$0x1e] }
 0x1e8   : > { %5238 = vmatpush3.bf16.msra.mxu1 %v5737_v59  ;;  %5363 = vmatprep.subr.bf16.mxu0 %v5742_v13  ;;  %v3650_v59 = vrot.slane %v3648_v35, 5  ;;  %v6603_v34 = vrot.slane %v4615_v40, 5  ;;  %v3654_v6 = vshll.u32 %v4829_v46, 16  ;;  %v3615_v42 = vsel %vm6400_vm10, %v3610_v44, %v3614_v43  ;;  %v5756_v54 = vld [vmem:[%s6852_s2 + $0x200] sm:$0xff]   ;;  %v5772_v43 = vld [vmem:[%s6852_s2 + $0x210] sm:$0xff]  }
 0x1e9   : > { %5239 = vmatprep.subr.bf16.mxu1 %v5739_v38  ;;  %5249 = vmatprep.mubr.bf16.mxu1 %v4650_v20  ;;  %v3629_v1 = vsel %vm6400_vm10, %v3624_v57, %v3628_v45  ;;  %v3637_v2 = vor.u32 %v3636_v58, %v3633_v52  ;;  %v4847_v7 = vcombine.low %v3587_v48, %v3601_v63  ;;  %v4629_v8 = vrot.slane %v4616_v47, 9  ;;  %v5765_v52 = vld [vmem:[%s6852_s2 + $0xc0] sm:$0xff]   ;;  %v5771_v63 = vld [vmem:[%s6852_s2 + $0xc8] sm:$0xff]  }
 0x1ea   : > { %v3651_v51 = vor.u32 %v3650_v59, %v3647_v15  ;;  %v3642_v50 = vrot.slane %v3640_v62, 5  ;;  %v4618_v11 = vcombine.low %v2376_v49, %v2376_v49  ;;  %v4619_v12 = vcombine.high %v2376_v49, %v2376_v49  ;;  %v5774_v15 = vld [vmem:[%s6852_s2 + $0x218] sm:$0xff]  }
 0x1eb   : > { %5364 = vmatpush3.bf16.msra.mxu0 %v5742_v13  ;;  %v4620_v13 = vcombine.low %v2377_v0, %v2377_v0  ;;  %v4621_v16 = vcombine.high %v2377_v0, %v2377_v0  ;;  %v4848_v17 = vcombine.low %v3615_v42, %v3629_v1  ;;  %v3656_v18 = vrot.slane %v3654_v6, 5  ;;  %v5773_v6 = vld [vmem:[%s6852_s2 + $0xd0] sm:$0xff]   ;;  %v5776_v0 = vld [vmem:[%s6852_s2 + $0x220] sm:$0xff]  }
 0x1ec   : > { %5240 = vmatpush3.bf16.msra.mxu1 %v5739_v38  ;;  %5365 = vmatprep.subr.bf16.mxu0 %v5745_v29  ;;  %v2437_v38 = vrot.slane %v4617_v60, 5  ;;  %v4858_v20 = vcombine.low %v3812_v4, %v3812_v4  ;;  %v4859_v41 = vcombine.high %v3812_v4, %v3812_v4  ;;  %v3638_v22 = vrot.slane %v3637_v2, 4  ;;  %v5778_v4 = vld [vmem:[%s6852_s2 + $0x228] sm:$0xff]  }
 0x1ed   : > { %5241 = vmatprep.subr.bf16.mxu1 %v5741_v36  ;;  %v3652_v23 = vrot.slane %v3651_v51, 4  ;;  %v4860_v24 = vcombine.low %v3813_v9, %v3813_v9  ;;  %v4861_v25 = vcombine.high %v3813_v9, %v3813_v9  ;;  %v2434_v27 = vsel %vm6428_vm13, %v6595_v61, %v6603_v34  ;;  %v3814_v51 = vld [vmem:[#allocation3 + $0x20] sm:$0x1e] }
 0x1ee   : > { %v4630_v5 = vrot.slane %v4618_v11, 9  ;;  %v2441_v28 = vrot.slane %v4619_v12, 5  ;;  %v2445_v30 = vrot.slane %v4621_v16, 5  ;;  %v2438_v14 = vsel %vm6428_vm13, %v4629_v8, %v2437_v38  ;;  %v5775_v8 = vld [vmem:[%s6852_s2 + $0xd8] sm:$0xff]   ;;  %v5808_v38 = vld [vmem:[#allocation3 + $0x8] ss:$8 sps:$4 sm:$0xff]  }
 0x1ef   : > { %5366 = vmatpush3.bf16.msra.mxu0 %v5745_v29  ;;  %v4631_v29 = vrot.slane %v4620_v13, 9  ;;  %v4622_v31 = vcombine.low %v2378_v19, %v2378_v19  ;;  %v4874_v33 = vrot.slane %v4858_v20, 9  ;;  %v3862_v35 = vrot.slane %v4859_v41, 5  ;;  %v5788_v16 = vld [vmem:[%s6852_s2 + $0x230] sm:$0xff]   ;;  %v5777_v20 = vld [vmem:[%s6852_s2 + $0xe0] sm:$0xff]  }
 0x1f0   : > { %5242 = vmatpush3.bf16.msra.mxu1 %v5741_v36  ;;  %5367 = vmatprep.subr.bf16.mxu0 %v5749_v55  ;;  %v3643_v36 = vsel %vm6400_vm10, %v3638_v22, %v3642_v50  ;;  %v3657_v37 = vsel %vm6400_vm10, %v3652_v23, %v3656_v18  ;;  %v4875_v39 = vrot.slane %v4860_v24, 9  ;;  %v3866_v40 = vrot.slane %v4861_v25, 5  ;;  %v3817_v50 = vld [vmem:[#allocation3 + $0x38] sm:$0x1e]  ;;  %v6673_v22 = vld [vmem:[#allocation3 + $0x8] sm:$0x1f] }
 0x1f1   : > { %5243 = vmatprep.subr.bf16.mxu1 %v5743_v53  ;;  %v4623_v44 = vcombine.high %v2378_v19, %v2378_v19  ;;  %v4624_v45 = vcombine.low %v2379_v3, %v2379_v3  ;;  %v4625_v46 = vcombine.high %v2379_v3, %v2379_v3  ;;  %v2446_v57 = vsel %vm6428_vm13, %v4631_v29, %v2445_v30  ;;  %v6675_v23 = vld [vmem:[#allocation3 + $0x10] sm:$0x1f]  ;;  %v5794_v24 = vld [vmem:[%s6852_s2 + $0x238] sm:$0xff]   ;;  %v3819_v30 = vld [vmem:[#allocation3 + $0x48] sm:$0x1e] }
 0x1f2   : > { %v4651_v58 = vcombine.low %v2434_v27, %v2438_v14  ;;  %v3863_v59 = vsel %vm6428_vm13, %v4874_v33, %v3862_v35  ;;  %v3867_v47 = vsel %vm6428_vm13, %v4875_v39, %v3866_v40  ;;  %v4632_v60 = vrot.slane %v4622_v31, 9  ;;  %v3818_v27 = vld [vmem:[#allocation3 + $0x40] sm:$0x1e]  ;;  %v5783_v14 = vld [vmem:[%s6852_s2 + $0xe8] sm:$0xff]  }
 0x1f3   : > { %5368 = vmatpush3.bf16.msra.mxu0 %v5749_v55  ;;  %v2442_v55 = vsel %vm6428_vm13, %v4630_v5, %v2441_v28  ;;  %v2449_v61 = vrot.slane %v4623_v44, 5  ;;  %v4633_v62 = vrot.slane %v4624_v45, 9  ;;  %v2453_v48 = vrot.slane %v4625_v46, 5  ;;  %v5793_v44 = vld [vmem:[%s6852_s2 + $0xf0] sm:$0xff]  }
 0x1f4   : > { %5244 = vmatpush3.bf16.msra.mxu1 %v5743_v53  ;;  %5377 = vmatprep.subr.bf16.mxu0 %v5756_v54  ;;  %v4849_v53 = vcombine.low %v3643_v36, %v3657_v37  ;;  %v4652_v49 = vcombine.low %v2442_v55, %v2446_v57  ;;  %v4898_v34 = vcombine.low %v3863_v59, %v3867_v47 }
 0x1f5   : > { %5245 = vmatprep.subr.bf16.mxu1 %v5748_v10  ;;  %v2450_v42 = vsel %vm6428_vm13, %v4632_v60, %v2449_v61  ;;  %v2454_v1 = vsel %vm6428_vm13, %v4633_v62, %v2453_v48  ;;  %v4862_v9 = vcombine.low %v3814_v51, %v3814_v51  ;;  %v4868_v18 = vcombine.low %v3817_v50, %v3817_v50 }
 0x1f6   : > { %5370 = vmatmul.mubr.bf16.vlgmr.msra.gmra.mrb[0].mxu0 %v4847_v7  ;;  %v4653_v2 = vcombine.low %v2450_v42, %v2454_v1  ;;  %v3816_v7 = vld [vmem:[#allocation3 + $0x30] sm:$0x1e]  ;;  %v4869_v19 = vcombine.high %v3817_v50, %v3817_v50  ;;  %v4690_v31 = vcombine.low %v6673_v22, %v6673_v22  ;;  %v4692_v33 = vcombine.low %v6675_v23, %v6675_v23 }
 0x1f7   : > { %5378 = vmatpush3.bf16.msra.mxu0 %v5756_v54  ;;  %5373 = vmatprep.mubr.bf16.mxu0 %v4848_v17  ;;  %v3815_v54 = vld [vmem:[#allocation3 + $0x28] sm:$0x1e]  ;;  %v4866_v13 = vcombine.low %v3816_v7, %v3816_v7  ;;  %v4867_v17 = vcombine.high %v3816_v7, %v3816_v7  ;;  %v4876_v41 = vrot.slane %v4862_v9, 9  ;;  %v4879_v28 = vrot.slane %v4868_v18, 9  ;;  %v5810_v9 = vld [vmem:[#allocation3 + $0x18] ss:$8 sps:$4 sm:$0xff]  }
 0x1f8   : > { %5246 = vmatpush3.bf16.msra.mxu1 %v5748_v10  ;;  %5379 = vmatprep.subr.bf16.mxu0 %v5766_v26  ;;  %v4863_v10 = vcombine.high %v3814_v51, %v3814_v51  ;;  %v4864_v11 = vcombine.low %v3815_v54, %v3815_v54  ;;  %v4865_v12 = vcombine.high %v3815_v54, %v3815_v54  ;;  %v3882_v29 = vrot.slane %v4869_v19, 5  ;;  %v2781_v18 = vld [vmem:[#allocation3 + $0x18] sm:$0x1f]  ;;  %v2782_v19 = vld [vmem:[#allocation3 + $0x20] sm:$0x1f] }
 0x1f9   : > { %5247 = vmatprep.subr.bf16.mxu1 %v5751_v21  ;;  %v4878_v3 = vrot.slane %v4866_v13, 9  ;;  %v3878_v5 = vrot.slane %v4867_v17, 5  ;;  %v4870_v36 = vcombine.low %v3818_v27, %v3818_v27  ;;  %v4871_v39 = vcombine.high %v3818_v27, %v3818_v27 }
 0x1fa   : > { %v4877_v25 = vrot.slane %v4864_v11, 9  ;;  %v4872_v40 = vcombine.low %v3819_v30, %v3819_v30  ;;  %v3883_v46 = vsel %vm6428_vm13, %v4879_v28, %v3882_v29  ;;  %v2831_v55 = vshll.u32 %v4690_v31, 16  ;;  %v5828_v11 = vld [vmem:[#allocation3 + $0x28] ss:$8 sps:$4 sm:$0xff]   ;;  %v5822_v28 = vld [vmem:[%s6852_s2 + $0x118] sm:$0xff]  }
 0x1fb   : > { %5380 = vmatpush3.bf16.msra.mxu0 %v5766_v26  ;;  %v3874_v26 = vrot.slane %v4865_v12, 5  ;;  %v3879_v45 = vsel %vm6428_vm13, %v4878_v3, %v3878_v5  ;;  %v2842_v57 = vshrl.u32 %v4692_v33, 16  ;;  %v4880_v59 = vrot.slane %v4870_v36, 9  ;;  %v5824_v36 = vld [vmem:[%s6852_s2 + $0x120] sm:$0xff]  }
 0x1fc   : > { %5248 = vmatpush3.bf16.msra.mxu1 %v5751_v21  ;;  %5381 = vmatprep.subr.bf16.mxu0 %v5772_v43  ;;  %v3870_v21 = vrot.slane %v4863_v10, 5  ;;  %v4900_v47 = vcombine.low %v3879_v45, %v3883_v46  ;;  %v3886_v60 = vrot.slane %v4871_v39, 5  ;;  %v4881_v61 = vrot.slane %v4872_v40, 9  ;;  %v5821_v10 = vld [vmem:[%s6066_s20 + $0xd8] ss:$8 sps:$4 sm:$0xff]  }
 0x1fd   : > { %5257 = vmatprep.subr.bf16.mxu1 %v5765_v52  ;;  %v3875_v37 = vsel %vm6428_vm13, %v4877_v25, %v3874_v26  ;;  %v2844_v42 = vrot.slane %v2842_v57, 4  ;;  %v5825_v25 = vld [vmem:[%s6066_s20 + $0xf8] ss:$8 sps:$4 sm:$0xff]   ;;  %v4694_v27 = vcombine.low %v2781_v18, %v2781_v18  ;;  %v4696_v3 = vcombine.low %v2782_v19, %v2782_v19  ;;  %v5827_v46 = vld [vmem:[%s6066_s20 + $0x108] ss:$8 sps:$4 sm:$0xff]  }
 0x1fe   : > { %5374 = vmatmul.mubr.bf16.gmra.mrb[4].mxu0 %v4849_v53  ;;  %v3871_v35 = vsel %vm6428_vm13, %v4876_v41, %v3870_v21  ;;  %v2828_v53 = vshrl.u32 %v4690_v31, 16  ;;  %v5829_v26 = vld [vmem:[#allocation3 + $0x38] ss:$8 sps:$4 sm:$0xff]  }
 0x1ff   : > { %5250 = vmatmul.mubr.bf16.vlgmr.msra.gmra.mrb[0].mxu1 %v4651_v58  ;;  %5382 = vmatpush3.bf16.msra.mxu0 %v5772_v43  ;;  %v4873_v43 = vcombine.high %v3819_v30, %v3819_v30  ;;  %v2845_v58 = vshll.u32 %v4692_v33, 16  ;;  %v2859_v31 = vshll.u32 %v4694_v27, 16  ;;  %v2870_v33 = vshrl.u32 %v4696_v3, 16  ;;  %v2786_v45 = vld [vmem:[#allocation3 + $0x40] sm:$0x1f] }
 0x200   : > { %5258 = vmatpush3.bf16.msra.mxu1 %v5765_v52  ;;  %5383 = vmatprep.subr.bf16.mxu0 %v5774_v15  ;;  %v4055_v52 = vld [vmem:[%s6853_s3] sm:$0xf] }
 0x201   : > { %5259 = vmatprep.subr.bf16.mxu1 %v5771_v63  ;;  %5253 = vmatprep.mubr.bf16.mxu1 %v4652_v49  ;;  %v3890_v62 = vrot.slane %v4873_v43, 5  ;;  %v4091_v48 = vsel %vm4089_vm14, %v4055_v52, 0  ;;  %v4693_v49 = vcombine.high %v6675_v23, %v6675_v23  ;;  %v2847_v1 = vrot.slane %v2845_v58, 5  ;;  %v2783_v23 = vld [vmem:[#allocation3 + $0x28] sm:$0x1f] }
 0x202   : > { %5393 = vmatprep.mubr.bf16.mxu0 %v4898_v34  ;;  %v5803_v34 = vld [vmem:[%s6852_s2 + $0xf8] sm:$0xff]   ;;  %v4698_v29 = vcombine.low %v2783_v23, %v2783_v23  ;;  %v2861_v57 = vrot.slane %v2859_v31, 5  ;;  %v2872_v58 = vrot.slane %v2870_v33, 4 }
 0x203   : > { %5384 = vmatpush3.bf16.msra.mxu0 %v5774_v15  ;;  %v4899_v15 = vcombine.low %v3871_v35, %v3875_v37  ;;  %v3891_v51 = vsel %vm6428_vm13, %v4881_v61, %v3890_v62  ;;  %v2873_v35 = vshll.u32 %v4696_v3, 16  ;;  %v2785_v37 = vld [vmem:[#allocation3 + $0x38] sm:$0x1f]  ;;  %v4704_v61 = vcombine.low %v2786_v45, %v2786_v45  ;;  %v5826_v62 = vld [vmem:[%s6852_s2 + $0x128] sm:$0xff]  }
 0x204   : > { %5260 = vmatpush3.bf16.msra.mxu1 %v5771_v63  ;;  %5385 = vmatprep.subr.bf16.mxu0 %v5776_v0  ;;  %v4691_v63 = vcombine.high %v6673_v22, %v6673_v22  ;;  %v5823_v22 = vld [vmem:[%s6066_s20 + $0xe8] ss:$8 sps:$4 sm:$0xff]   ;;  %v2884_v39 = vshrl.u32 %v4698_v29, 16  ;;  %v2887_v40 = vshll.u32 %v4698_v29, 16 }
 0x205   : > { %5261 = vmatprep.subr.bf16.mxu1 %v5773_v6 }
 0x206   : > { %v2837_v7 = vshll.u32 %v4691_v63, 16  ;;  %v2889_v63 = vrot.slane %v2887_v40, 5 }
 0x207   : > { %5386 = vmatpush3.bf16.msra.mxu0 %v5776_v0  ;;  %5254 = vmatmul.mubr.bf16.gmra.mrb[4].mxu1 %v4653_v2  ;;  %v2833_v0 = vrot.slane %v2831_v55, 5  ;;  %v3887_v2 = vsel %vm6428_vm13, %v4880_v59, %v3886_v60  ;;  %v4699_v59 = vcombine.high %v2783_v23, %v2783_v23  ;;  %v4702_v60 = vcombine.low %v2785_v37, %v2785_v37 }
 0x208   : > { %5262 = vmatpush3.bf16.msra.mxu1 %v5773_v6  ;;  %5387 = vmatprep.subr.bf16.mxu0 %v5778_v4  ;;  %v2830_v6 = vrot.slane %v2828_v53, 4  ;;  %v4901_v50 = vcombine.low %v3887_v2, %v3891_v51  ;;  %v2839_v13 = vrot.slane %v2837_v7, 5  ;;  %v4697_v53 = vcombine.high %v2782_v19, %v2782_v19  ;;  %v5830_v7 = vld [vmem:[%s6852_s2 + $0x130] sm:$0xff]  }
 0x209   : > { %5263 = vmatprep.subr.bf16.mxu1 %v5775_v8  ;;  %5273 = vmatprep.mubr.bf16.mxu1 %v5808_v38  ;;  %v2851_v38 = vshll.u32 %v4693_v49, 16  ;;  %v2912_v2 = vshrl.u32 %v4702_v60, 16  ;;  %v2915_v51 = vshll.u32 %v4702_v60, 16 }
 0x20a   : > { %v2834_v54 = vor.u32 %v2833_v0, %v2830_v6  ;;  %v2879_v0 = vshll.u32 %v4697_v53, 16 }
 0x20b   : > { %5388 = vmatpush3.bf16.msra.mxu0 %v5778_v4  ;;  %v5809_v4 = vld [vmem:[%s6852_s2 + $0x100] sm:$0xff]   ;;  %v2853_v17 = vrot.slane %v2851_v38, 5  ;;  %v2893_v38 = vshll.u32 %v4699_v59, 16 }
 0x20c   : > { %5264 = vmatpush3.bf16.msra.mxu1 %v5775_v8  ;;  %5389 = vmatprep.subr.bf16.mxu0 %v5788_v16  ;;  %v2848_v8 = vor.u32 %v2847_v1, %v2844_v42  ;;  %v2835_v12 = vrot.slane %v2834_v54, 4  ;;  %v2929_v54 = vshll.u32 %v4704_v61, 16 }
 0x20d   : > { %5265 = vmatprep.subr.bf16.mxu1 %v5777_v20 }
 0x20e   : > { %v2840_v41 = vsel %vm6400_vm10, %v2835_v12, %v2839_v13  ;;  %v4703_v13 = vcombine.high %v2785_v37, %v2785_v37 }
 0x20f   : > { %5390 = vmatpush3.bf16.msra.mxu0 %v5788_v16  ;;  %v2849_v16 = vrot.slane %v2848_v8, 4 }
 0x210   : > { %5266 = vmatpush3.bf16.msra.mxu1 %v5777_v20  ;;  %5391 = vmatprep.subr.bf16.mxu0 %v5794_v24  ;;  %v5820_v20 = vld [vmem:[%s6852_s2 + $0x110] sm:$0xff]  }
 0x211   : > { %5267 = vmatprep.subr.bf16.mxu1 %v5783_v14  ;;  %v2854_v21 = vsel %vm6400_vm10, %v2849_v16, %v2853_v17  ;;  %v4705_v16 = vcombine.high %v2786_v45, %v2786_v45  ;;  %v2914_v17 = vrot.slane %v2912_v2, 4 }
 0x212   : > { %v4722_v5 = vcombine.low %v2840_v41, %v2854_v21  ;;  %v5831_v41 = vld [vmem:[%s6852_s2 + $0x138] sm:$0xff]  }
 0x213   : > { %5392 = vmatpush3.bf16.msra.mxu0 %v5794_v24  ;;  %v2784_v24 = vld [vmem:[#allocation3 + $0x30] sm:$0x1f] }
 0x214   : > { %5268 = vmatpush3.bf16.msra.mxu1 %v5783_v14  ;;  %5559 = vmatprep.subr.msk.bf16.mxu0 %vm4089_vm14, %v4055_v52  ;;  %v4700_v30 = vcombine.low %v2784_v24, %v2784_v24  ;;  %v2856_v14 = vshrl.u32 %v4694_v27, 16  ;;  %v4695_v52 = vcombine.high %v2781_v18, %v2781_v18  ;;  %v2917_v18 = vrot.slane %v2915_v51, 5 }
 0x215   : > { %5269 = vmatprep.subr.bf16.mxu1 %v5793_v44 }
 0x216   : > { %5394 = vmatmul.mubr.bf16.vlgmr.msra.gmra.mrb[0].mxu0 %v4899_v15  ;;  %v2898_v43 = vshrl.u32 %v4700_v30, 16  ;;  %v2858_v55 = vrot.slane %v2856_v14, 4  ;;  %v2875_v15 = vrot.slane %v2873_v35, 5  ;;  %v2865_v6 = vshll.u32 %v4695_v52, 16 }
 0x217   : > { %5397 = vmatprep.mubr.bf16.mxu0 %v4900_v47  ;;  %5402 = vmatpush3.bf16.msra.mxu0 %v4091_v48  ;;  %v4701_v47 = vcombine.high %v2784_v24, %v2784_v24  ;;  %v2886_v48 = vrot.slane %v2884_v39, 4  ;;  %v2918_v3 = vor.u32 %v2917_v18, %v2914_v17 }
 0x218   : > { %5270 = vmatpush3.bf16.msra.mxu1 %v5793_v44  ;;  %v2901_v44 = vshll.u32 %v4700_v30, 16  ;;  %v2900_v49 = vrot.slane %v2898_v43, 4  ;;  %v2862_v42 = vor.u32 %v2861_v57, %v2858_v55  ;;  %v2876_v1 = vor.u32 %v2875_v15, %v2872_v58 }
 0x219   : > { %5271 = vmatprep.subr.bf16.mxu1 %v5803_v34  ;;  %v2890_v8 = vor.u32 %v2889_v63, %v2886_v48  ;;  %v2919_v35 = vrot.slane %v2918_v3, 4 }
 0x21a   : > { %v2877_v12 = vrot.slane %v2876_v1, 4 }
 0x21b   : > { %v2891_v21 = vrot.slane %v2890_v8, 4 }
 0x21c   : > { %5272 = vmatpush3.bf16.msra.mxu1 %v5803_v34  ;;  %v2903_v34 = vrot.slane %v2901_v44, 5 }
 0x21d   : > { %5281 = vmatprep.subr.bf16.mxu1 %v5809_v4 }
 0x21e   : > { %5398 = vmatmul.mubr.bf16.gmra.mrb[4].mxu0 %v4901_v50  ;;  %v2904_v50 = vor.u32 %v2903_v34, %v2900_v49 }
 0x21f   : > { %5274 = vmatmul.mubr.bf16.vlgmr.msra.gmra.mrb[0].mxu1 %v5810_v9  ;;  %5403 = vmatprep.mubr.msk.bf16.mxu0 %vm4076_vm15, %v5821_v10  ;;  %v2907_v9 = vshll.u32 %v4701_v47, 16  ;;  %v2867_v10 = vrot.slane %v2865_v6, 5 }
 0x220   : > { %5282 = vmatpush3.bf16.msra.mxu1 %v5809_v4  ;;  %5277 = vmatprep.mubr.bf16.mxu1 %v5828_v11  ;;  %v2926_v4 = vshrl.u32 %v4704_v61, 16  ;;  %v2881_v11 = vrot.slane %v2879_v0, 5  ;;  %v2905_v23 = vrot.slane %v2904_v50, 4 }
 0x221   : > { %5283 = vmatprep.subr.bf16.mxu1 %v5815_v56  ;;  %v2909_v24 = vrot.slane %v2907_v9, 5 }
 0x222   : > { %v2928_v19 = vrot.slane %v2926_v4, 4  ;;  %v2882_v27 = vsel %vm6400_vm10, %v2877_v12, %v2881_v11 }
 0x223   : > { %v2910_v30 = vsel %vm6400_vm10, %v2905_v23, %v2909_v24 }
 0x224   : > { %5284 = vmatpush3.bf16.msra.mxu1 %v5815_v56  ;;  %v2863_v56 = vrot.slane %v2862_v42, 4 }
 0x225   : > { %5285 = vmatprep.subr.bf16.mxu1 %v5820_v20 }
 0x226   : > { %5404 = vmatmul.mubr.msk.bf16.vlgmr.msra.gmra.mrb[0].mxu0 %vm4076_vm15, %v5823_v22  ;;  %v2895_v22 = vrot.slane %v2893_v38, 5 }
 0x227   : > { %5407 = vmatprep.mubr.msk.bf16.mxu0 %vm4076_vm15, %v5825_v25  ;;  %5278 = vmatmul.mubr.bf16.gmra.mrb[4].mxu1 %v5829_v26  ;;  %v2868_v25 = vsel %vm6400_vm10, %v2863_v56, %v2867_v10  ;;  %v2921_v26 = vshll.u32 %v4703_v13, 16 }
 0x228   : > { %5286 = vmatpush3.bf16.msra.mxu1 %v5820_v20  ;;  %5297 = vmatprep.mubr.bf16.mxu1 %v4722_v5  ;;  %v2931_v20 = vrot.slane %v2929_v54, 5  ;;  %v2896_v29 = vsel %vm6400_vm10, %v2891_v21, %v2895_v22  ;;  %v4723_v14 = vcombine.low %v2868_v25, %v2882_v27 }
 0x229   : > { %5287 = vmatprep.subr.bf16.mxu1 %v5822_v28  ;;  %v2923_v31 = vrot.slane %v2921_v26, 5  ;;  %v4724_v33 = vcombine.low %v2896_v29, %v2910_v30 }
 0x22a   : > { %v2932_v5 = vor.u32 %v2931_v20, %v2928_v19 }
 0x22b   : > { %v2924_v39 = vsel %vm6400_vm10, %v2919_v35, %v2923_v31  ;;  %v4190_v35 = vld [vmem:[#allocation5] sm:$0x1] }
 0x22c   : > { %5288 = vmatpush3.bf16.msra.mxu1 %v5822_v28  ;;  %v2935_v28 = vshll.u32 %v4705_v16, 16 }
 0x22d   : > { %5289 = vmatprep.subr.bf16.mxu1 %v5824_v36 }
 0x22e   : > { %5408 = vmatmul.mubr.msk.bf16.gmra.mrb[4].mxu0 %vm4076_vm15, %v5827_v46  ;;  %v2937_v37 = vrot.slane %v2935_v28, 5 }
 0x230   : > { %5290 = vmatpush3.bf16.msra.mxu1 %v5824_v36  ;;  %v2933_v36 = vrot.slane %v2932_v5, 4 }
 0x231   : > { %5291 = vmatprep.subr.bf16.mxu1 %v5826_v62 }
 0x232   : > { %v2938_v40 = vsel %vm6400_vm10, %v2933_v36, %v2937_v37 }
 0x233   : > { %v4725_v43 = vcombine.low %v2924_v39, %v2938_v40 }
 0x234   : > { %5292 = vmatpush3.bf16.msra.mxu1 %v5826_v62 }
 0x235   : > { %5293 = vmatprep.subr.bf16.mxu1 %v5830_v7 }
 0x238   : > { %5294 = vmatpush3.bf16.msra.mxu1 %v5830_v7 }
 0x239   : > { %5295 = vmatprep.subr.bf16.mxu1 %v5831_v41 }
 0x23c   : > { %5296 = vmatpush3.bf16.msra.mxu1 %v5831_v41 }
 0x23f   : > { %5298 = vmatmul.mubr.bf16.vlgmr.msra.gmra.mrb[0].mxu1 %v4723_v14  ;;  %v4174_v14 = vld [vmem:[#allocation4] sm:$0x1] }
 0x240   : > { %5301 = vmatprep.mubr.bf16.mxu1 %v4724_v33 }
 0x247   : > { %5302 = vmatmul.mubr.bf16.gmra.mrb[4].mxu1 %v4725_v43 }
 0x2f9   : > { %v5405_v44 = vpop.f32.mrb[0].mxu0 }
 0x2fa   : > { %v4127_v45 = vpop.f32.mrb[1].mxu0 }
 0x2fb   : > { %v5406_v46 = vpop.f32.mrb[2].mxu0 }
 0x2fc   : > { %v4130_v52 = vpop.f32.mrb[3].mxu0 }
 0x301   : > { %v5409_v53 = vpop.f32.mrb[4].mxu0 }
 0x302   : > { %v4143_v55 = vpop.f32.mrb[5].mxu0 }
 0x303   : > { %v5410_v57 = vpop.f32.mrb[6].mxu0 }
 0x304   : > { %v4146_v58 = vpop.f32.mrb[7].mxu0 }
 0x312   : > { %v5299_v15 = vpop.f32.mrb[0].mxu1 }
 0x313   : > { %v5477_v59 = vadd.f32 %v5405_v44, %v5299_v15  ;;  %v3054_v47 = vpop.f32.mrb[1].mxu1 }
 0x314   : > { %v5478_v60 = vadd.f32 %v4127_v45, %v3054_v47  ;;  %v5300_v32 = vpop.f32.mrb[2].mxu1 }
 0x315   : > { %4168 = vst [vmem:[%s6341_s18 + $0x10] sm:$0xff] %v5477_v59  ;;  %v5479_v61 = vadd.f32 %v5406_v46, %v5300_v32  ;;  %v3057_v62 = vpop.f32.mrb[3].mxu1  ;;  %v4193_v6 = vmul.f32 %v5477_v59, %v5477_v59 }
 0x316   : > { %4166 = vst [vmem:[%s6341_s18] sm:$0xff] %v5478_v60  ;;  %v5480_v48 = vadd.f32 %v4130_v52, %v3057_v62  ;;  %v4191_v63 = vmul.f32 %v5478_v60, %v5478_v60 }
 0x317   : > { %4169 = vst [vmem:[%s6341_s18 + $0x18] sm:$0xff] %v5479_v61  ;;  %v4194_v4 = vmul.f32 %v5479_v61, %v5479_v61 }
 0x318   : > { %4167 = vst [vmem:[%s6341_s18 + $0x8] sm:$0xff] %v5480_v48  ;;  %v4175_v49 = vadd.f32 %v5480_v48, %v5478_v60  ;;  %v4192_v34 = vmul.f32 %v5480_v48, %v5480_v48 }
 0x31a   : > { %v4176_v0 = vadd.f32 %v5477_v59, %v4175_v49  ;;  %v4199_v42 = vadd.f32 %v4192_v34, %v4191_v63  ;;  %v5303_v1 = vpop.f32.mrb[4].mxu1 }
 0x31b   : > { %v5481_v2 = vadd.f32 %v5409_v53, %v5303_v1  ;;  %v3070_v51 = vpop.f32.mrb[5].mxu1 }
 0x31c   : > { %v4200_v54 = vadd.f32 %v4199_v42, %v4193_v6  ;;  %v5482_v7 = vadd.f32 %v4143_v55, %v3070_v51  ;;  %v4177_v8 = vadd.f32 %v5479_v61, %v4176_v0  ;;  %v5304_v38 = vpop.f32.mrb[6].mxu1 }
 0x31d   : > { %4172 = vst [vmem:[%s6341_s18 + $0x30] sm:$0xff] %v5481_v2  ;;  %v5483_v50 = vadd.f32 %v5410_v57, %v5304_v38  ;;  %v3073_v9 = vpop.f32.mrb[7].mxu1  ;;  %v4197_v18 = vmul.f32 %v5481_v2, %v5481_v2 }
 0x31e   : > { %4170 = vst [vmem:[%s6341_s18 + $0x20] sm:$0xff] %v5482_v7  ;;  %v4178_v10 = vadd.f32 %v5482_v7, %v4177_v8  ;;  %v4195_v11 = vmul.f32 %v5482_v7, %v5482_v7  ;;  %v4201_v56 = vadd.f32 %v4200_v54, %v4194_v4  ;;  %v5484_v12 = vadd.f32 %v4146_v58, %v3073_v9 }
 0x31f   : > { %4173 = vst [vmem:[%s6341_s18 + $0x38] sm:$0xff] %v5483_v50  ;;  %v4198_v41 = vmul.f32 %v5483_v50, %v5483_v50 }
 0x320   : > { %v4202_v13 = vadd.f32 %v4201_v56, %v4195_v11  ;;  %4171 = vst [vmem:[%s6341_s18 + $0x28] sm:$0xff] %v5484_v12  ;;  %v4179_v16 = vadd.f32 %v5484_v12, %v4178_v10  ;;  %v4196_v17 = vmul.f32 %v5484_v12, %v5484_v12 }
 0x322   : > { %v4180_v19 = vadd.f32 %v5481_v2, %v4179_v16  ;;  %v4203_v20 = vadd.f32 %v4202_v13, %v4196_v17 }
 0x324   : > { %v4181_v21 = vadd.f32 %v5483_v50, %v4180_v19  ;;  %v4204_v22 = vadd.f32 %v4203_v20, %v4197_v18 }
 0x326   : > { %v4182_v23 = vrot.slane %v4181_v21, 4  ;;  %v4205_v24 = vadd.f32 %v4204_v22, %v4198_v41 }
 0x328   : > { %v4183_v25 = vadd.f32 %v4182_v23, %v4181_v21  ;;  %v4206_v26 = vrot.slane %v4205_v24, 4 }
 0x32a   : > { %v4184_v27 = vrot.slane %v4183_v25, 2  ;;  %v4207_v3 = vadd.f32 %v4206_v26, %v4205_v24 }
 0x32c   : > { %v4185_v5 = vadd.f32 %v4184_v27, %v4183_v25  ;;  %v4208_v28 = vrot.slane %v4207_v3, 2 }
 0x32e   : > { %v4186_v29 = vrot.slane %v4185_v5, 1  ;;  %v4209_v30 = vadd.f32 %v4208_v28, %v4207_v3 }
 0x330   : > { %v4187_v31 = vadd.f32 %v4186_v29, %v4185_v5  ;;  %v4210_v33 = vrot.slane %v4209_v30, 1 }
 0x332   : > { %v4188_v36 = vadd.f32 %v4187_v31, %v4174_v14  ;;  %v4211_v37 = vadd.f32 %v4210_v33, %v4209_v30 }
 0x334   : > { %4189 = vst [vmem:[#allocation4] sm:$0x1] %v4188_v36  ;;  %v4212_v39 = vadd.f32 %v4211_v37, %v4190_v35 }
 0x336   : > { %4213 = vst [vmem:[#allocation5] sm:$0x1] %v4212_v39 }
 0x337 PF: > { %p4926_p6 = scmp.ne.s32.totalorder %s5932_s25, 2 }
 0x338   : > { %p4927_p7 = scmp.ne.s32.totalorder (!%p4926_p6), %s5928_s24, 0 }
 0x339   : > { %4217 = sbr.rel (%p4926_p6) target bundleno = 874 (0x36a), region = 64 }
 0x340   : > { %4220 = sbr.rel (%p4927_p7) target bundleno = 859 (0x35b), region = 68  ;;  %v4221_v40 = vld [vmem:[#allocation4] sm:$0x1] (!%p4927_p7)  ;;  %v4223_v43 = vld [vmem:[#allocation5] sm:$0x1] (!%p4927_p7)  ;;  %v5949_v46 = vmov (!%p4927_p7), 0.0  }
 0x341   : > { %v4222_v44 = vmul.f32 (!%p4927_p7), 0.0078125, %v4221_v40  ;;  %v4224_v45 = vmul.f32 (!%p4927_p7), 0.0078125, %v4223_v43  ;;  %4236 = vst [vmem:[#allocation4] sm:$0x1] (!%p4927_p7), %v5949_v46  ;;  %4237 = vst [vmem:[#allocation5] sm:$0x1] (!%p4927_p7), %v5949_v46 }
 0x342   : > { %v4227_v57 = vld [vmem:[%s6854_s4] sm:$0x1] (!%p4927_p7) }
 0x343   : > { %v4225_v52 = vmul.f32 (!%p4927_p7), %v4222_v44, %v4222_v44  ;;  %v4232_v59 = vld [vmem:[%s6855_s5] sm:$0x1] (!%p4927_p7) }
 0x345   : > { %v4226_v53 = vsub.f32 (!%p4927_p7), %v4224_v45, %v4225_v52 }
 0x347   : > { %v4228_v55 = vadd.f32 1e-05, %v4226_v53 }
 0x349   : > { %5848 = vrsqrt.f32 %v4228_v55 }
 0x353   : > { %v5849_v58 = vpop.eup %5848 }
 0x354   : > { %v4230_v15 = vmul.f32 %v5849_v58, %v4227_v57 }
 0x356   : > { %4231 = vst [vmem:[#allocation6] sm:$0x1] %v4230_v15  ;;  %v4233_v47 = vmul.f32 %v4230_v15, %v4222_v44 }
 0x358   : > { %v4234_v60 = vsub.f32 %v4232_v59, %v4233_v47 }
 0x35a   : > { %4235 = vst [vmem:[#allocation7] sm:$0x1] %v4234_v60 }
 0x35b PF: > { %s4928_s15 = sshll.u32 %s5928_s24, 6 }
 0x35c   : > { %s4239_s16 = scalar_lea.vmem [#allocation2], %s4928_s15 }
 0x35d   : > { %v4929_v32 = vld [vmem:[#allocation6] ss:$0 sm:$0xff]  ;;  %v4240_v62 = vld [vmem:[%s4239_s16] sm:$0xff]  ;;  %v4241_v48 = vld [vmem:[%s4239_s16 + $0x8] sm:$0xff] }
 0x35e   : > { %v4242_v63 = vld [vmem:[%s4239_s16 + $0x10] sm:$0xff]  ;;  %v4255_v49 = vmul.f32 %v4929_v32, %v4240_v62  ;;  %v4256_v34 = vmul.f32 %v4929_v32, %v4241_v48  ;;  %v4243_v0 = vld [vmem:[%s4239_s16 + $0x18] sm:$0xff]  ;;  %v4244_v42 = vld [vmem:[%s4239_s16 + $0x20] sm:$0xff] }
 0x35f   : > { %v4257_v6 = vmul.f32 %v4929_v32, %v4242_v63  ;;  %v4245_v1 = vld [vmem:[%s4239_s16 + $0x28] sm:$0xff]  ;;  %v4258_v2 = vmul.f32 %v4929_v32, %v4243_v0  ;;  %v4259_v51 = vmul.f32 %v4929_v32, %v4244_v42  ;;  %v4246_v54 = vld [vmem:[%s4239_s16 + $0x30] sm:$0xff]  ;;  %v4247_v7 = vld [vmem:[%s4239_s16 + $0x38] sm:$0xff] }
 0x360   : > { %v4260_v4 = vmul.f32 %v4929_v32, %v4245_v1  ;;  %v4261_v9 = vmul.f32 %v4929_v32, %v4246_v54  ;;  %v4262_v12 = vmul.f32 %v4929_v32, %v4247_v7 }
 0x361   : > { %v4930_v61 = vld [vmem:[#allocation7] ss:$0 sm:$0xff] }
 0x362   : > { %v4270_v8 = vadd.f32 %v4930_v61, %v4255_v49  ;;  %v4271_v38 = vadd.f32 %v4930_v61, %v4256_v34  ;;  %v4272_v50 = vadd.f32 %v4930_v61, %v4257_v6  ;;  %v4273_v10 = vadd.f32 %v4930_v61, %v4258_v2 }
 0x363   : > { %v4274_v11 = vadd.f32 %v4930_v61, %v4259_v51  ;;  %v4275_v56 = vadd.f32 %v4930_v61, %v4260_v4  ;;  %v4276_v18 = vadd.f32 %v4930_v61, %v4261_v9  ;;  %v4277_v21 = vadd.f32 %v4930_v61, %v4262_v12 }
 0x364   : > { %v4278_v13 = vmax.f32 %v4270_v8, 0.0  ;;  %v4279_v16 = vmax.f32 %v4271_v38, 0.0  ;;  %v4280_v17 = vmax.f32 %v4272_v50, 0.0  ;;  %v4281_v19 = vmax.f32 %v4273_v10, 0.0 }
 0x365   : > { %v4282_v20 = vmax.f32 %v4274_v11, 0.0  ;;  %v4283_v41 = vmax.f32 %v4275_v56, 0.0  ;;  %v4284_v22 = vmax.f32 %v4276_v18, 0.0  ;;  %v4285_v23 = vmax.f32 %v4277_v21, 0.0 }
 0x366   : > { %4286 = vst [vmem:[%s6068_s29] sm:$0xff] %v4278_v13  ;;  %4287 = vst [vmem:[%s6068_s29 + $0x8] sm:$0xff] %v4279_v16 }
 0x367   : > { %4288 = vst [vmem:[%s6068_s29 + $0x10] sm:$0xff] %v4280_v17  ;;  %4289 = vst [vmem:[%s6068_s29 + $0x18] sm:$0xff] %v4281_v19 }
 0x368   : > { %4290 = vst [vmem:[%s6068_s29 + $0x20] sm:$0xff] %v4282_v20  ;;  %4291 = vst [vmem:[%s6068_s29 + $0x28] sm:$0xff] %v4283_v41 }
 0x369   : > { %4292 = vst [vmem:[%s6068_s29 + $0x30] sm:$0xff] %v4284_v22  ;;  %4293 = vst [vmem:[%s6068_s29 + $0x38] sm:$0xff] %v4285_v23 }
 0x36a PF: > { %s4936_s17 = sshll.u32 %s5928_s24, 10  ;;  %s4308_s14 = sshll.u32 %s6068_s29, 4  ;;  %s6794_s14 = int_to_ptr.vmem [resolvable:$true] %s4308_s14 }
 0x36b   : > { %s6791_s30 = scalar_lea.hbm %s6856_s6, %s4936_s17  ;;  %s6868_s18 = sand.u32 1, %s5920_s22  }
 0x36c   : > { %s6798_s9 = scalar_lea.sflag [#allocation9], %s6868_s18  ;;  %s5850_s25 = scalar_lea.vmem %s6794_s14, 1024 }
 0x36d   : > { %p5851_p9 = scmp.ne.s32.totalorder %s6794_s14, %s5850_s25  ;;  %s5950_s24 = smov [#allocation8]  }
 0x36e   : > { %s5854_s10 = sshll.u32 %s5950_s24, 4  ;;  %s5855_s10 = int_to_ptr.vmem [resolvable:$false] %s5854_s10 }
 0x36f   : > { %p5852_p10 = pnand %p5851_p9, %p6040_p3  ;;  %s5856_s15 = scalar_lea.vmem %s5855_s10, 2048 }
 0x370   : > { %p5857_p12 = scmp.lt.s32.totalorder %s6794_s14, %s5855_s10  ;;  %p5858_p13 = scmp.lt.s32.totalorder %s5856_s15, %s5850_s25 }
 0x371   : > { %p5853_p11 = pneg %p5852_p10 }
 0x372   : > { %p5859_p0 = por %p5858_p13, %p5857_p12 }
 0x374   : > { %p5860_p1 = pnand %p5859_p0, %p5853_p11 }
 0x376   : > { %5863 = shalt.err (!%p5860_p1)
}
 0x377   : > { %s5864_s29 = scalar_lea.hbm %s6791_s30, 1024  ;;  %s5868_s20 = scalar_lea.hbm %s6856_s6, 2048 }
 0x378   : > { %p5865_p2 = scmp.ne.s32.totalorder %s6791_s30, %s5864_s29  ;;  %p5869_p6 = scmp.lt.u32.totalorder %s6791_s30, %s6856_s6 }
 0x379   : > { %p5870_p7 = scmp.lt.u32.totalorder %s5868_s20, %s5864_s29  ;;  %p5872_p10 = scmp.lt.u32.totalorder %s5864_s29, %s6791_s30 }
 0x37a   : > { %p5866_p4 = pnand %p5865_p2, %p6040_p3 }
 0x37b   : > { %p5871_p9 = por %p5870_p7, %p5869_p6 }
 0x37c   : > { %p5867_p5 = pneg %p5866_p4 }
 0x37d   : > { %p5873_p11 = por %p5872_p10, %p5871_p9 }
 0x37f   : > { %p5874_p12 = pnand %p5873_p11, %p5867_p5 }
 0x381   : > { %5877 = shalt.err (!%p5874_p12)
}
 0x382   : > { %s5951_s25 = smov 128   ;;  %s5952_s24 = smov 8  }
 0x383   : > { %5561 = dma.vmem_to_hbm [thread:$0]  (%p6040_p3), %s6794_s14, 1024, %s6791_s30, %s6798_s9, %s5951_s25, %s5951_s25, %s5952_s24  }
 0x384 PF: > { %p5567_p13 = scmp.ge.s32.totalorder %s5944_s28, 2  ;;  %s4323_s10 = sand.u32 1, %s5916_s21  }
 0x385   : > { %s4324_s15 = scalar_lea.sflag [#allocation9], %s4323_s10 }
 0x386   : > { %p5564_p0 = pnand %p5567_p13, %p6051_p8 }
 0x388   : > { %5911 = dma.done.wait (!%p5564_p0), %s4324_s15, 1024  }
 0x389   : > { %5913 = vsyncadd (!%p5564_p0), %s4324_s15, 4294966272  ;;  %s19_s28 = sadd.s32 1, %s5944_s28   ;;  %s6869_s21 = smov %s5920_s22 }
 0x38a   : > { %p16_p1 = scmp.ge.s32.totalorder %s19_s28, 8   ;;  %s6870_s22 = smov %s5924_s23 }
 0x38b   : > { %s6871_s23 = smov %s6049_s12  ;;  %s6872_s24 = smov %s5936_s26 }
 0x38c   : > { %s6873_s25 = smov %s5940_s27  ;;  %s6874_s26 = smov %s6877_s7 }
 0x38d   : > { %s6875_s27 = smov %s6881_s8  ;;  %18 = sbr.rel (!%p16_p1) target bundleno = 5 (0x5), region = 130 }
 0x394   :  { %4329 = vsyncpa [#allocation9], 1 }
 0x395   :  { %4331 = vsyncpa [#allocation9 + $0x1], 1 }

</bundles_post_ra>
